<compile_context>
chip_gen: v7x
topology: tpu7x:2x2x1
jax: 0.10.0
libtpu: 0.0.40
codegen_flags: <defaults>
</compile_context>

<pallas_src>
import math

import jax
import jax.numpy as jnp
from jax.experimental import pallas as pl
from jax.experimental.pallas import tpu as pltpu

# ---- model hyper-parameters (from MAA.__init__ defaults) ----
D_MODEL   = 64
TX_LAYERS = 2            # TransformerEncoder num_layers
NUM_HEADS = 4            # multi_query attention heads
HEAD_DIM  = D_MODEL // NUM_HEADS
DIM_FF    = 4 * D_MODEL  # TODO(synk): custom TransformerEncoder FFN width not given; standard 4x assumed
PHI_DIM   = 32           # kwargs['phi_dim']
LN_EPS    = 1e-5
LANE      = 128


def _round_up(x, m):
    return ((x + m - 1) // m) * m


def _pick_edge_tile(n_edges):
    # Review opts 6/9: keep >=2 tiles when possible for v7x megacore; use
    # larger tiles on big edge counts to amortize per-grid-step overhead.
    if n_edges <= 256:
        return 128
    if n_edges <= 4096:
        return 256
    return 512


def _vmem_limit_bytes(npad, edge_tile, n_tiles):
    # Review opts 5/7: raise the default scoped-VMEM limit explicitly (16 MiB
    # v5e / 32 MiB v6e,v7x) but never ask for more than v7x's 64 MiB physical.
    m_blk  = 2 * npad * npad * 2                    # double-buffered bf16 M block
    interm = edge_tile * npad * (2 * 2 + 2 * 4)     # bf16 one-hots + f32 gathered rows
    ffn    = edge_tile * DIM_FF * (4 + 2)           # f32 pre-ReLU + bf16 hidden
    acc    = n_tiles * edge_tile * LANE * 4         # (TILE,1) scratch pads to 128 lanes
    small  = 4 << 20                                # weights, norms, idx/out blocks
    est = m_blk + interm + ffn + acc + small + (8 << 20)
    return int(min(max(est, 32 << 20), 64 << 20))


def _layer_norm(x, g, b):
    mu = jnp.mean(x, axis=-1, keepdims=True)
    var = jnp.mean((x - mu) ** 2, axis=-1, keepdims=True)
    return (x - mu) * jax.lax.rsqrt(var + LN_EPS) * g + b


# ---------------------------------------------------------------------------
# Fused kernel: one-hot gather of M -> cosine score -> transformer -> g_phi1
#               -> accumulate over policy pairs -> g_phi2
# ---------------------------------------------------------------------------
def _make_fused_kernel(lm, beta):
    scale = beta / lm

    def kernel(src_ref, dst_ref,            # (TILE, 1) int32
               m_ref,                       # (1, Npad, Npad) bf16   M = S1 @ S2[pair]^T
               n1_ref,                      # (1, Npad) f32          ||S1[n,:]+eps||
               n2_ref,                      # (1, 1, Npad) f32       ||S2[pair][n,:]+eps||
               w_in_ref, b_in_ref,          # (1, 64)
               wa_ref, ba_ref,              # (L, 64, 64) bf16 / (L, 1, 64) f32
               ln1g_ref, ln1b_ref,          # (L, 1, 64)
               w1_ref, b1_ref,              # (L, 64, 256) bf16 / (L, 1, 256)
               w2_ref, b2_ref,              # (L, 256, 64) bf16 / (L, 1, 64)
               ln2g_ref, ln2b_ref,          # (L, 1, 64)
               w_out_ref, b_out_ref,        # (1, 64) / (1, 1)
               wp1_ref, bp1_ref, wp2_ref, bp2_ref,   # g_phi1
               wq1_ref, bq1_ref, wq2_ref, bq2_ref,   # g_phi2
               out_ref,                     # (TILE, 1) f32
               acc_ref):                    # (n_tiles, TILE, 1) f32 VMEM scratch
        j = pl.program_id(0)                # policy-pair axis (outer, "arbitrary")
        i = pl.program_id(1)                # edge-tile axis  (inner, "parallel")

        tile = src_ref.shape[0]
        npad = m_ref.shape[1]

        @pl.when(j == 0)
        def _():
            acc_ref[i] = jnp.zeros((tile, 1), jnp.float32)

        # ---- one-hot edge masks (cheap VPU work; rebuilt per step because the
        #      pair axis is outermost so M is DMA'd only once per pair) ----
        lane = jax.lax.broadcasted_iota(jnp.int32, (tile, npad), 1)
        msk_src = lane == src_ref[...]
        msk_dst = lane == dst_ref[...]
        oh_src = msk_src.astype(jnp.bfloat16)       # 0/1 are exact in bf16
        oh_dst = msk_dst.astype(jnp.bfloat16)

        # ---- structural cosine score from precomputed M and per-node norms ----
        m = m_ref[0]                                                       # (Npad, Npad) bf16
        rows_s = jnp.dot(oh_src, m, preferred_element_type=jnp.float32)    # M[src, :]
        rows_d = jnp.dot(oh_dst, m, preferred_element_type=jnp.float32)    # M[dst, :]
        num_fwd = jnp.sum(jnp.where(msk_dst, rows_s, 0.0), axis=-1, keepdims=True)  # M[src,dst]
        num_rev = jnp.sum(jnp.where(msk_src, rows_d, 0.0), axis=-1, keepdims=True)  # M[dst,src]

        n1 = n1_ref[...]                     # (1, Npad) f32
        n2 = n2_ref[0]                       # (1, Npad) f32
        n1_src = jnp.sum(jnp.where(msk_src, n1, 0.0), axis=-1, keepdims=True)
        n1_dst = jnp.sum(jnp.where(msk_dst, n1, 0.0), axis=-1, keepdims=True)
        n2_src = jnp.sum(jnp.where(msk_src, n2, 0.0), axis=-1, keepdims=True)
        n2_dst = jnp.sum(jnp.where(msk_dst, n2, 0.0), axis=-1, keepdims=True)

        # reference: out/D + out_rev/D_rev, D = ||S1[src]+eps|| * ||S2[dst]+eps||
        score = num_fwd / (n1_src * n2_dst) + num_rev / (n2_src * n1_dst)  # (TILE, 1)

        # ---- transformer encoder (seq_len == 1, folded multi-query attention) ----
        x = score * w_in_ref[...] + b_in_ref[...]                          # (TILE, 64) f32
        for l in range(TX_LAYERS):
            attn = jnp.dot(x.astype(jnp.bfloat16), wa_ref[l],
                           preferred_element_type=jnp.float32) + ba_ref[l]
            x = _layer_norm(x + attn, ln1g_ref[l], ln1b_ref[l])
            h = jnp.maximum(jnp.dot(x.astype(jnp.bfloat16), w1_ref[l],
                                    preferred_element_type=jnp.float32) + b1_ref[l],
                            0.0).astype(jnp.bfloat16)                      # bf16 hidden (opt 8)
            ffn = jnp.dot(h, w2_ref[l], preferred_element_type=jnp.float32) + b2_ref[l]
            x = _layer_norm(x + ffn, ln2g_ref[l], ln2b_ref[l])
        # d_model -> 1 projection as VPU multiply + lane reduce (no N=1 matmul)
        y = jnp.sum(x * w_out_ref[...], axis=-1, keepdims=True) + b_out_ref[...]

        # ---- g_phi1: Linear(1, phi) -> ReLU -> Linear(phi, 1) ----
        h1 = jnp.maximum(y * wp1_ref[...] + bp1_ref[...], 0.0)             # (TILE, 32)
        out_n = jnp.sum(h1 * wp2_ref[...], axis=-1, keepdims=True) + bp2_ref[...]

        acc = acc_ref[i] + scale * out_n
        acc_ref[i] = acc

        # ---- g_phi2: written every step; the last pair's write (the final
        #      visit of this output block) is the one that persists in HBM ----
        h2 = jnp.maximum(acc * wq1_ref[...] + bq1_ref[...], 0.0)
        out_ref[...] = jnp.sum(h2 * wq2_ref[...], axis=-1, keepdims=True) + bq2_ref[...]

    return kernel


def _full_spec(a):
    nd = a.ndim
    return pl.BlockSpec(a.shape, lambda j, i, _nd=nd: (0,) * _nd)


def fused_layer_forward(src, dst, m_stack, norm1, norm2_stack, tx, g1, g2,
                        *, lm, beta, edge_tile):
    e_pad = src.shape[0]
    npad = m_stack.shape[1]
    n_pairs = m_stack.shape[0]
    n_tiles = e_pad // edge_tile

    weights = (tx["w_in"], tx["b_in"], tx["wa"], tx["ba"], tx["ln1g"], tx["ln1b"],
               tx["w1"], tx["b1"], tx["w2"], tx["b2"], tx["ln2g"], tx["ln2b"],
               tx["w_out_t"], tx["b_out"]) + tuple(g1) + tuple(g2)

    kern = _make_fused_kernel(lm=lm, beta=beta)

    grid_spec = pltpu.PrefetchScalarGridSpec(
        num_scalar_prefetch=0,
        grid=(n_pairs, n_tiles),                                   # pair axis OUTERMOST (opt 4)
        in_specs=[
            pl.BlockSpec((edge_tile, 1), lambda j, i: (i, 0)),     # src indices
            pl.BlockSpec((edge_tile, 1), lambda j, i: (i, 0)),     # dst indices
            pl.BlockSpec((1, npad, npad), lambda j, i: (j, 0, 0)), # M[pair] (fetched once/pair)
            pl.BlockSpec((1, npad), lambda j, i: (0, 0)),          # norms of S[lid1]
            pl.BlockSpec((1, 1, npad), lambda j, i: (j, 0, 0)),    # norms of S[pair]
        ] + [_full_spec(w) for w in weights],
        out_specs=pl.BlockSpec((edge_tile, 1), lambda j, i: (i, 0)),
        scratch_shapes=[pltpu.VMEM((n_tiles, edge_tile, 1), jnp.float32)],
    )
    return pl.pallas_call(
        kern,
        out_shape=jax.ShapeDtypeStruct((e_pad, 1), jnp.float32),
        grid_spec=grid_spec,
        compiler_params=pltpu.CompilerParams(
            dimension_semantics=("arbitrary", "parallel"),
            vmem_limit_bytes=_vmem_limit_bytes(npad, edge_tile, n_tiles)),
    )(src, dst, m_stack, norm1, norm2_stack, *weights)


# ---------------------------------------------------------------------------
# Parameter init (deterministic, PyTorch-Linear-style uniform)
# ---------------------------------------------------------------------------
def _linear_init(key, fan_in, fan_out):
    k1, k2 = jax.random.split(key)
    bound = 1.0 / math.sqrt(fan_in)
    w = jax.random.uniform(k1, (fan_in, fan_out), jnp.float32, -bound, bound)
    b = jax.random.uniform(k2, (1, fan_out), jnp.float32, -bound, bound)
    return w, b


def init_params(key, n_layers):
    ks = jax.random.split(key, 4)
    w_in, b_in = _linear_init(ks[0], 1, D_MODEL)

    kl = jax.random.split(ks[1], 4 * TX_LAYERS)
    wa_l, ba_l, w1_l, b1_l, w2_l, b2_l = ([] for _ in range(6))
    for l in range(TX_LAYERS):
        # TODO(synk): Wq/Wk of the multi-query attention cancel for seq_len==1
        # (softmax over one key == 1); the attention collapses exactly to
        # x @ (Wv @ sum_h Wo_rowblock_h) + (bv @ Wo_fold + bo), precomputed here.
        wv, bv = _linear_init(kl[4 * l + 0], D_MODEL, HEAD_DIM)
        wo, bo = _linear_init(kl[4 * l + 1], D_MODEL, D_MODEL)
        wo_fold = sum(wo[h * HEAD_DIM:(h + 1) * HEAD_DIM] for h in range(NUM_HEADS))
        wa_l.append(wv @ wo_fold)            # [64, 64]
        ba_l.append(bv @ wo_fold + bo)       # [1, 64]
        w1, b1 = _linear_init(kl[4 * l + 2], D_MODEL, DIM_FF)
        w2, b2 = _linear_init(kl[4 * l + 3], DIM_FF, D_MODEL)
        w1_l.append(w1); b1_l.append(b1); w2_l.append(w2); b2_l.append(b2)

    w_out, b_out = _linear_init(ks[2], D_MODEL, 1)
    ones = jnp.ones((TX_LAYERS, 1, D_MODEL), jnp.float32)
    zeros = jnp.zeros((TX_LAYERS, 1, D_MODEL), jnp.float32)

    tx_params = dict(
        w_in=w_in, b_in=b_in,
        wa=jnp.stack(wa_l).astype(jnp.bfloat16), ba=jnp.stack(ba_l),
        ln1g=ones, ln1b=zeros,
        w1=jnp.stack(w1_l).astype(jnp.bfloat16), b1=jnp.stack(b1_l),
        w2=jnp.stack(w2_l).astype(jnp.bfloat16), b2=jnp.stack(b2_l),
        ln2g=ones, ln2b=zeros,
        w_out_t=w_out.T, b_out=b_out)        # w_out transposed -> lane reduce in-kernel

    kphi = jax.random.split(ks[3], 4 * n_layers)
    gphi1_params, gphi2_params = [], []
    for l in range(n_layers):
        wA1, bA1 = _linear_init(kphi[4 * l + 0], 1, PHI_DIM)
        wA2, bA2 = _linear_init(kphi[4 * l + 1], PHI_DIM, 1)
        gphi1_params.append((wA1, bA1, wA2.T, bA2))
        wB1, bB1 = _linear_init(kphi[4 * l + 2], 1, PHI_DIM)
        wB2, bB2 = _linear_init(kphi[4 * l + 3], PHI_DIM, 1)
        gphi2_params.append((wB1, bB1, wB2.T, bB2))
    return tx_params, gphi1_params, gphi2_params


# ---------------------------------------------------------------------------
# MAA.forward (edge_w = False path)
# ---------------------------------------------------------------------------
def maa_forward(adjs, feats, out_structs, src_idx, dst_idx, policies,
                tx_params, gphi1_params, gphi2_params, beta, eps):
    n_layers = len(adjs)
    n_nodes = adjs[0].shape[0]
    npad = _round_up(n_nodes, LANE)
    pad_n = npad - n_nodes

    # Dense scaled adjacency S[l][r, c] = A[l][r, c] * feats[l][c]  (== the
    # reference's CSR row-gather + node_struct_feats column scaling, densified).
    s_layers = [adjs[l] * feats[l][:, 0][None, :] for l in range(n_layers)]
    # Per-node row norms of the eps-filled rows (random_fill in the
    # deterministic / eval path), over the real n_nodes columns only.
    norm_layers = [jnp.sqrt(jnp.sum((s + eps) ** 2, axis=-1)) for s in s_layers]

    s_pad = [jnp.pad(s, ((0, pad_n), (0, pad_n))) for s in s_layers]
    norm_pad = [jnp.pad(n, (0, pad_n), constant_values=1.0).reshape(1, npad)
                for n in norm_layers]

    outs = []
    for lid1 in range(n_layers):
        n_edges = int(src_idx[lid1].shape[0])
        if n_edges <= 0:
            outs.append(None)
            continue
        pol = policies[lid1]
        lm = len(pol)                    # reference divides by the FULL policy length
        valid = [l2 for l2 in pol if l2 is not None and l2 != -1 and l2 != lid1]
        wq1, bq1, wq2t, bq2 = gphi2_params[lid1]
        if len(valid) == 0:
            sl1 = jnp.zeros((n_edges, 1), jnp.float32)
            h2 = jnp.maximum(sl1 * wq1 + bq1, 0.0)
            outs.append(jnp.sum(h2 * wq2t, axis=-1, keepdims=True) + bq2)
            continue

        # Host-side prep (review opt 3): per-pair M = S1 @ S2^T (f32 compute,
        # bf16 storage for the in-kernel one-hot gathers) + stacked pair norms.
        s1 = s_pad[lid1]
        m_stack = jnp.stack(
            [jnp.dot(s1, s_pad[l2].T, precision=jax.lax.Precision.HIGHEST)
             for l2 in valid]).astype(jnp.bfloat16)          # [P, Npad, Npad]
        norm2_stack = jnp.stack([norm_pad[l2] for l2 in valid])  # [P, 1, Npad] f32

        edge_tile = _pick_edge_tile(n_edges)
        e_pad = _round_up(n_edges, edge_tile)
        src = jnp.pad(src_idx[lid1].astype(jnp.int32),
                      (0, e_pad - n_edges)).reshape(e_pad, 1)
        dst = jnp.pad(dst_idx[lid1].astype(jnp.int32),
                      (0, e_pad - n_edges)).reshape(e_pad, 1)

        out = fused_layer_forward(src, dst, m_stack, norm_pad[lid1], norm2_stack,
                                  tx_params, gphi1_params[lid1], gphi2_params[lid1],
                                  lm=lm, beta=beta, edge_tile=edge_tile)
        outs.append(out[:n_edges])
    return [o for o in outs if o is not None]


if __name__ == "__main__":
    n_layers = 3
    N_NODES = 16
    N_EDGES = 64
    beta = 0.5
    eps = 1e-16

    key = jax.random.PRNGKey(0)
    k_param, k_data = jax.random.split(key)
    tx_params, gphi1_params, gphi2_params = init_params(k_param, n_layers)

    dk = jax.random.split(k_data, 4 * n_layers)
    adjs, feats, src_idx, dst_idx, out_structs = [], [], [], [], []
    for l in range(n_layers):
        adjs.append((jax.random.uniform(dk[4 * l + 0], (N_NODES, N_NODES)) < 0.4)
                    .astype(jnp.float32))
        feats.append(jax.random.normal(dk[4 * l + 1], (N_NODES, 1), jnp.float32))
        src_idx.append(jax.random.randint(dk[4 * l + 2], (N_EDGES,), 0, N_NODES))
        dst_idx.append(jax.random.randint(dk[4 * l + 3], (N_EDGES,), 0, N_NODES))
        out_structs.append(jnp.zeros((N_EDGES, 1), jnp.float32))

    policies = [[l2 for l2 in range(n_layers) if l2 != l1] for l1 in range(n_layers)]

    outs = maa_forward(adjs, feats, out_structs, src_idx, dst_idx, policies,
                       tx_params, gphi1_params, gphi2_params, beta, eps)
    for o in outs:
        jax.block_until_ready(o)
    assert len(outs) == n_layers
    assert all(o.shape == (N_EDGES, 1) and o.dtype == jnp.float32 for o in outs)
    assert all(bool(jnp.all(jnp.isfinite(o))) for o in outs)
    print("KERNEL_OK")
</pallas_src>

<mosaic_0001>
module attributes {stable_mosaic.version = 11 : i64} {
  func.func @kernel(%arg0: i32, %arg1: i32, %arg2: memref<128x1xi32, #tpu.memory_space<vmem>>, %arg3: memref<128x1xi32, #tpu.memory_space<vmem>>, %arg4: memref<1x128x128xbf16, #tpu.memory_space<vmem>>, %arg5: memref<1x128xf32, #tpu.memory_space<vmem>>, %arg6: memref<1x1x128xf32, #tpu.memory_space<vmem>>, %arg7: memref<1x64xf32, #tpu.memory_space<vmem>>, %arg8: memref<1x64xf32, #tpu.memory_space<vmem>>, %arg9: memref<2x64x64xbf16, #tpu.memory_space<vmem>>, %arg10: memref<2x1x64xf32, #tpu.memory_space<vmem>>, %arg11: memref<2x1x64xf32, #tpu.memory_space<vmem>>, %arg12: memref<2x1x64xf32, #tpu.memory_space<vmem>>, %arg13: memref<2x64x256xbf16, #tpu.memory_space<vmem>>, %arg14: memref<2x1x256xf32, #tpu.memory_space<vmem>>, %arg15: memref<2x256x64xbf16, #tpu.memory_space<vmem>>, %arg16: memref<2x1x64xf32, #tpu.memory_space<vmem>>, %arg17: memref<2x1x64xf32, #tpu.memory_space<vmem>>, %arg18: memref<2x1x64xf32, #tpu.memory_space<vmem>>, %arg19: memref<1x64xf32, #tpu.memory_space<vmem>>, %arg20: memref<1x1xf32, #tpu.memory_space<vmem>>, %arg21: memref<1x32xf32, #tpu.memory_space<vmem>>, %arg22: memref<1x32xf32, #tpu.memory_space<vmem>>, %arg23: memref<1x32xf32, #tpu.memory_space<vmem>>, %arg24: memref<1x1xf32, #tpu.memory_space<vmem>>, %arg25: memref<1x32xf32, #tpu.memory_space<vmem>>, %arg26: memref<1x32xf32, #tpu.memory_space<vmem>>, %arg27: memref<1x32xf32, #tpu.memory_space<vmem>>, %arg28: memref<1x1xf32, #tpu.memory_space<vmem>>, %arg29: memref<128x1xf32, #tpu.memory_space<vmem>>, %arg30: memref<1x128x1xf32, #tpu.memory_space<vmem>>) attributes {dimension_semantics = [#tpu.dimension_semantics<arbitrary>, #tpu.dimension_semantics<parallel>], iteration_bounds = array<i64: 2, 1>, scalar_prefetch = 0 : i64, scratch_operands = 1 : i64, tpu.core_type = #tpu.core_type<tc>, window_params = [{transform_indices = @transform_0, window_bounds = array<i64: 128, 1>}, {transform_indices = @transform_1, window_bounds = array<i64: 128, 1>}, {transform_indices = @transform_2, window_bounds = array<i64: 1, 128, 128>}, {pipeline_mode = #tpu.pipeline_mode<synchronous>, transform_indices = @transform_3, window_bounds = array<i64: 1, 128>}, {transform_indices = @transform_4, window_bounds = array<i64: 1, 1, 128>}, {pipeline_mode = #tpu.pipeline_mode<synchronous>, transform_indices = @transform_5, window_bounds = array<i64: 1, 64>}, {pipeline_mode = #tpu.pipeline_mode<synchronous>, transform_indices = @transform_6, window_bounds = array<i64: 1, 64>}, {pipeline_mode = #tpu.pipeline_mode<synchronous>, transform_indices = @transform_7, window_bounds = array<i64: 2, 64, 64>}, {pipeline_mode = #tpu.pipeline_mode<synchronous>, transform_indices = @transform_8, window_bounds = array<i64: 2, 1, 64>}, {pipeline_mode = #tpu.pipeline_mode<synchronous>, transform_indices = @transform_9, window_bounds = array<i64: 2, 1, 64>}, {pipeline_mode = #tpu.pipeline_mode<synchronous>, transform_indices = @transform_10, window_bounds = array<i64: 2, 1, 64>}, {pipeline_mode = #tpu.pipeline_mode<synchronous>, transform_indices = @transform_11, window_bounds = array<i64: 2, 64, 256>}, {pipeline_mode = #tpu.pipeline_mode<synchronous>, transform_indices = @transform_12, window_bounds = array<i64: 2, 1, 256>}, {pipeline_mode = #tpu.pipeline_mode<synchronous>, transform_indices = @transform_13, window_bounds = array<i64: 2, 256, 64>}, {pipeline_mode = #tpu.pipeline_mode<synchronous>, transform_indices = @transform_14, window_bounds = array<i64: 2, 1, 64>}, {pipeline_mode = #tpu.pipeline_mode<synchronous>, transform_indices = @transform_15, window_bounds = array<i64: 2, 1, 64>}, {pipeline_mode = #tpu.pipeline_mode<synchronous>, transform_indices = @transform_16, window_bounds = array<i64: 2, 1, 64>}, {pipeline_mode = #tpu.pipeline_mode<synchronous>, transform_indices = @transform_17, window_bounds = array<i64: 1, 64>}, {pipeline_mode = #tpu.pipeline_mode<synchronous>, transform_indices = @transform_18, window_bounds = array<i64: 1, 1>}, {pipeline_mode = #tpu.pipeline_mode<synchronous>, transform_indices = @transform_19, window_bounds = array<i64: 1, 32>}, {pipeline_mode = #tpu.pipeline_mode<synchronous>, transform_indices = @transform_20, window_bounds = array<i64: 1, 32>}, {pipeline_mode = #tpu.pipeline_mode<synchronous>, transform_indices = @transform_21, window_bounds = array<i64: 1, 32>}, {pipeline_mode = #tpu.pipeline_mode<synchronous>, transform_indices = @transform_22, window_bounds = array<i64: 1, 1>}, {pipeline_mode = #tpu.pipeline_mode<synchronous>, transform_indices = @transform_23, window_bounds = array<i64: 1, 32>}, {pipeline_mode = #tpu.pipeline_mode<synchronous>, transform_indices = @transform_24, window_bounds = array<i64: 1, 32>}, {pipeline_mode = #tpu.pipeline_mode<synchronous>, transform_indices = @transform_25, window_bounds = array<i64: 1, 32>}, {pipeline_mode = #tpu.pipeline_mode<synchronous>, transform_indices = @transform_26, window_bounds = array<i64: 1, 1>}, {transform_indices = @transform_27, window_bounds = array<i64: 128, 1>}]} {
    %c0_i32 = arith.constant 0 : i32
    %0 = arith.cmpi eq, %arg0, %c0_i32 : i32
    %1 = arith.extui %0 : i1 to i32
    %c0_i32_0 = arith.constant 0 : i32
    %2 = arith.cmpi ne, %1, %c0_i32_0 : i32
    scf.if %2 {
      %cst_148 = arith.constant 0.000000e+00 : f32
      %280 = vector.broadcast %cst_148 : f32 to vector<128x1xf32>
      %281 = arith.index_cast %arg1 : i32 to index
      %c0_149 = arith.constant 0 : index
      %c0_150 = arith.constant 0 : index
      %282 = vector.load %arg30[%281, %c0_149, %c0_150] : memref<1x128x1xf32, #tpu.memory_space<vmem>>, vector<1x128x1xf32>
      %283 = vector.shape_cast %282 : vector<1x128x1xf32> to vector<128x1xf32>
      %284 = vector.shape_cast %280 : vector<128x1xf32> to vector<1x128x1xf32>
      tpu.vector_store %arg30[%281, %c0_149, %c0_150], %284 {strides = array<i32>} : memref<1x128x1xf32, #tpu.memory_space<vmem>>, vector<1x128x1xf32>,
    } else {
    }
    %3 = tpu.iota {dimensions = array<i32: 1>} : vector<128x128xi32>
    %c0 = arith.constant 0 : index
    %c0_1 = arith.constant 0 : index
    %4 = vector.load %arg2[%c0, %c0_1] : memref<128x1xi32, #tpu.memory_space<vmem>>, vector<128x1xi32>
    %5 = vector.broadcast %4 : vector<128x1xi32> to vector<128x128xi32>
    %6 = arith.cmpi eq, %3, %5 : vector<128x128xi32>
    %c0_2 = arith.constant 0 : index
    %c0_3 = arith.constant 0 : index
    %7 = vector.load %arg3[%c0_2, %c0_3] : memref<128x1xi32, #tpu.memory_space<vmem>>, vector<128x1xi32>
    %8 = vector.broadcast %7 : vector<128x1xi32> to vector<128x128xi32>
    %9 = arith.cmpi eq, %3, %8 : vector<128x128xi32>
    %10 = arith.extui %6 : vector<128x128xi1> to vector<128x128xi32>
    %11 = arith.sitofp %10 : vector<128x128xi32> to vector<128x128xf32>
    %12 = arith.truncf %11 : vector<128x128xf32> to vector<128x128xbf16>
    %13 = arith.extui %9 : vector<128x128xi1> to vector<128x128xi32>
    %14 = arith.sitofp %13 : vector<128x128xi32> to vector<128x128xf32>
    %15 = arith.truncf %14 : vector<128x128xf32> to vector<128x128xbf16>
    %c0_4 = arith.constant 0 : index
    %c0_5 = arith.constant 0 : index
    %c0_6 = arith.constant 0 : index
    %16 = vector.load %arg4[%c0_4, %c0_5, %c0_6] : memref<1x128x128xbf16, #tpu.memory_space<vmem>>, vector<1x128x128xbf16>
    %17 = vector.shape_cast %16 : vector<1x128x128xbf16> to vector<128x128xbf16>
    %cst = arith.constant dense<0.000000e+00> : vector<128x128xf32>
    %18 = tpu.matmul %12, %17, %cst {dimension_numbers = #tpu.dot_dimension_numbers<[1], [0], [0], [1], [0, 0, 1, 1], [], []>} : vector<128x128xbf16>, vector<128x128xbf16>, vector<128x128xf32> -> vector<128x128xf32>
    %cst_7 = arith.constant dense<0.000000e+00> : vector<128x128xf32>
    %19 = tpu.matmul %15, %17, %cst_7 {dimension_numbers = #tpu.dot_dimension_numbers<[1], [0], [0], [1], [0, 0, 1, 1], [], []>} : vector<128x128xbf16>, vector<128x128xbf16>, vector<128x128xf32> -> vector<128x128xf32>
    %cst_8 = arith.constant 0.000000e+00 : f32
    %20 = vector.broadcast %cst_8 : f32 to vector<128x128xf32>
    %21 = arith.select %9, %18, %20 : vector<128x128xi1>, vector<128x128xf32>
    %cst_9 = arith.constant dense<0.000000e+00> : vector<128xf32>
    %22 = vector.multi_reduction <add>, %21, %cst_9 [1] : vector<128x128xf32> to vector<128xf32>
    %23 = vector.shape_cast %22 : vector<128xf32> to vector<128x1xf32>
    %cst_10 = arith.constant 0.000000e+00 : f32
    %24 = vector.broadcast %cst_10 : f32 to vector<128x128xf32>
    %25 = arith.select %6, %19, %24 : vector<128x128xi1>, vector<128x128xf32>
    %cst_11 = arith.constant dense<0.000000e+00> : vector<128xf32>
    %26 = vector.multi_reduction <add>, %25, %cst_11 [1] : vector<128x128xf32> to vector<128xf32>
    %27 = vector.shape_cast %26 : vector<128xf32> to vector<128x1xf32>
    %c0_12 = arith.constant 0 : index
    %c0_13 = arith.constant 0 : index
    %28 = vector.load %arg5[%c0_12, %c0_13] : memref<1x128xf32, #tpu.memory_space<vmem>>, vector<1x128xf32>
    %c0_14 = arith.constant 0 : index
    %c0_15 = arith.constant 0 : index
    %c0_16 = arith.constant 0 : index
    %29 = vector.load %arg6[%c0_14, %c0_15, %c0_16] : memref<1x1x128xf32, #tpu.memory_space<vmem>>, vector<1x1x128xf32>
    %30 = vector.shape_cast %29 : vector<1x1x128xf32> to vector<1x128xf32>
    %cst_17 = arith.constant 0.000000e+00 : f32
    %31 = vector.shape_cast %28 : vector<1x128xf32> to vector<1x128xf32>
    %32 = vector.broadcast %31 : vector<1x128xf32> to vector<128x128xf32>
    %33 = vector.broadcast %cst_17 : f32 to vector<128x128xf32>
    %34 = arith.select %6, %32, %33 : vector<128x128xi1>, vector<128x128xf32>
    %cst_18 = arith.constant dense<0.000000e+00> : vector<128xf32>
    %35 = vector.multi_reduction <add>, %34, %cst_18 [1] : vector<128x128xf32> to vector<128xf32>
    %36 = vector.shape_cast %35 : vector<128xf32> to vector<128x1xf32>
    %cst_19 = arith.constant 0.000000e+00 : f32
    %37 = vector.shape_cast %28 : vector<1x128xf32> to vector<1x128xf32>
    %38 = vector.broadcast %37 : vector<1x128xf32> to vector<128x128xf32>
    %39 = vector.broadcast %cst_19 : f32 to vector<128x128xf32>
    %40 = arith.select %9, %38, %39 : vector<128x128xi1>, vector<128x128xf32>
    %cst_20 = arith.constant dense<0.000000e+00> : vector<128xf32>
    %41 = vector.multi_reduction <add>, %40, %cst_20 [1] : vector<128x128xf32> to vector<128xf32>
    %42 = vector.shape_cast %41 : vector<128xf32> to vector<128x1xf32>
    %cst_21 = arith.constant 0.000000e+00 : f32
    %43 = vector.shape_cast %30 : vector<1x128xf32> to vector<1x128xf32>
    %44 = vector.broadcast %43 : vector<1x128xf32> to vector<128x128xf32>
    %45 = vector.broadcast %cst_21 : f32 to vector<128x128xf32>
    %46 = arith.select %6, %44, %45 : vector<128x128xi1>, vector<128x128xf32>
    %cst_22 = arith.constant dense<0.000000e+00> : vector<128xf32>
    %47 = vector.multi_reduction <add>, %46, %cst_22 [1] : vector<128x128xf32> to vector<128xf32>
    %48 = vector.shape_cast %47 : vector<128xf32> to vector<128x1xf32>
    %cst_23 = arith.constant 0.000000e+00 : f32
    %49 = vector.shape_cast %30 : vector<1x128xf32> to vector<1x128xf32>
    %50 = vector.broadcast %49 : vector<1x128xf32> to vector<128x128xf32>
    %51 = vector.broadcast %cst_23 : f32 to vector<128x128xf32>
    %52 = arith.select %9, %50, %51 : vector<128x128xi1>, vector<128x128xf32>
    %cst_24 = arith.constant dense<0.000000e+00> : vector<128xf32>
    %53 = vector.multi_reduction <add>, %52, %cst_24 [1] : vector<128x128xf32> to vector<128xf32>
    %54 = vector.shape_cast %53 : vector<128xf32> to vector<128x1xf32>
    %55 = arith.mulf %36, %54 : vector<128x1xf32>
    %56 = arith.divf %23, %55 : vector<128x1xf32>
    %57 = arith.mulf %48, %42 : vector<128x1xf32>
    %58 = arith.divf %27, %57 : vector<128x1xf32>
    %59 = arith.addf %56, %58 : vector<128x1xf32>
    %c0_25 = arith.constant 0 : index
    %c0_26 = arith.constant 0 : index
    %60 = vector.load %arg7[%c0_25, %c0_26] : memref<1x64xf32, #tpu.memory_space<vmem>>, vector<1x64xf32>
    %61 = vector.broadcast %59 : vector<128x1xf32> to vector<128x64xf32>
    %62 = vector.broadcast %60 : vector<1x64xf32> to vector<128x64xf32>
    %63 = arith.mulf %61, %62 : vector<128x64xf32>
    %c0_27 = arith.constant 0 : index
    %c0_28 = arith.constant 0 : index
    %64 = vector.load %arg8[%c0_27, %c0_28] : memref<1x64xf32, #tpu.memory_space<vmem>>, vector<1x64xf32>
    %65 = vector.broadcast %64 : vector<1x64xf32> to vector<128x64xf32>
    %66 = arith.addf %63, %65 : vector<128x64xf32>
    %67 = arith.truncf %66 : vector<128x64xf32> to vector<128x64xbf16>
    %c0_29 = arith.constant 0 : index
    %c0_30 = arith.constant 0 : index
    %c0_31 = arith.constant 0 : index
    %68 = vector.load %arg9[%c0_29, %c0_30, %c0_31] : memref<2x64x64xbf16, #tpu.memory_space<vmem>>, vector<1x64x64xbf16>
    %69 = vector.shape_cast %68 : vector<1x64x64xbf16> to vector<64x64xbf16>
    %cst_32 = arith.constant dense<0.000000e+00> : vector<128x64xf32>
    %70 = tpu.matmul %67, %69, %cst_32 {dimension_numbers = #tpu.dot_dimension_numbers<[1], [0], [0], [1], [0, 0, 1, 1], [], []>} : vector<128x64xbf16>, vector<64x64xbf16>, vector<128x64xf32> -> vector<128x64xf32>
    %c0_33 = arith.constant 0 : index
    %c0_34 = arith.constant 0 : index
    %c0_35 = arith.constant 0 : index
    %71 = vector.load %arg10[%c0_33, %c0_34, %c0_35] : memref<2x1x64xf32, #tpu.memory_space<vmem>>, vector<1x1x64xf32>
    %72 = vector.shape_cast %71 : vector<1x1x64xf32> to vector<1x64xf32>
    %73 = vector.broadcast %72 : vector<1x64xf32> to vector<128x64xf32>
    %74 = arith.addf %70, %73 : vector<128x64xf32>
    %75 = arith.addf %66, %74 : vector<128x64xf32>
    %c0_36 = arith.constant 0 : index
    %c0_37 = arith.constant 0 : index
    %c0_38 = arith.constant 0 : index
    %76 = vector.load %arg11[%c0_36, %c0_37, %c0_38] : memref<2x1x64xf32, #tpu.memory_space<vmem>>, vector<1x1x64xf32>
    %77 = vector.shape_cast %76 : vector<1x1x64xf32> to vector<1x64xf32>
    %c0_39 = arith.constant 0 : index
    %c0_40 = arith.constant 0 : index
    %c0_41 = arith.constant 0 : index
    %78 = vector.load %arg12[%c0_39, %c0_40, %c0_41] : memref<2x1x64xf32, #tpu.memory_space<vmem>>, vector<1x1x64xf32>
    %79 = vector.shape_cast %78 : vector<1x1x64xf32> to vector<1x64xf32>
    %cst_42 = arith.constant dense<0.000000e+00> : vector<128xf32>
    %80 = vector.multi_reduction <add>, %75, %cst_42 [1] : vector<128x64xf32> to vector<128xf32>
    %81 = vector.shape_cast %80 : vector<128xf32> to vector<128x1xf32>
    %cst_43 = arith.constant 6.400000e+01 : f32
    %82 = vector.broadcast %cst_43 : f32 to vector<128x1xf32>
    %83 = arith.divf %81, %82 : vector<128x1xf32>
    %84 = vector.broadcast %83 : vector<128x1xf32> to vector<128x64xf32>
    %85 = arith.subf %75, %84 : vector<128x64xf32>
    %86 = arith.mulf %85, %85 : vector<128x64xf32>
    %cst_44 = arith.constant dense<0.000000e+00> : vector<128xf32>
    %87 = vector.multi_reduction <add>, %86, %cst_44 [1] : vector<128x64xf32> to vector<128xf32>
    %88 = vector.shape_cast %87 : vector<128xf32> to vector<128x1xf32>
    %cst_45 = arith.constant 6.400000e+01 : f32
    %89 = vector.broadcast %cst_45 : f32 to vector<128x1xf32>
    %90 = arith.divf %88, %89 : vector<128x1xf32>
    %91 = vector.broadcast %83 : vector<128x1xf32> to vector<128x64xf32>
    %92 = arith.subf %75, %91 : vector<128x64xf32>
    %cst_46 = arith.constant 9.99999974E-6 : f32
    %93 = vector.broadcast %cst_46 : f32 to vector<128x1xf32>
    %94 = arith.addf %90, %93 : vector<128x1xf32>
    %95 = math.rsqrt %94 : vector<128x1xf32>
    %96 = vector.broadcast %95 : vector<128x1xf32> to vector<128x64xf32>
    %97 = arith.mulf %92, %96 : vector<128x64xf32>
    %98 = vector.broadcast %77 : vector<1x64xf32> to vector<128x64xf32>
    %99 = arith.mulf %97, %98 : vector<128x64xf32>
    %100 = vector.broadcast %79 : vector<1x64xf32> to vector<128x64xf32>
    %101 = arith.addf %99, %100 : vector<128x64xf32>
    %102 = arith.truncf %101 : vector<128x64xf32> to vector<128x64xbf16>
    %c0_47 = arith.constant 0 : index
    %c0_48 = arith.constant 0 : index
    %c0_49 = arith.constant 0 : index
    %103 = vector.load %arg13[%c0_47, %c0_48, %c0_49] : memref<2x64x256xbf16, #tpu.memory_space<vmem>>, vector<1x64x256xbf16>
    %104 = vector.shape_cast %103 : vector<1x64x256xbf16> to vector<64x256xbf16>
    %cst_50 = arith.constant dense<0.000000e+00> : vector<128x256xf32>
    %105 = tpu.matmul %102, %104, %cst_50 {dimension_numbers = #tpu.dot_dimension_numbers<[1], [0], [0], [1], [0, 0, 1, 1], [], []>} : vector<128x64xbf16>, vector<64x256xbf16>, vector<128x256xf32> -> vector<128x256xf32>
    %c0_51 = arith.constant 0 : index
    %c0_52 = arith.constant 0 : index
    %c0_53 = arith.constant 0 : index
    %106 = vector.load %arg14[%c0_51, %c0_52, %c0_53] : memref<2x1x256xf32, #tpu.memory_space<vmem>>, vector<1x1x256xf32>
    %107 = vector.shape_cast %106 : vector<1x1x256xf32> to vector<1x256xf32>
    %108 = vector.broadcast %107 : vector<1x256xf32> to vector<128x256xf32>
    %109 = arith.addf %105, %108 : vector<128x256xf32>
    %cst_54 = arith.constant 0.000000e+00 : f32
    %110 = vector.broadcast %cst_54 : f32 to vector<128x256xf32>
    %111 = arith.maximumf %109, %110 : vector<128x256xf32>
    %112 = arith.truncf %111 : vector<128x256xf32> to vector<128x256xbf16>
    %c0_55 = arith.constant 0 : index
    %c0_56 = arith.constant 0 : index
    %c0_57 = arith.constant 0 : index
    %113 = vector.load %arg15[%c0_55, %c0_56, %c0_57] : memref<2x256x64xbf16, #tpu.memory_space<vmem>>, vector<1x256x64xbf16>
    %114 = vector.shape_cast %113 : vector<1x256x64xbf16> to vector<256x64xbf16>
    %cst_58 = arith.constant dense<0.000000e+00> : vector<128x64xf32>
    %115 = tpu.matmul %112, %114, %cst_58 {dimension_numbers = #tpu.dot_dimension_numbers<[1], [0], [0], [1], [0, 0, 1, 1], [], []>} : vector<128x256xbf16>, vector<256x64xbf16>, vector<128x64xf32> -> vector<128x64xf32>
    %c0_59 = arith.constant 0 : index
    %c0_60 = arith.constant 0 : index
    %c0_61 = arith.constant 0 : index
    %116 = vector.load %arg16[%c0_59, %c0_60, %c0_61] : memref<2x1x64xf32, #tpu.memory_space<vmem>>, vector<1x1x64xf32>
    %117 = vector.shape_cast %116 : vector<1x1x64xf32> to vector<1x64xf32>
    %118 = vector.broadcast %117 : vector<1x64xf32> to vector<128x64xf32>
    %119 = arith.addf %115, %118 : vector<128x64xf32>
    %120 = arith.addf %101, %119 : vector<128x64xf32>
    %c0_62 = arith.constant 0 : index
    %c0_63 = arith.constant 0 : index
    %c0_64 = arith.constant 0 : index
    %121 = vector.load %arg17[%c0_62, %c0_63, %c0_64] : memref<2x1x64xf32, #tpu.memory_space<vmem>>, vector<1x1x64xf32>
    %122 = vector.shape_cast %121 : vector<1x1x64xf32> to vector<1x64xf32>
    %c0_65 = arith.constant 0 : index
    %c0_66 = arith.constant 0 : index
    %c0_67 = arith.constant 0 : index
    %123 = vector.load %arg18[%c0_65, %c0_66, %c0_67] : memref<2x1x64xf32, #tpu.memory_space<vmem>>, vector<1x1x64xf32>
    %124 = vector.shape_cast %123 : vector<1x1x64xf32> to vector<1x64xf32>
    %cst_68 = arith.constant dense<0.000000e+00> : vector<128xf32>
    %125 = vector.multi_reduction <add>, %120, %cst_68 [1] : vector<128x64xf32> to vector<128xf32>
    %126 = vector.shape_cast %125 : vector<128xf32> to vector<128x1xf32>
    %cst_69 = arith.constant 6.400000e+01 : f32
    %127 = vector.broadcast %cst_69 : f32 to vector<128x1xf32>
    %128 = arith.divf %126, %127 : vector<128x1xf32>
    %129 = vector.broadcast %128 : vector<128x1xf32> to vector<128x64xf32>
    %130 = arith.subf %120, %129 : vector<128x64xf32>
    %131 = arith.mulf %130, %130 : vector<128x64xf32>
    %cst_70 = arith.constant dense<0.000000e+00> : vector<128xf32>
    %132 = vector.multi_reduction <add>, %131, %cst_70 [1] : vector<128x64xf32> to vector<128xf32>
    %133 = vector.shape_cast %132 : vector<128xf32> to vector<128x1xf32>
    %cst_71 = arith.constant 6.400000e+01 : f32
    %134 = vector.broadcast %cst_71 : f32 to vector<128x1xf32>
    %135 = arith.divf %133, %134 : vector<128x1xf32>
    %136 = vector.broadcast %128 : vector<128x1xf32> to vector<128x64xf32>
    %137 = arith.subf %120, %136 : vector<128x64xf32>
    %cst_72 = arith.constant 9.99999974E-6 : f32
    %138 = vector.broadcast %cst_72 : f32 to vector<128x1xf32>
    %139 = arith.addf %135, %138 : vector<128x1xf32>
    %140 = math.rsqrt %139 : vector<128x1xf32>
    %141 = vector.broadcast %140 : vector<128x1xf32> to vector<128x64xf32>
    %142 = arith.mulf %137, %141 : vector<128x64xf32>
    %143 = vector.broadcast %122 : vector<1x64xf32> to vector<128x64xf32>
    %144 = arith.mulf %142, %143 : vector<128x64xf32>
    %145 = vector.broadcast %124 : vector<1x64xf32> to vector<128x64xf32>
    %146 = arith.addf %144, %145 : vector<128x64xf32>
    %147 = arith.truncf %146 : vector<128x64xf32> to vector<128x64xbf16>
    %c1 = arith.constant 1 : index
    %c0_73 = arith.constant 0 : index
    %c0_74 = arith.constant 0 : index
    %148 = vector.load %arg9[%c1, %c0_73, %c0_74] : memref<2x64x64xbf16, #tpu.memory_space<vmem>>, vector<1x64x64xbf16>
    %149 = vector.shape_cast %148 : vector<1x64x64xbf16> to vector<64x64xbf16>
    %cst_75 = arith.constant dense<0.000000e+00> : vector<128x64xf32>
    %150 = tpu.matmul %147, %149, %cst_75 {dimension_numbers = #tpu.dot_dimension_numbers<[1], [0], [0], [1], [0, 0, 1, 1], [], []>} : vector<128x64xbf16>, vector<64x64xbf16>, vector<128x64xf32> -> vector<128x64xf32>
    %c1_76 = arith.constant 1 : index
    %c0_77 = arith.constant 0 : index
    %c0_78 = arith.constant 0 : index
    %151 = vector.load %arg10[%c1_76, %c0_77, %c0_78] : memref<2x1x64xf32, #tpu.memory_space<vmem>>, vector<1x1x64xf32>
    %152 = vector.shape_cast %151 : vector<1x1x64xf32> to vector<1x64xf32>
    %153 = vector.broadcast %152 : vector<1x64xf32> to vector<128x64xf32>
    %154 = arith.addf %150, %153 : vector<128x64xf32>
    %155 = arith.addf %146, %154 : vector<128x64xf32>
    %c1_79 = arith.constant 1 : index
    %c0_80 = arith.constant 0 : index
    %c0_81 = arith.constant 0 : index
    %156 = vector.load %arg11[%c1_79, %c0_80, %c0_81] : memref<2x1x64xf32, #tpu.memory_space<vmem>>, vector<1x1x64xf32>
    %157 = vector.shape_cast %156 : vector<1x1x64xf32> to vector<1x64xf32>
    %c1_82 = arith.constant 1 : index
    %c0_83 = arith.constant 0 : index
    %c0_84 = arith.constant 0 : index
    %158 = vector.load %arg12[%c1_82, %c0_83, %c0_84] : memref<2x1x64xf32, #tpu.memory_space<vmem>>, vector<1x1x64xf32>
    %159 = vector.shape_cast %158 : vector<1x1x64xf32> to vector<1x64xf32>
    %cst_85 = arith.constant dense<0.000000e+00> : vector<128xf32>
    %160 = vector.multi_reduction <add>, %155, %cst_85 [1] : vector<128x64xf32> to vector<128xf32>
    %161 = vector.shape_cast %160 : vector<128xf32> to vector<128x1xf32>
    %cst_86 = arith.constant 6.400000e+01 : f32
    %162 = vector.broadcast %cst_86 : f32 to vector<128x1xf32>
    %163 = arith.divf %161, %162 : vector<128x1xf32>
    %164 = vector.broadcast %163 : vector<128x1xf32> to vector<128x64xf32>
    %165 = arith.subf %155, %164 : vector<128x64xf32>
    %166 = arith.mulf %165, %165 : vector<128x64xf32>
    %cst_87 = arith.constant dense<0.000000e+00> : vector<128xf32>
    %167 = vector.multi_reduction <add>, %166, %cst_87 [1] : vector<128x64xf32> to vector<128xf32>
    %168 = vector.shape_cast %167 : vector<128xf32> to vector<128x1xf32>
    %cst_88 = arith.constant 6.400000e+01 : f32
    %169 = vector.broadcast %cst_88 : f32 to vector<128x1xf32>
    %170 = arith.divf %168, %169 : vector<128x1xf32>
    %171 = vector.broadcast %163 : vector<128x1xf32> to vector<128x64xf32>
    %172 = arith.subf %155, %171 : vector<128x64xf32>
    %cst_89 = arith.constant 9.99999974E-6 : f32
    %173 = vector.broadcast %cst_89 : f32 to vector<128x1xf32>
    %174 = arith.addf %170, %173 : vector<128x1xf32>
    %175 = math.rsqrt %174 : vector<128x1xf32>
    %176 = vector.broadcast %175 : vector<128x1xf32> to vector<128x64xf32>
    %177 = arith.mulf %172, %176 : vector<128x64xf32>
    %178 = vector.broadcast %157 : vector<1x64xf32> to vector<128x64xf32>
    %179 = arith.mulf %177, %178 : vector<128x64xf32>
    %180 = vector.broadcast %159 : vector<1x64xf32> to vector<128x64xf32>
    %181 = arith.addf %179, %180 : vector<128x64xf32>
    %182 = arith.truncf %181 : vector<128x64xf32> to vector<128x64xbf16>
    %c1_90 = arith.constant 1 : index
    %c0_91 = arith.constant 0 : index
    %c0_92 = arith.constant 0 : index
    %183 = vector.load %arg13[%c1_90, %c0_91, %c0_92] : memref<2x64x256xbf16, #tpu.memory_space<vmem>>, vector<1x64x256xbf16>
    %184 = vector.shape_cast %183 : vector<1x64x256xbf16> to vector<64x256xbf16>
    %cst_93 = arith.constant dense<0.000000e+00> : vector<128x256xf32>
    %185 = tpu.matmul %182, %184, %cst_93 {dimension_numbers = #tpu.dot_dimension_numbers<[1], [0], [0], [1], [0, 0, 1, 1], [], []>} : vector<128x64xbf16>, vector<64x256xbf16>, vector<128x256xf32> -> vector<128x256xf32>
    %c1_94 = arith.constant 1 : index
    %c0_95 = arith.constant 0 : index
    %c0_96 = arith.constant 0 : index
    %186 = vector.load %arg14[%c1_94, %c0_95, %c0_96] : memref<2x1x256xf32, #tpu.memory_space<vmem>>, vector<1x1x256xf32>
    %187 = vector.shape_cast %186 : vector<1x1x256xf32> to vector<1x256xf32>
    %188 = vector.broadcast %187 : vector<1x256xf32> to vector<128x256xf32>
    %189 = arith.addf %185, %188 : vector<128x256xf32>
    %cst_97 = arith.constant 0.000000e+00 : f32
    %190 = vector.broadcast %cst_97 : f32 to vector<128x256xf32>
    %191 = arith.maximumf %189, %190 : vector<128x256xf32>
    %192 = arith.truncf %191 : vector<128x256xf32> to vector<128x256xbf16>
    %c1_98 = arith.constant 1 : index
    %c0_99 = arith.constant 0 : index
    %c0_100 = arith.constant 0 : index
    %193 = vector.load %arg15[%c1_98, %c0_99, %c0_100] : memref<2x256x64xbf16, #tpu.memory_space<vmem>>, vector<1x256x64xbf16>
    %194 = vector.shape_cast %193 : vector<1x256x64xbf16> to vector<256x64xbf16>
    %cst_101 = arith.constant dense<0.000000e+00> : vector<128x64xf32>
    %195 = tpu.matmul %192, %194, %cst_101 {dimension_numbers = #tpu.dot_dimension_numbers<[1], [0], [0], [1], [0, 0, 1, 1], [], []>} : vector<128x256xbf16>, vector<256x64xbf16>, vector<128x64xf32> -> vector<128x64xf32>
    %c1_102 = arith.constant 1 : index
    %c0_103 = arith.constant 0 : index
    %c0_104 = arith.constant 0 : index
    %196 = vector.load %arg16[%c1_102, %c0_103, %c0_104] : memref<2x1x64xf32, #tpu.memory_space<vmem>>, vector<1x1x64xf32>
    %197 = vector.shape_cast %196 : vector<1x1x64xf32> to vector<1x64xf32>
    %198 = vector.broadcast %197 : vector<1x64xf32> to vector<128x64xf32>
    %199 = arith.addf %195, %198 : vector<128x64xf32>
    %200 = arith.addf %181, %199 : vector<128x64xf32>
    %c1_105 = arith.constant 1 : index
    %c0_106 = arith.constant 0 : index
    %c0_107 = arith.constant 0 : index
    %201 = vector.load %arg17[%c1_105, %c0_106, %c0_107] : memref<2x1x64xf32, #tpu.memory_space<vmem>>, vector<1x1x64xf32>
    %202 = vector.shape_cast %201 : vector<1x1x64xf32> to vector<1x64xf32>
    %c1_108 = arith.constant 1 : index
    %c0_109 = arith.constant 0 : index
    %c0_110 = arith.constant 0 : index
    %203 = vector.load %arg18[%c1_108, %c0_109, %c0_110] : memref<2x1x64xf32, #tpu.memory_space<vmem>>, vector<1x1x64xf32>
    %204 = vector.shape_cast %203 : vector<1x1x64xf32> to vector<1x64xf32>
    %cst_111 = arith.constant dense<0.000000e+00> : vector<128xf32>
    %205 = vector.multi_reduction <add>, %200, %cst_111 [1] : vector<128x64xf32> to vector<128xf32>
    %206 = vector.shape_cast %205 : vector<128xf32> to vector<128x1xf32>
    %cst_112 = arith.constant 6.400000e+01 : f32
    %207 = vector.broadcast %cst_112 : f32 to vector<128x1xf32>
    %208 = arith.divf %206, %207 : vector<128x1xf32>
    %209 = vector.broadcast %208 : vector<128x1xf32> to vector<128x64xf32>
    %210 = arith.subf %200, %209 : vector<128x64xf32>
    %211 = arith.mulf %210, %210 : vector<128x64xf32>
    %cst_113 = arith.constant dense<0.000000e+00> : vector<128xf32>
    %212 = vector.multi_reduction <add>, %211, %cst_113 [1] : vector<128x64xf32> to vector<128xf32>
    %213 = vector.shape_cast %212 : vector<128xf32> to vector<128x1xf32>
    %cst_114 = arith.constant 6.400000e+01 : f32
    %214 = vector.broadcast %cst_114 : f32 to vector<128x1xf32>
    %215 = arith.divf %213, %214 : vector<128x1xf32>
    %216 = vector.broadcast %208 : vector<128x1xf32> to vector<128x64xf32>
    %217 = arith.subf %200, %216 : vector<128x64xf32>
    %cst_115 = arith.constant 9.99999974E-6 : f32
    %218 = vector.broadcast %cst_115 : f32 to vector<128x1xf32>
    %219 = arith.addf %215, %218 : vector<128x1xf32>
    %220 = math.rsqrt %219 : vector<128x1xf32>
    %221 = vector.broadcast %220 : vector<128x1xf32> to vector<128x64xf32>
    %222 = arith.mulf %217, %221 : vector<128x64xf32>
    %223 = vector.broadcast %202 : vector<1x64xf32> to vector<128x64xf32>
    %224 = arith.mulf %222, %223 : vector<128x64xf32>
    %225 = vector.broadcast %204 : vector<1x64xf32> to vector<128x64xf32>
    %226 = arith.addf %224, %225 : vector<128x64xf32>
    %c0_116 = arith.constant 0 : index
    %c0_117 = arith.constant 0 : index
    %227 = vector.load %arg19[%c0_116, %c0_117] : memref<1x64xf32, #tpu.memory_space<vmem>>, vector<1x64xf32>
    %228 = vector.broadcast %227 : vector<1x64xf32> to vector<128x64xf32>
    %229 = arith.mulf %226, %228 : vector<128x64xf32>
    %cst_118 = arith.constant dense<0.000000e+00> : vector<128xf32>
    %230 = vector.multi_reduction <add>, %229, %cst_118 [1] : vector<128x64xf32> to vector<128xf32>
    %231 = vector.shape_cast %230 : vector<128xf32> to vector<128x1xf32>
    %c0_119 = arith.constant 0 : index
    %c0_120 = arith.constant 0 : index
    %232 = vector.load %arg20[%c0_119, %c0_120] : memref<1x1xf32, #tpu.memory_space<vmem>>, vector<1x1xf32>
    %233 = vector.broadcast %232 : vector<1x1xf32> to vector<128x1xf32>
    %234 = arith.addf %231, %233 : vector<128x1xf32>
    %c0_121 = arith.constant 0 : index
    %c0_122 = arith.constant 0 : index
    %235 = vector.load %arg21[%c0_121, %c0_122] : memref<1x32xf32, #tpu.memory_space<vmem>>, vector<1x32xf32>
    %236 = vector.broadcast %234 : vector<128x1xf32> to vector<128x32xf32>
    %237 = vector.broadcast %235 : vector<1x32xf32> to vector<128x32xf32>
    %238 = arith.mulf %236, %237 : vector<128x32xf32>
    %c0_123 = arith.constant 0 : index
    %c0_124 = arith.constant 0 : index
    %239 = vector.load %arg22[%c0_123, %c0_124] : memref<1x32xf32, #tpu.memory_space<vmem>>, vector<1x32xf32>
    %240 = vector.broadcast %239 : vector<1x32xf32> to vector<128x32xf32>
    %241 = arith.addf %238, %240 : vector<128x32xf32>
    %cst_125 = arith.constant 0.000000e+00 : f32
    %242 = vector.broadcast %cst_125 : f32 to vector<128x32xf32>
    %243 = arith.maximumf %241, %242 : vector<128x32xf32>
    %c0_126 = arith.constant 0 : index
    %c0_127 = arith.constant 0 : index
    %244 = vector.load %arg23[%c0_126, %c0_127] : memref<1x32xf32, #tpu.memory_space<vmem>>, vector<1x32xf32>
    %245 = vector.broadcast %244 : vector<1x32xf32> to vector<128x32xf32>
    %246 = arith.mulf %243, %245 : vector<128x32xf32>
    %cst_128 = arith.constant dense<0.000000e+00> : vector<128xf32>
    %247 = vector.multi_reduction <add>, %246, %cst_128 [1] : vector<128x32xf32> to vector<128xf32>
    %248 = vector.shape_cast %247 : vector<128xf32> to vector<128x1xf32>
    %c0_129 = arith.constant 0 : index
    %c0_130 = arith.constant 0 : index
    %249 = vector.load %arg24[%c0_129, %c0_130] : memref<1x1xf32, #tpu.memory_space<vmem>>, vector<1x1xf32>
    %250 = vector.broadcast %249 : vector<1x1xf32> to vector<128x1xf32>
    %251 = arith.addf %248, %250 : vector<128x1xf32>
    %252 = arith.index_cast %arg1 : i32 to index
    %c0_131 = arith.constant 0 : index
    %c0_132 = arith.constant 0 : index
    %253 = vector.load %arg30[%252, %c0_131, %c0_132] : memref<1x128x1xf32, #tpu.memory_space<vmem>>, vector<1x128x1xf32>
    %254 = vector.shape_cast %253 : vector<1x128x1xf32> to vector<128x1xf32>
    %cst_133 = arith.constant 2.500000e-01 : f32
    %255 = vector.broadcast %cst_133 : f32 to vector<128x1xf32>
    %256 = arith.mulf %255, %251 : vector<128x1xf32>
    %257 = arith.addf %254, %256 : vector<128x1xf32>
    %258 = arith.index_cast %arg1 : i32 to index
    %c0_134 = arith.constant 0 : index
    %c0_135 = arith.constant 0 : index
    %259 = vector.load %arg30[%258, %c0_134, %c0_135] : memref<1x128x1xf32, #tpu.memory_space<vmem>>, vector<1x128x1xf32>
    %260 = vector.shape_cast %259 : vector<1x128x1xf32> to vector<128x1xf32>
    %261 = vector.shape_cast %257 : vector<128x1xf32> to vector<1x128x1xf32>
    tpu.vector_store %arg30[%258, %c0_134, %c0_135], %261 {strides = array<i32>} : memref<1x128x1xf32, #tpu.memory_space<vmem>>, vector<1x128x1xf32>,
    %c0_136 = arith.constant 0 : index
    %c0_137 = arith.constant 0 : index
    %262 = vector.load %arg25[%c0_136, %c0_137] : memref<1x32xf32, #tpu.memory_space<vmem>>, vector<1x32xf32>
    %263 = vector.broadcast %257 : vector<128x1xf32> to vector<128x32xf32>
    %264 = vector.broadcast %262 : vector<1x32xf32> to vector<128x32xf32>
    %265 = arith.mulf %263, %264 : vector<128x32xf32>
    %c0_138 = arith.constant 0 : index
    %c0_139 = arith.constant 0 : index
    %266 = vector.load %arg26[%c0_138, %c0_139] : memref<1x32xf32, #tpu.memory_space<vmem>>, vector<1x32xf32>
    %267 = vector.broadcast %266 : vector<1x32xf32> to vector<128x32xf32>
    %268 = arith.addf %265, %267 : vector<128x32xf32>
    %cst_140 = arith.constant 0.000000e+00 : f32
    %269 = vector.broadcast %cst_140 : f32 to vector<128x32xf32>
    %270 = arith.maximumf %268, %269 : vector<128x32xf32>
    %c0_141 = arith.constant 0 : index
    %c0_142 = arith.constant 0 : index
    %271 = vector.load %arg27[%c0_141, %c0_142] : memref<1x32xf32, #tpu.memory_space<vmem>>, vector<1x32xf32>
    %272 = vector.broadcast %271 : vector<1x32xf32> to vector<128x32xf32>
    %273 = arith.mulf %270, %272 : vector<128x32xf32>
    %cst_143 = arith.constant dense<0.000000e+00> : vector<128xf32>
    %274 = vector.multi_reduction <add>, %273, %cst_143 [1] : vector<128x32xf32> to vector<128xf32>
    %275 = vector.shape_cast %274 : vector<128xf32> to vector<128x1xf32>
    %c0_144 = arith.constant 0 : index
    %c0_145 = arith.constant 0 : index
    %276 = vector.load %arg28[%c0_144, %c0_145] : memref<1x1xf32, #tpu.memory_space<vmem>>, vector<1x1xf32>
    %277 = vector.broadcast %276 : vector<1x1xf32> to vector<128x1xf32>
    %278 = arith.addf %275, %277 : vector<128x1xf32>
    %c0_146 = arith.constant 0 : index
    %c0_147 = arith.constant 0 : index
    %279 = vector.load %arg29[%c0_146, %c0_147] : memref<128x1xf32, #tpu.memory_space<vmem>>, vector<128x1xf32>
    tpu.vector_store %arg29[%c0_146, %c0_147], %278 {strides = array<i32>} : memref<128x1xf32, #tpu.memory_space<vmem>>, vector<128x1xf32>,
    return
  }
  func.func @transform_0(%arg0: i32, %arg1: i32) -> (i32, i32) {
    %c0_i32 = arith.constant 0 : i32
    %c0_i32_0 = arith.constant 0 : i32
    return %arg1, %c0_i32 : i32, i32
  }
  func.func @transform_1(%arg0: i32, %arg1: i32) -> (i32, i32) {
    %c0_i32 = arith.constant 0 : i32
    %c0_i32_0 = arith.constant 0 : i32
    return %arg1, %c0_i32 : i32, i32
  }
  func.func @transform_2(%arg0: i32, %arg1: i32) -> (i32, i32, i32) {
    %c0_i32 = arith.constant 0 : i32
    %c0_i32_0 = arith.constant 0 : i32
    %c0_i32_1 = arith.constant 0 : i32
    return %arg0, %c0_i32, %c0_i32_0 : i32, i32, i32
  }
  func.func @transform_3(%arg0: i32, %arg1: i32) -> (i32, i32) {
    %c0_i32 = arith.constant 0 : i32
    %c0_i32_0 = arith.constant 0 : i32
    %c0_i32_1 = arith.constant 0 : i32
    return %c0_i32, %c0_i32_0 : i32, i32
  }
  func.func @transform_4(%arg0: i32, %arg1: i32) -> (i32, i32, i32) {
    %c0_i32 = arith.constant 0 : i32
    %c0_i32_0 = arith.constant 0 : i32
    %c0_i32_1 = arith.constant 0 : i32
    return %arg0, %c0_i32, %c0_i32_0 : i32, i32, i32
  }
  func.func @transform_5(%arg0: i32, %arg1: i32) -> (i32, i32) {
    %c0_i32 = arith.constant 0 : i32
    %c0_i32_0 = arith.constant 0 : i32
    %c0_i32_1 = arith.constant 0 : i32
    return %c0_i32, %c0_i32_0 : i32, i32
  }
  func.func @transform_6(%arg0: i32, %arg1: i32) -> (i32, i32) {
    %c0_i32 = arith.constant 0 : i32
    %c0_i32_0 = arith.constant 0 : i32
    %c0_i32_1 = arith.constant 0 : i32
    return %c0_i32, %c0_i32_0 : i32, i32
  }
  func.func @transform_7(%arg0: i32, %arg1: i32) -> (i32, i32, i32) {
    %c0_i32 = arith.constant 0 : i32
    %c0_i32_0 = arith.constant 0 : i32
    %c0_i32_1 = arith.constant 0 : i32
    %c0_i32_2 = arith.constant 0 : i32
    return %c0_i32, %c0_i32_0, %c0_i32_1 : i32, i32, i32
  }
  func.func @transform_8(%arg0: i32, %arg1: i32) -> (i32, i32, i32) {
    %c0_i32 = arith.constant 0 : i32
    %c0_i32_0 = arith.constant 0 : i32
    %c0_i32_1 = arith.constant 0 : i32
    %c0_i32_2 = arith.constant 0 : i32
    return %c0_i32, %c0_i32_0, %c0_i32_1 : i32, i32, i32
  }
  func.func @transform_9(%arg0: i32, %arg1: i32) -> (i32, i32, i32) {
    %c0_i32 = arith.constant 0 : i32
    %c0_i32_0 = arith.constant 0 : i32
    %c0_i32_1 = arith.constant 0 : i32
    %c0_i32_2 = arith.constant 0 : i32
    return %c0_i32, %c0_i32_0, %c0_i32_1 : i32, i32, i32
  }
  func.func @transform_10(%arg0: i32, %arg1: i32) -> (i32, i32, i32) {
    %c0_i32 = arith.constant 0 : i32
    %c0_i32_0 = arith.constant 0 : i32
    %c0_i32_1 = arith.constant 0 : i32
    %c0_i32_2 = arith.constant 0 : i32
    return %c0_i32, %c0_i32_0, %c0_i32_1 : i32, i32, i32
  }
  func.func @transform_11(%arg0: i32, %arg1: i32) -> (i32, i32, i32) {
    %c0_i32 = arith.constant 0 : i32
    %c0_i32_0 = arith.constant 0 : i32
    %c0_i32_1 = arith.constant 0 : i32
    %c0_i32_2 = arith.constant 0 : i32
    return %c0_i32, %c0_i32_0, %c0_i32_1 : i32, i32, i32
  }
  func.func @transform_12(%arg0: i32, %arg1: i32) -> (i32, i32, i32) {
    %c0_i32 = arith.constant 0 : i32
    %c0_i32_0 = arith.constant 0 : i32
    %c0_i32_1 = arith.constant 0 : i32
    %c0_i32_2 = arith.constant 0 : i32
    return %c0_i32, %c0_i32_0, %c0_i32_1 : i32, i32, i32
  }
  func.func @transform_13(%arg0: i32, %arg1: i32) -> (i32, i32, i32) {
    %c0_i32 = arith.constant 0 : i32
    %c0_i32_0 = arith.constant 0 : i32
    %c0_i32_1 = arith.constant 0 : i32
    %c0_i32_2 = arith.constant 0 : i32
    return %c0_i32, %c0_i32_0, %c0_i32_1 : i32, i32, i32
  }
  func.func @transform_14(%arg0: i32, %arg1: i32) -> (i32, i32, i32) {
    %c0_i32 = arith.constant 0 : i32
    %c0_i32_0 = arith.constant 0 : i32
    %c0_i32_1 = arith.constant 0 : i32
    %c0_i32_2 = arith.constant 0 : i32
    return %c0_i32, %c0_i32_0, %c0_i32_1 : i32, i32, i32
  }
  func.func @transform_15(%arg0: i32, %arg1: i32) -> (i32, i32, i32) {
    %c0_i32 = arith.constant 0 : i32
    %c0_i32_0 = arith.constant 0 : i32
    %c0_i32_1 = arith.constant 0 : i32
    %c0_i32_2 = arith.constant 0 : i32
    return %c0_i32, %c0_i32_0, %c0_i32_1 : i32, i32, i32
  }
  func.func @transform_16(%arg0: i32, %arg1: i32) -> (i32, i32, i32) {
    %c0_i32 = arith.constant 0 : i32
    %c0_i32_0 = arith.constant 0 : i32
    %c0_i32_1 = arith.constant 0 : i32
    %c0_i32_2 = arith.constant 0 : i32
    return %c0_i32, %c0_i32_0, %c0_i32_1 : i32, i32, i32
  }
  func.func @transform_17(%arg0: i32, %arg1: i32) -> (i32, i32) {
    %c0_i32 = arith.constant 0 : i32
    %c0_i32_0 = arith.constant 0 : i32
    %c0_i32_1 = arith.constant 0 : i32
    return %c0_i32, %c0_i32_0 : i32, i32
  }
  func.func @transform_18(%arg0: i32, %arg1: i32) -> (i32, i32) {
    %c0_i32 = arith.constant 0 : i32
    %c0_i32_0 = arith.constant 0 : i32
    %c0_i32_1 = arith.constant 0 : i32
    return %c0_i32, %c0_i32_0 : i32, i32
  }
  func.func @transform_19(%arg0: i32, %arg1: i32) -> (i32, i32) {
    %c0_i32 = arith.constant 0 : i32
    %c0_i32_0 = arith.constant 0 : i32
    %c0_i32_1 = arith.constant 0 : i32
    return %c0_i32, %c0_i32_0 : i32, i32
  }
  func.func @transform_20(%arg0: i32, %arg1: i32) -> (i32, i32) {
    %c0_i32 = arith.constant 0 : i32
    %c0_i32_0 = arith.constant 0 : i32
    %c0_i32_1 = arith.constant 0 : i32
    return %c0_i32, %c0_i32_0 : i32, i32
  }
  func.func @transform_21(%arg0: i32, %arg1: i32) -> (i32, i32) {
    %c0_i32 = arith.constant 0 : i32
    %c0_i32_0 = arith.constant 0 : i32
    %c0_i32_1 = arith.constant 0 : i32
    return %c0_i32, %c0_i32_0 : i32, i32
  }
  func.func @transform_22(%arg0: i32, %arg1: i32) -> (i32, i32) {
    %c0_i32 = arith.constant 0 : i32
    %c0_i32_0 = arith.constant 0 : i32
    %c0_i32_1 = arith.constant 0 : i32
    return %c0_i32, %c0_i32_0 : i32, i32
  }
  func.func @transform_23(%arg0: i32, %arg1: i32) -> (i32, i32) {
    %c0_i32 = arith.constant 0 : i32
    %c0_i32_0 = arith.constant 0 : i32
    %c0_i32_1 = arith.constant 0 : i32
    return %c0_i32, %c0_i32_0 : i32, i32
  }
  func.func @transform_24(%arg0: i32, %arg1: i32) -> (i32, i32) {
    %c0_i32 = arith.constant 0 : i32
    %c0_i32_0 = arith.constant 0 : i32
    %c0_i32_1 = arith.constant 0 : i32
    return %c0_i32, %c0_i32_0 : i32, i32
  }
  func.func @transform_25(%arg0: i32, %arg1: i32) -> (i32, i32) {
    %c0_i32 = arith.constant 0 : i32
    %c0_i32_0 = arith.constant 0 : i32
    %c0_i32_1 = arith.constant 0 : i32
    return %c0_i32, %c0_i32_0 : i32, i32
  }
  func.func @transform_26(%arg0: i32, %arg1: i32) -> (i32, i32) {
    %c0_i32 = arith.constant 0 : i32
    %c0_i32_0 = arith.constant 0 : i32
    %c0_i32_1 = arith.constant 0 : i32
    return %c0_i32, %c0_i32_0 : i32, i32
  }
  func.func @transform_27(%arg0: i32, %arg1: i32) -> (i32, i32) {
    %c0_i32 = arith.constant 0 : i32
    %c0_i32_0 = arith.constant 0 : i32
    return %arg1, %c0_i32 : i32, i32
  }
}

</mosaic_0001>

<bundles_post_ra>
// kernel: tpu_custom_call.1
= control target key start
LH: loop header
LB: loop body
LE: loop exit
PB: predicated region body
PF: predicated region fallthrough
CT: control target
= control target key end

     0   :  { %s6053_s28 = smov 0   ;;  %s8861_s0 = inlined_call_operand.vmem [shape: s32[128,1], index: 0, kind: input, shape index: {}]   ;;  %s8862_s1 = inlined_call_operand.vmem [shape: s32[128,1], index: 1, kind: input, shape index: {}]   ;;  %s8863_s2 = inlined_call_operand.vmem [shape: bf16[2,128,128], index: 2, kind: input, shape index: {}]   ;;  %s8864_s3 = inlined_call_operand.vmem [shape: f32[1,128], index: 3, kind: input, shape index: {}]   ;;  %s8865_s4 = inlined_call_operand.vmem [shape: f32[2,1,128], index: 4, kind: input, shape index: {}]   ;;  %s8866_s5 = inlined_call_operand.vmem [shape: f32[1,64], index: 5, kind: input, shape index: {}]   ;;  %s8867_s6 = inlined_call_operand.vmem [shape: f32[1,64], index: 6, kind: input, shape index: {}]   ;;  %s8868_s7 = inlined_call_operand.vmem [shape: bf16[2,64,64], index: 7, kind: input, shape index: {}]   ;;  %s8869_s8 = inlined_call_operand.vmem [shape: f32[2,1,64], index: 8, kind: input, shape index: {}]   ;;  %s8870_s9 = inlined_call_operand.vmem [shape: f32[2,1,64], index: 9, kind: input, shape index: {}]   ;;  %s8871_s10 = inlined_call_operand.vmem [shape: f32[2,1,64], index: 10, kind: input, shape index: {}]   ;;  %s8872_s11 = inlined_call_operand.vmem [shape: bf16[2,64,256], index: 11, kind: input, shape index: {}]   ;;  %s8873_s12 = inlined_call_operand.vmem [shape: f32[2,1,256], index: 12, kind: input, shape index: {}]   ;;  %s8874_s13 = inlined_call_operand.vmem [shape: bf16[2,256,64], index: 13, kind: input, shape index: {}]   ;;  %s8875_s14 = inlined_call_operand.vmem [shape: f32[2,1,64], index: 14, kind: input, shape index: {}]   ;;  %s8876_s15 = inlined_call_operand.vmem [shape: f32[2,1,64], index: 15, kind: input, shape index: {}]   ;;  %s8877_s16 = inlined_call_operand.vmem [shape: f32[2,1,64], index: 16, kind: input, shape index: {}]   ;;  %s8878_s17 = inlined_call_operand.vmem [shape: f32[1,64], index: 17, kind: input, shape index: {}]   ;;  %s8879_s18 = inlined_call_operand.<no memory space> [shape: f32[1,1], index: 18, kind: input, shape index: {}]   ;;  %s8880_s19 = inlined_call_operand.vmem [shape: f32[1,32], index: 19, kind: input, shape index: {}]   ;;  %s8881_s20 = inlined_call_operand.vmem [shape: f32[1,32], index: 20, kind: input, shape index: {}]   ;;  %s8882_s21 = inlined_call_operand.vmem [shape: f32[1,32], index: 21, kind: input, shape index: {}]   ;;  %s8883_s23 = inlined_call_operand.vmem [shape: f32[1,32], index: 23, kind: input, shape index: {}]   ;;  %s8884_s24 = inlined_call_operand.vmem [shape: f32[1,32], index: 24, kind: input, shape index: {}]   ;;  %s8885_s25 = inlined_call_operand.vmem [shape: f32[1,32], index: 25, kind: input, shape index: {}]   ;;  %s8886_s27 = inlined_call_operand.vmem [shape: f32[128,1], index: 27, kind: output, shape index: {}]   ;;  %s8887_s22 = inlined_call_operand.<no memory space> [shape: f32[1,1], index: 22, kind: input, shape index: {}]   ;;  %s8888_s26 = inlined_call_operand.<no memory space> [shape: f32[1,1], index: 26, kind: input, shape index: {}]  }
   0x1   :  { %8921 = sst [smem:[#allocation9_spill]] %s8861_s0  ;;  %v32_v0 = vstv %s8879_s18  ;;  %v34_v1 = vstv %s8887_s22  ;;  %v36_v2 = vstv %s8888_s26  ;;  %s6055_s0 = smov 0  }
   0x2   :  { %8922 = sst [smem:[#allocation10_spill]] %s8862_s1  ;;  %33 = vst [vmem:[#allocation3] sm:$0x1] %v32_v0  ;;  %35 = vst [vmem:[#allocation4] sm:$0x1] %v34_v1 }
   0x3   :  { %8923 = sst [smem:[#allocation11_spill]] %s8863_s2  ;;  %37 = vst [vmem:[#allocation5] sm:$0x1] %v36_v2 }
   0x4   :  { %8924 = sst [smem:[#allocation12_spill]] %s8864_s3 }
   0x5   :  { %8925 = sst [smem:[#allocation13_spill]] %s8865_s4 }
   0x6   :  { %8926 = sst [smem:[#allocation14_spill]] %s8866_s5 }
   0x7   :  { %8927 = sst [smem:[#allocation15_spill]] %s8867_s6 }
   0x8   :  { %8928 = sst [smem:[#allocation16_spill]] %s8868_s7 }
   0x9   :  { %8929 = sst [smem:[#allocation17_spill]] %s8869_s8 }
   0xa   :  { %8930 = sst [smem:[#allocation18_spill]] %s8870_s9 }
   0xb   :  { %8931 = sst [smem:[#allocation19_spill]] %s8871_s10  ;;  %s6057_s10 = smov 0  }
   0xc   :  { %8932 = sst [smem:[#allocation20_spill]] %s8872_s11 }
   0xd LB: > { %s55_s18 = sadd.s32 1, %s5895_s0  ;;  %p5038_p0 = scmp.ge.s32.totalorder %s5899_s10, 1  ;;  %s5899_s10 = sphi %s6057_s10, %s43_s10   ;;  %s5895_s0 = sphi %s6055_s0, %s8982_s0   ;;  %s5891_s28 = sphi %s6053_s28, %s8981_s28  }
   0xe   : > { %p57_p1 = scmp.ge.s32.totalorder %s55_s18, 2  ;;  %p785_p2 = scmp.lt.s32.totalorder %s5899_s10, 3 }
  0x10   : > { %s8984_s18 = smov (%p57_p1, %s55_s18), 0  ;;  %p786_p3 = pnand %p5038_p0, %p785_p2 }
  0x12   : > { %789 = sbr.rel (%p786_p3) target bundleno = 3926 (0xf56), region = 128 }
  0x19   : > { %p882_p4 = scmp.lt.s32.totalorder %s5891_s28, 1  ;;  %s8933_s6 = sld [smem:[#allocation13_spill]] }
  0x1a   : > { %s8934_s7 = sld [smem:[#allocation11_spill]]  ;;  %p5041_p5 = scmp.ne.s32.totalorder %s5891_s28, 0 }
  0x1b   : > { %s6071_s22 = scalar_select %p882_p4, %s5891_s28, 1 }
  0x1c   : > { %900 = sbr.rel (%p5041_p5) target bundleno = 37 (0x25), region = 132  ;;  %vm903_vm0 = vcmask (!%p5041_p5), 7168   ;;  %v5901_v3 = vmov (!%p5041_p5), 0.0  }
  0x1d   : > { %s5287_s26 = sshll.u32 %s6071_s22, 6  ;;  %904 = vst.msk [vmem:[#allocation2] sm:$0xff] (!%p5041_p5), %vm903_vm0, %v5901_v3  ;;  %905 = vst.msk [vmem:[#allocation2 + $0x8] sm:$0xff] (!%p5041_p5), %vm903_vm0, %v5901_v3 }
  0x1e   : > { %906 = vst.msk [vmem:[#allocation2 + $0x10] sm:$0xff] (!%p5041_p5), %vm903_vm0, %v5901_v3  ;;  %907 = vst.msk [vmem:[#allocation2 + $0x18] sm:$0xff] (!%p5041_p5), %vm903_vm0, %v5901_v3 }
  0x1f   : > { %s889_s11 = scalar_lea.vmem %s8933_s6, %s6071_s22  ;;  %908 = vst.msk [vmem:[#allocation2 + $0x20] sm:$0xff] (!%p5041_p5), %vm903_vm0, %v5901_v3  ;;  %909 = vst.msk [vmem:[#allocation2 + $0x28] sm:$0xff] (!%p5041_p5), %vm903_vm0, %v5901_v3 }
  0x20   : > { %s6081_s4 = scalar_lea.vmem %s8934_s7, %s5287_s26  ;;  %910 = vst.msk [vmem:[#allocation2 + $0x30] sm:$0xff] (!%p5041_p5), %vm903_vm0, %v5901_v3  ;;  %911 = vst.msk [vmem:[#allocation2 + $0x38] sm:$0xff] (!%p5041_p5), %vm903_vm0, %v5901_v3 }
  0x21   : > { %912 = vst.msk [vmem:[#allocation2 + $0x40] sm:$0xff] (!%p5041_p5), %vm903_vm0, %v5901_v3  ;;  %913 = vst.msk [vmem:[#allocation2 + $0x48] sm:$0xff] (!%p5041_p5), %vm903_vm0, %v5901_v3 }
  0x22   : > { %914 = vst.msk [vmem:[#allocation2 + $0x50] sm:$0xff] (!%p5041_p5), %vm903_vm0, %v5901_v3  ;;  %915 = vst.msk [vmem:[#allocation2 + $0x58] sm:$0xff] (!%p5041_p5), %vm903_vm0, %v5901_v3 }
  0x23   : > { %916 = vst.msk [vmem:[#allocation2 + $0x60] sm:$0xff] %vm903_vm0, %v5901_v3  ;;  %917 = vst.msk [vmem:[#allocation2 + $0x68] sm:$0xff] %vm903_vm0, %v5901_v3 }
  0x24   : > { %918 = vst.msk [vmem:[#allocation2 + $0x70] sm:$0xff] %vm903_vm0, %v5901_v3  ;;  %919 = vst.msk [vmem:[#allocation2 + $0x78] sm:$0xff] %vm903_vm0, %v5901_v3 }
  0x25 PF: > { %s8935_s9 = sld [smem:[#allocation10_spill]]  ;;  %s8936_s26 = sld [smem:[#allocation9_spill]]  ;;  %v8917_v6 = vmov 0   ;;  %v5613_v13 = vld [vmem:[%s6081_s4] sm:$0xff]   ;;  %v5614_v14 = vld [vmem:[%s6081_s4 + $0x8] sm:$0xff]   ;;  %v5615_v17 = vld [vmem:[%s6081_s4 + $0x10] sm:$0xff]   ;;  %v8916_v45 = vlaneseq }
  0x26   : > { %5612 = vset.pattern.permute.xlu1 %v8917_v6  ;;  %5611 = vset.pattern.permute.xlu0 %v8917_v6  ;;  %v5616_v20 = vld [vmem:[%s6081_s4 + $0x18] sm:$0xff]   ;;  %v5617_v23 = vld [vmem:[%s6081_s4 + $0x20] sm:$0xff]   ;;  %v5618_v26 = vld [vmem:[%s6081_s4 + $0x28] sm:$0xff]   ;;  %s8937_s29 = sld [smem:[#allocation12_spill]]  ;;  %v5903_v54 = vmov 1.0|1.0  }
  0x27   : > { %5472 = vmatprep.subr.bf16.mxu0 %v5613_v13  ;;  %5504 = vmatprep.subr.bf16.mxu1 %v5613_v13  ;;  %v5619_v29 = vld [vmem:[%s6081_s4 + $0x30] sm:$0xff]   ;;  %v5620_v32 = vld [vmem:[%s6081_s4 + $0x38] sm:$0xff]   ;;  %v6206_v46 = vand.u32 127, %v8916_v45  ;;  %v6259_v56 = vld [vmem:[%s889_s11] ss:$0 sm:$0xff]  ;;  %s8945_s2 = sld [smem:[#allocation16_spill]] }
  0x28   : > { %5473 = vmatpush3.bf16.msra.mxu0 %v5613_v13  ;;  %5505 = vmatpush3.bf16.msra.mxu1 %v5613_v13  ;;  %s8969_s1 = sld [smem:[#allocation14_spill]]  ;;  %s8970_s11 = sld [smem:[#allocation15_spill]] }
  0x29   : > { %5474 = vmatprep.subr.bf16.mxu0 %v5614_v14  ;;  %5506 = vmatprep.subr.bf16.mxu1 %v5614_v14  ;;  %s8974_s8 = sld [smem:[#allocation17_spill]]  ;;  %s8975_s28 = sld [smem:[#allocation20_spill]] }
  0x2a   : > { %s8977_s5 = sld [smem:[#allocation18_spill]] }
  0x2b   : > { %v1002_v4 = vld [vmem:[%s8935_s9] sm:$0xff]  ;;  %v1003_v7 = vld [vmem:[%s8935_s9 + $0x8] sm:$0xff]  ;;  %v925_v9 = vld [vmem:[%s8936_s26 + $0x18] sm:$0xff] }
  0x2c   : > { %v922_v5 = vld [vmem:[%s8936_s26] sm:$0xff]  ;;  %1019 = vperm.xlu1 %5612, %v1002_v4   ;;  %v923_v8 = vld [vmem:[%s8936_s26 + $0x8] sm:$0xff]  ;;  %v924_v10 = vld [vmem:[%s8936_s26 + $0x10] sm:$0xff]  ;;  %5475 = vmatpush3.bf16.msra.mxu0 %v5614_v14 }
  0x2d   : > { %939 = vperm.xlu0 %5611, %v922_v5   ;;  %v1005_v11 = vld [vmem:[%s8935_s9 + $0x18] sm:$0xff]  ;;  %v1004_v12 = vld [vmem:[%s8935_s9 + $0x10] sm:$0xff]  ;;  %v927_v15 = vld [vmem:[%s8936_s26 + $0x28] sm:$0xff]  ;;  %5507 = vmatpush3.bf16.msra.mxu1 %v5614_v14 }
  0x2e   : > { %v926_v16 = vld [vmem:[%s8936_s26 + $0x20] sm:$0xff]  ;;  %v1007_v18 = vld [vmem:[%s8935_s9 + $0x28] sm:$0xff]  ;;  %5476 = vmatprep.subr.bf16.mxu0 %v5615_v17  ;;  %5508 = vmatprep.subr.bf16.mxu1 %v5615_v17  ;;  %v929_v21 = vld [vmem:[%s8936_s26 + $0x38] sm:$0xff] }
  0x2f   : > { %v1006_v19 = vld [vmem:[%s8935_s9 + $0x20] sm:$0xff]  ;;  %v928_v22 = vld [vmem:[%s8936_s26 + $0x30] sm:$0xff]  ;;  %v1009_v24 = vld [vmem:[%s8935_s9 + $0x38] sm:$0xff] }
  0x30   : > { %1022 = vperm.xlu1 %5612, %v1003_v7   ;;  %5477 = vmatpush3.bf16.msra.mxu0 %v5615_v17  ;;  %v1008_v25 = vld [vmem:[%s8935_s9 + $0x30] sm:$0xff]  ;;  %v931_v27 = vld [vmem:[%s8936_s26 + $0x48] sm:$0xff]  ;;  %v930_v28 = vld [vmem:[%s8936_s26 + $0x40] sm:$0xff] }
  0x31   : > { %942 = vperm.xlu0 %5611, %v923_v8   ;;  %5509 = vmatpush3.bf16.msra.mxu1 %v5615_v17  ;;  %v1011_v30 = vld [vmem:[%s8935_s9 + $0x48] sm:$0xff]  ;;  %v1010_v31 = vld [vmem:[%s8935_s9 + $0x40] sm:$0xff]  ;;  %v933_v33 = vld [vmem:[%s8936_s26 + $0x58] sm:$0xff] }
  0x32   : > { %5478 = vmatprep.subr.bf16.mxu0 %v5616_v20  ;;  %5510 = vmatprep.subr.bf16.mxu1 %v5616_v20  ;;  %v932_v34 = vld [vmem:[%s8936_s26 + $0x50] sm:$0xff]  ;;  %v1013_v35 = vld [vmem:[%s8935_s9 + $0x58] sm:$0xff]  ;;  %v935_v37 = vld [vmem:[%s8936_s26 + $0x68] sm:$0xff] }
  0x33   : > { %v1012_v36 = vld [vmem:[%s8935_s9 + $0x50] sm:$0xff]  ;;  %v934_v38 = vld [vmem:[%s8936_s26 + $0x60] sm:$0xff]  ;;  %v1015_v39 = vld [vmem:[%s8935_s9 + $0x68] sm:$0xff] }
  0x34   : > { %948 = vperm.xlu1 %5612, %v925_v9   ;;  %5479 = vmatpush3.bf16.msra.mxu0 %v5616_v20  ;;  %v1014_v40 = vld [vmem:[%s8935_s9 + $0x60] sm:$0xff]  ;;  %v937_v41 = vld [vmem:[%s8936_s26 + $0x78] sm:$0xff]  ;;  %v936_v42 = vld [vmem:[%s8936_s26 + $0x70] sm:$0xff] }
  0x35   : > { %945 = vperm.xlu0 %5611, %v924_v10   ;;  %5511 = vmatpush3.bf16.msra.mxu1 %v5616_v20  ;;  %v1017_v43 = vld [vmem:[%s8935_s9 + $0x78] sm:$0xff]  ;;  %v1016_v44 = vld [vmem:[%s8935_s9 + $0x70] sm:$0xff]  ;;  %v6211_v47 = vld [vmem:[%s8937_s29] ss:$0 sm:$0xff]  ;;  %s8976_s29 = smov %s8975_s28 }
  0x36   : > { %5480 = vmatprep.subr.bf16.mxu0 %v5617_v23  ;;  %5512 = vmatprep.subr.bf16.mxu1 %v5617_v23 }
  0x38   : > { %1028 = vperm.xlu1 %5612, %v1005_v11   ;;  %5481 = vmatpush3.bf16.msra.mxu0 %v5617_v23 }
  0x39   : > { %1025 = vperm.xlu0 %5611, %v1004_v12   ;;  %5513 = vmatpush3.bf16.msra.mxu1 %v5617_v23 }
  0x3a   : > { %5482 = vmatprep.subr.bf16.mxu0 %v5618_v26  ;;  %5514 = vmatprep.subr.bf16.mxu1 %v5618_v26 }
  0x3c   : > { %954 = vperm.xlu1 %5612, %v927_v15   ;;  %5483 = vmatpush3.bf16.msra.mxu0 %v5618_v26 }
  0x3d   : > { %951 = vperm.xlu0 %5611, %v926_v16   ;;  %5515 = vmatpush3.bf16.msra.mxu1 %v5618_v26 }
  0x3e   : > { %5484 = vmatprep.subr.bf16.mxu0 %v5619_v29  ;;  %5516 = vmatprep.subr.bf16.mxu1 %v5619_v29 }
  0x40   : > { %1034 = vperm.xlu1 %5612, %v1007_v18   ;;  %5485 = vmatpush3.bf16.msra.mxu0 %v5619_v29 }
  0x41   : > { %1031 = vperm.xlu0 %5611, %v1006_v19   ;;  %5517 = vmatpush3.bf16.msra.mxu1 %v5619_v29 }
  0x42   : > { %5486 = vmatprep.subr.bf16.mxu0 %v5620_v32  ;;  %5518 = vmatprep.subr.bf16.mxu1 %v5620_v32 }
  0x44   : > { %960 = vperm.xlu1 %5612, %v929_v21   ;;  %5487 = vmatpush3.bf16.msra.mxu0 %v5620_v32 }
  0x45   : > { %957 = vperm.xlu0 %5611, %v928_v22   ;;  %5519 = vmatpush3.bf16.msra.mxu1 %v5620_v32 }
  0x48   : > { %1040 = vperm.xlu1 %5612, %v1009_v24  }
  0x49   : > { %1037 = vperm.xlu0 %5611, %v1008_v25  }
  0x4c   : > { %966 = vperm.xlu1 %5612, %v931_v27  }
  0x4d   : > { %963 = vperm.xlu0 %5611, %v930_v28  }
  0x50   : > { %1046 = vperm.xlu1 %5612, %v1011_v30  }
  0x51   : > { %1043 = vperm.xlu0 %5611, %v1010_v31  }
  0x54   : > { %972 = vperm.xlu1 %5612, %v933_v33  }
  0x55   : > { %969 = vperm.xlu0 %5611, %v932_v34  }
  0x58   : > { %1052 = vperm.xlu1 %5612, %v1013_v35  }
  0x59   : > { %1049 = vperm.xlu0 %5611, %v1012_v36  }
  0x5c   : > { %978 = vperm.xlu1 %5612, %v935_v37  }
  0x5d   : > { %975 = vperm.xlu0 %5611, %v934_v38  }
  0x60   : > { %1058 = vperm.xlu1 %5612, %v1015_v39  }
  0x61   : > { %1055 = vperm.xlu0 %5611, %v1014_v40  }
  0x64   : > { %984 = vperm.xlu1 %5612, %v937_v41  }
  0x65   : > { %981 = vperm.xlu0 %5611, %v936_v42  }
  0x68   : > { %1064 = vperm.xlu1 %5612, %v1017_v43  }
  0x69   : > { %1061 = vperm.xlu0 %5611, %v1016_v44  }
  0xab   : > { %v6213_v48 = vpop.permute.xlu1 %1019 }
  0xac   : > { %v6215_v49 = vpop.permute.xlu0 %939  ;;  %vm8899_vm2 = vcmp.eq.s32.totalorder %v6206_v46, %v6213_v48 }
  0xad   : > { %vm8897_vm1 = vcmp.eq.s32.totalorder %v6206_v46, %v6215_v49  ;;  %v1572_v55 = vsel %vm8899_vm2, %v6211_v47, 0.0  ;;  %v1674_v63 = vsel %vm8899_vm2, %v6259_v56, 0.0 }
  0xae   : > { %v1524_v50 = vsel %vm8897_vm1, %v6211_v47, 0.0  ;;  %v1626_v59 = vsel %vm8897_vm1, %v6259_v56, 0.0 }
  0xaf   : > { %1540 = vadd.xlane.f32.xlu0 %v1524_v50  ;;  %v6225_v51 = vpop.permute.xlu1 %1022 }
  0xb0   : > { %v6227_v52 = vpop.permute.xlu0 %942  ;;  %vm8898_vm3 = vcmp.eq.s32.totalorder %v6206_v46, %v6225_v51 }
  0xb1   : > { %vm8896_vm4 = vcmp.eq.s32.totalorder %v6206_v46, %v6227_v52  ;;  %vm5098_vm5 = vmpackc.low %vm8898_vm3, %vm8899_vm2  ;;  %v1573_v60 = vsel %vm8898_vm3, %v6211_v47, 0.0  ;;  %v1675_v4 = vsel %vm8898_vm3, %v6259_v56, 0.0 }
  0xb2   : > { %v1525_v53 = vsel %vm8896_vm4, %v6211_v47, 0.0  ;;  %5520 = vmatprep.mubr.msk.bf16.mxu1 %vm5098_vm5, %v5903_v54  ;;  %vm5082_vm6 = vmpackc.low %vm8896_vm4, %vm8897_vm1  ;;  %v1627_v0 = vsel %vm8896_vm4, %v6259_v56, 0.0 }
  0xb3   : > { %1542 = vadd.xlane.f32.xlu1 %v1525_v53  ;;  %1588 = vadd.xlane.f32.xlu0 %v1572_v55  ;;  %v6262_v57 = vpop.permute.xlu1 %948 }
  0xb4   : > { %5488 = vmatprep.mubr.msk.bf16.mxu0 %vm5082_vm6, %v5903_v54  ;;  %v6264_v58 = vpop.permute.xlu0 %945  ;;  %vm8900_vm7 = vcmp.eq.s32.totalorder %v6206_v46, %v6262_v57 }
  0xb5   : > { %vm8901_vm8 = vcmp.eq.s32.totalorder %v6206_v46, %v6264_v58  ;;  %v1527_v9 = vsel %vm8900_vm7, %v6211_v47, 0.0  ;;  %v1629_v17 = vsel %vm8900_vm7, %v6259_v56, 0.0 }
  0xb6   : > { %vm5084_vm9 = vmpackc.low %vm8900_vm7, %vm8901_vm8  ;;  %v1526_v3 = vsel %vm8901_vm8, %v6211_v47, 0.0  ;;  %v1628_v12 = vsel %vm8901_vm8, %v6259_v56, 0.0 }
  0xb7   : > { %1642 = vadd.xlane.f32.xlu1 %v1626_v59  ;;  %5489 = vmatmul.mubr.msk.bf16.vlgmr.msra.gmra.mrb[0].mxu0 %vm5084_vm9, %v5903_v54  ;;  %v6285_v61 = vpop.permute.xlu1 %1028 }
  0xb8   : > { %1590 = vadd.xlane.f32.xlu0 %v1573_v60  ;;  %v6287_v62 = vpop.permute.xlu0 %1025  ;;  %vm8902_vm10 = vcmp.eq.s32.totalorder %v6206_v46, %v6285_v61 }
  0xb9   : > { %vm8904_vm11 = vcmp.eq.s32.totalorder %v6206_v46, %v6287_v62  ;;  %v1575_v13 = vsel %vm8902_vm10, %v6211_v47, 0.0  ;;  %v1677_v21 = vsel %vm8902_vm10, %v6259_v56, 0.0 }
  0xba   : > { %vm5100_vm12 = vmpackc.low %vm8902_vm10, %vm8904_vm11  ;;  %v1574_v8 = vsel %vm8904_vm11, %v6211_v47, 0.0  ;;  %v1676_v16 = vsel %vm8904_vm11, %v6259_v56, 0.0 }
  0xbb   : > { %5521 = vmatmul.mubr.msk.bf16.vlgmr.msra.gmra.mrb[0].mxu1 %vm5100_vm12, %v5903_v54  ;;  %1690 = vadd.xlane.f32.xlu1 %v1674_v63  ;;  %v6308_v1 = vpop.permute.xlu1 %954 }
  0xbc   : > { %1644 = vadd.xlane.f32.xlu0 %v1627_v0  ;;  %v6310_v2 = vpop.permute.xlu0 %951  ;;  %vm8907_vm13 = vcmp.eq.s32.totalorder %v6206_v46, %v6308_v1 }
  0xbd   : > { %vm8903_vm14 = vcmp.eq.s32.totalorder %v6206_v46, %v6310_v2  ;;  %v1529_v25 = vsel %vm8907_vm13, %v6211_v47, 0.0  ;;  %v1631_v33 = vsel %vm8907_vm13, %v6259_v56, 0.0 }
  0xbe   : > { %vm5086_vm15 = vmpackc.low %vm8907_vm13, %vm8903_vm14  ;;  %v1528_v20 = vsel %vm8903_vm14, %v6211_v47, 0.0  ;;  %v1630_v28 = vsel %vm8903_vm14, %v6259_v56, 0.0 }
  0xbf   : > { %1544 = vadd.xlane.f32.xlu1 %v1526_v3  ;;  %5492 = vmatprep.mubr.msk.bf16.mxu0 %vm5086_vm15, %v5903_v54  ;;  %v6331_v5 = vpop.permute.xlu1 %1034 }
  0xc0   : > { %1692 = vadd.xlane.f32.xlu0 %v1675_v4  ;;  %v6333_v7 = vpop.permute.xlu0 %1031  ;;  %vm8909_vm0 = vcmp.eq.s32.totalorder %v6206_v46, %v6331_v5 }
  0xc1   : > { %vm8908_vm5 = vcmp.eq.s32.totalorder %v6206_v46, %v6333_v7  ;;  %v1577_v29 = vsel %vm8909_vm0, %v6211_v47, 0.0  ;;  %v1679_v37 = vsel %vm8909_vm0, %v6259_v56, 0.0 }
  0xc2   : > { %vm5102_vm6 = vmpackc.low %vm8909_vm0, %vm8908_vm5  ;;  %v1576_v24 = vsel %vm8908_vm5, %v6211_v47, 0.0  ;;  %v1678_v32 = vsel %vm8908_vm5, %v6259_v56, 0.0 }
  0xc3   : > { %5524 = vmatprep.mubr.msk.bf16.mxu1 %vm5102_vm6, %v5903_v54  ;;  %1592 = vadd.xlane.f32.xlu1 %v1574_v8  ;;  %v6354_v10 = vpop.permute.xlu1 %960 }
  0xc4   : > { %1546 = vadd.xlane.f32.xlu0 %v1527_v9  ;;  %v6356_v11 = vpop.permute.xlu0 %957  ;;  %vm993_vm9 = vcmp.eq.s32.totalorder %v6206_v46, %v6354_v10 }
  0xc5   : > { %vm8911_vm12 = vcmp.eq.s32.totalorder %v6206_v46, %v6356_v11  ;;  %v1531_v41 = vsel %vm993_vm9, %v6211_v47, 0.0  ;;  %v1633_v60 = vsel %vm993_vm9, %v6259_v56, 0.0 }
  0xc6   : > { %vm5088_vm15 = vmpackc.low %vm993_vm9, %vm8911_vm12  ;;  %v1530_v36 = vsel %vm8911_vm12, %v6211_v47, 0.0  ;;  %v1632_v44 = vsel %vm8911_vm12, %v6259_v56, 0.0 }
  0xc7   : > { %1646 = vadd.xlane.f32.xlu1 %v1628_v12  ;;  %5493 = vmatmul.mubr.msk.bf16.gmra.mrb[4].mxu0 %vm5088_vm15, %v5903_v54  ;;  %v6377_v14 = vpop.permute.xlu1 %1040 }
  0xc8   : > { %1594 = vadd.xlane.f32.xlu0 %v1575_v13  ;;  %v6379_v15 = vpop.permute.xlu0 %1037  ;;  %vm1073_vm6 = vcmp.eq.s32.totalorder %v6206_v46, %v6377_v14 }
  0xc9   : > { %vm1072_vm4 = vcmp.eq.s32.totalorder %v6206_v46, %v6379_v15  ;;  %v1579_v50 = vsel %vm1073_vm6, %v6211_v47, 0.0 }
  0xca   : > { %vm5104_vm1 = vmpackc.low %vm1073_vm6, %vm1072_vm4  ;;  %v1578_v40 = vsel %vm1072_vm4, %v6211_v47, 0.0  ;;  %v1680_v59 = vsel %vm1072_vm4, %v6259_v56, 0.0 }
  0xcb   : > { %5525 = vmatmul.mubr.msk.bf16.gmra.mrb[4].mxu1 %vm5104_vm1, %v5903_v54  ;;  %1694 = vadd.xlane.f32.xlu1 %v1676_v16  ;;  %v6400_v18 = vpop.permute.xlu1 %966 }
  0xcc   : > { %1648 = vadd.xlane.f32.xlu0 %v1629_v17  ;;  %v6402_v19 = vpop.permute.xlu0 %963  ;;  %vm995_vm15 = vcmp.eq.s32.totalorder %v6206_v46, %v6400_v18 }
  0xcd   : > { %vm994_vm3 = vcmp.eq.s32.totalorder %v6206_v46, %v6402_v19  ;;  %v1533_v3 = vsel %vm995_vm15, %v6211_v47, 0.0  ;;  %v1635_v12 = vsel %vm995_vm15, %v6259_v56, 0.0 }
  0xce   : > { %vm5090_vm1 = vmpackc.low %vm995_vm15, %vm994_vm3  ;;  %v1532_v63 = vsel %vm994_vm3, %v6211_v47, 0.0  ;;  %v1634_v4 = vsel %vm994_vm3, %v6259_v56, 0.0 }
  0xcf   : > { %1548 = vadd.xlane.f32.xlu1 %v1528_v20  ;;  %5496 = vmatprep.mubr.msk.bf16.mxu0 %vm5090_vm1, %v5903_v54  ;;  %v6423_v22 = vpop.permute.xlu1 %1046 }
  0xd0   : > { %1696 = vadd.xlane.f32.xlu0 %v1677_v21  ;;  %v6425_v23 = vpop.permute.xlu0 %1043  ;;  %vm1075_vm2 = vcmp.eq.s32.totalorder %v6206_v46, %v6423_v22 }
  0xd1   : > { %vm1074_vm7 = vcmp.eq.s32.totalorder %v6206_v46, %v6425_v23  ;;  %v1581_v8 = vsel %vm1075_vm2, %v6211_v47, 0.0  ;;  %v1683_v16 = vsel %vm1075_vm2, %v6259_v56, 0.0 }
  0xd2   : > { %vm5106_vm8 = vmpackc.low %vm1075_vm2, %vm1074_vm7  ;;  %v1580_v0 = vsel %vm1074_vm7, %v6211_v47, 0.0  ;;  %v1682_v9 = vsel %vm1074_vm7, %v6259_v56, 0.0 }
  0xd3   : > { %5528 = vmatprep.mubr.msk.bf16.mxu1 %vm5106_vm8, %v5903_v54  ;;  %1596 = vadd.xlane.f32.xlu1 %v1576_v24  ;;  %v6446_v26 = vpop.permute.xlu1 %972 }
  0xd4   : > { %1550 = vadd.xlane.f32.xlu0 %v1529_v25  ;;  %v6448_v27 = vpop.permute.xlu0 %969  ;;  %vm8905_vm1 = vcmp.eq.s32.totalorder %v6206_v46, %v6446_v26 }
  0xd5   : > { %vm996_vm10 = vcmp.eq.s32.totalorder %v6206_v46, %v6448_v27 }
  0xd6   : > { %vm5092_vm8 = vmpackc.low %vm8905_vm1, %vm996_vm10  ;;  %v1534_v13 = vsel %vm996_vm10, %v6211_v47, 0.0  ;;  %v1636_v21 = vsel %vm996_vm10, %v6259_v56, 0.0 }
  0xd7   : > { %1650 = vadd.xlane.f32.xlu1 %v1630_v28  ;;  %5497 = vmatmul.mubr.msk.bf16.gmra.mrb[8].mxu0 %vm5092_vm8, %v5903_v54  ;;  %v6469_v30 = vpop.permute.xlu1 %1052 }
  0xd8   : > { %1598 = vadd.xlane.f32.xlu0 %v1577_v29  ;;  %v6471_v31 = vpop.permute.xlu0 %1049  ;;  %vm8906_vm14 = vcmp.eq.s32.totalorder %v6206_v46, %v6469_v30 }
  0xd9   : > { %vm1076_vm11 = vcmp.eq.s32.totalorder %v6206_v46, %v6471_v31 }
  0xda   : > { %vm5108_vm1 = vmpackc.low %vm8906_vm14, %vm1076_vm11  ;;  %v1582_v17 = vsel %vm1076_vm11, %v6211_v47, 0.0  ;;  %v1684_v25 = vsel %vm1076_vm11, %v6259_v56, 0.0 }
  0xdb   : > { %5529 = vmatmul.mubr.msk.bf16.gmra.mrb[8].mxu1 %vm5108_vm1, %v5903_v54  ;;  %1698 = vadd.xlane.f32.xlu1 %v1678_v32  ;;  %v6492_v34 = vpop.permute.xlu1 %978 }
  0xdc   : > { %1652 = vadd.xlane.f32.xlu0 %v1631_v33  ;;  %v6494_v35 = vpop.permute.xlu0 %975  ;;  %vm8912_vm8 = vcmp.eq.s32.totalorder %v6206_v46, %v6492_v34 }
  0xdd   : > { %vm8915_vm14 = vcmp.eq.s32.totalorder %v6206_v46, %v6494_v35 }
  0xde   : > { %vm5094_vm1 = vmpackc.low %vm8912_vm8, %vm8915_vm14  ;;  %v1536_v29 = vsel %vm8915_vm14, %v6211_v47, 0.0 }
  0xdf   : > { %1552 = vadd.xlane.f32.xlu1 %v1530_v36  ;;  %5500 = vmatprep.mubr.msk.bf16.mxu0 %vm5094_vm1, %v5903_v54  ;;  %v6515_v38 = vpop.permute.xlu1 %1058 }
  0xe0   : > { %1700 = vadd.xlane.f32.xlu0 %v1679_v37  ;;  %v6517_v39 = vpop.permute.xlu0 %1055  ;;  %vm8910_vm13 = vcmp.eq.s32.totalorder %v6206_v46, %v6515_v38  ;;  %v1638_v37 = vsel %vm8915_vm14, %v6259_v56, 0.0  ;;  %vm8952_vm14 = vcmp.eq.s32.totalorder %v6206_v46, %v6215_v49  ;;  %v5622_v49 = vld [vmem:[%s8945_s2 + $0x8] sm:$0xff]  }
  0xe1   : > { %vm1078_vm5 = vcmp.eq.s32.totalorder %v6206_v46, %v6517_v39 }
  0xe2   : > { %vm5110_vm0 = vmpackc.low %vm8910_vm13, %vm1078_vm5  ;;  %v1584_v33 = vsel %vm1078_vm5, %v6211_v47, 0.0 }
  0xe3   : > { %5532 = vmatprep.mubr.msk.bf16.mxu1 %vm5110_vm0, %v5903_v54  ;;  %1600 = vadd.xlane.f32.xlu1 %v1578_v40  ;;  %v6538_v42 = vpop.permute.xlu1 %984 }
  0xe4   : > { %1554 = vadd.xlane.f32.xlu0 %v1531_v41  ;;  %v6540_v43 = vpop.permute.xlu0 %981  ;;  %vm8913_vm1 = vcmp.eq.s32.totalorder %v6206_v46, %v6538_v42  ;;  %v1686_v41 = vsel %vm1078_vm5, %v6259_v56, 0.0 }
  0xe5   : > { %vm8914_vm13 = vcmp.eq.s32.totalorder %v6206_v46, %v6540_v43 }
  0xe6   : > { %vm5096_vm0 = vmpackc.low %vm8913_vm1, %vm8914_vm13 }
  0xe7   : > { %1654 = vadd.xlane.f32.xlu1 %v1632_v44  ;;  %5501 = vmatmul.mubr.msk.bf16.gmra.mrb[12].mxu0 %vm5096_vm0, %v5903_v54  ;;  %v6561_v53 = vpop.permute.xlu1 %1064  ;;  %vm8940_vm0 = vcmp.eq.s32.totalorder %v6206_v46, %v6469_v30 }
  0xe8   : > { %1602 = vadd.xlane.f32.xlu0 %v1579_v50  ;;  %v6563_v55 = vpop.permute.xlu0 %1061  ;;  %vm1081_vm12 = vcmp.eq.s32.totalorder %v6206_v46, %v6561_v53  ;;  %v1583_v24 = vsel %vm8940_vm0, %v6211_v47, 0.0  ;;  %v1685_v32 = vsel %vm8940_vm0, %v6259_v56, 0.0  ;;  %vm8942_vm0 = vcmp.eq.s32.totalorder %v6206_v46, %v6515_v38 }
  0xe9   : > { %vm1080_vm8 = vcmp.eq.s32.totalorder %v6206_v46, %v6563_v55  ;;  %v1585_v40 = vsel %vm8942_vm0, %v6211_v47, 0.0  ;;  %v1538_v50 = vsel %vm8914_vm13, %v6211_v47, 0.0  ;;  %v1689_v18 = vsel %vm1081_vm12, %v6259_v56, 0.0 }
  0xea   : > { %vm5112_vm1 = vmpackc.low %vm1081_vm12, %vm1080_vm8  ;;  %v1688_v22 = vsel %vm1080_vm8, %v6259_v56, 0.0 }
  0xeb   : > { %5533 = vmatmul.mubr.msk.bf16.gmra.mrb[12].mxu1 %vm5112_vm1, %v5903_v54  ;;  %1702 = vadd.xlane.f32.xlu1 %v1680_v59  ;;  %v1681_v54 = vsel %vm1073_vm6, %v6259_v56, 0.0  ;;  %vm8939_vm1 = vcmp.eq.s32.totalorder %v6206_v46, %v6446_v26  ;;  %v1687_v59 = vsel %vm8942_vm0, %v6259_v56, 0.0 }
  0xec   : > { %1656 = vadd.xlane.f32.xlu0 %v1633_v60  ;;  %2444 = vmatprep.mubr.bf16.mxu1 %v8917_v6  ;;  %v1535_v20 = vsel %vm8939_vm1, %v6211_v47, 0.0  ;;  %v1637_v28 = vsel %vm8939_vm1, %v6259_v56, 0.0  ;;  %vm8941_vm1 = vcmp.eq.s32.totalorder %v6206_v46, %v6492_v34  ;;  %v1586_v60 = vsel %vm1080_vm8, %v6211_v47, 0.0 }
  0xed   : > { %v1537_v36 = vsel %vm8941_vm1, %v6211_v47, 0.0  ;;  %v1639_v44 = vsel %vm8941_vm1, %v6259_v56, 0.0  ;;  %vm8943_vm1 = vcmp.eq.s32.totalorder %v6206_v46, %v6538_v42 }
  0xee   : > { %vm8944_vm0 = vmmov %vm8943_vm1 }
  0xef   : > { %1556 = vadd.xlane.f32.xlu1 %v1532_v63  ;;  %v1539_v63 = vsel %vm8943_vm1, %v6211_v47, 0.0  ;;  %vm8946_vm1 = vcmp.eq.s32.totalorder %v6206_v46, %v6287_v62 }
  0xf0   : > { %1704 = vadd.xlane.f32.xlu0 %v1681_v54  ;;  %v1640_v54 = vsel %vm8914_vm13, %v6259_v56, 0.0  ;;  %vm8948_vm13 = vcmp.eq.s32.totalorder %v6206_v46, %v6264_v58 }
  0xf3   : > { %1604 = vadd.xlane.f32.xlu1 %v1580_v0  ;;  %v1587_v0 = vsel %vm1081_vm12, %v6211_v47, 0.0 }
  0xf4   : > { %1558 = vadd.xlane.f32.xlu0 %v1533_v3  ;;  %v1641_v3 = vsel %vm8944_vm0, %v6259_v56, 0.0  ;;  %vm8947_vm0 = vcmp.eq.s32.totalorder %v6206_v46, %v6285_v61 }
  0xf7   : > { %1658 = vadd.xlane.f32.xlu1 %v1634_v4  ;;  %v5621_v4 = vld [vmem:[%s8945_s2] sm:$0xff]  }
  0xf8   : > { %1606 = vadd.xlane.f32.xlu0 %v1581_v8  ;;  %5536 = vmatprep.subr.bf16.mxu0 %v5621_v4 }
  0xf9   : > { %5537 = vmatpush3.bf16.msra.mxu0 %v5621_v4 }
  0xfa   : > { %5538 = vmatprep.subr.bf16.mxu0 %v5622_v49 }
  0xfb   : > { %1706 = vadd.xlane.f32.xlu1 %v1682_v9 }
  0xfc   : > { %1660 = vadd.xlane.f32.xlu0 %v1635_v12 }
  0xfd   : > { %5539 = vmatpush3.bf16.msra.mxu0 %v5622_v49 }
  0xff   : > { %1560 = vadd.xlane.f32.xlu1 %v1534_v13 }
 0x100   : > { %1708 = vadd.xlane.f32.xlu0 %v1683_v16 }
 0x103   : > { %1608 = vadd.xlane.f32.xlu1 %v1582_v17 }
 0x104   : > { %1562 = vadd.xlane.f32.xlu0 %v1535_v20 }
 0x107   : > { %1662 = vadd.xlane.f32.xlu1 %v1636_v21 }
 0x108   : > { %1610 = vadd.xlane.f32.xlu0 %v1583_v24 }
 0x10b   : > { %1710 = vadd.xlane.f32.xlu1 %v1684_v25 }
 0x10c   : > { %1664 = vadd.xlane.f32.xlu0 %v1637_v28 }
 0x10f   : > { %1564 = vadd.xlane.f32.xlu1 %v1536_v29 }
 0x110   : > { %1712 = vadd.xlane.f32.xlu0 %v1685_v32 }
 0x113   : > { %1612 = vadd.xlane.f32.xlu1 %v1584_v33 }
 0x114   : > { %1566 = vadd.xlane.f32.xlu0 %v1537_v36 }
 0x117   : > { %1666 = vadd.xlane.f32.xlu1 %v1638_v37 }
 0x118   : > { %1614 = vadd.xlane.f32.xlu0 %v1585_v40 }
 0x11b   : > { %1714 = vadd.xlane.f32.xlu1 %v1686_v41 }
 0x11c   : > { %1668 = vadd.xlane.f32.xlu0 %v1639_v44 }
 0x11f   : > { %1568 = vadd.xlane.f32.xlu1 %v1538_v50 }
 0x120   : > { %1716 = vadd.xlane.f32.xlu0 %v1687_v59 }
 0x123   : > { %1616 = vadd.xlane.f32.xlu1 %v1586_v60 }
 0x124   : > { %1570 = vadd.xlane.f32.xlu0 %v1539_v63 }
 0x127   : > { %1670 = vadd.xlane.f32.xlu1 %v1640_v54 }
 0x128   : > { %1618 = vadd.xlane.f32.xlu0 %v1587_v0 }
 0x12c   : > { %1672 = vadd.xlane.f32.xlu0 %v1641_v3 }
 0x13c   : > { %v6712_v8 = vpop.xlane.xlu0 %1540 }
 0x140   : > { %v6714_v9 = vpop.xlane.xlu0 %1588  ;;  %v6716_v12 = vpop.xlane.xlu1 %1542 }
 0x144   : > { %v6720_v13 = vpop.xlane.xlu1 %1642 }
 0x145   : > { %v6718_v47 = vpop.xlane.xlu0 %1590  ;;  %v1770_v6 = vmul.f32 %v6720_v13, %v6714_v9 }
 0x148   : > { %v6724_v17 = vpop.xlane.xlu1 %1690 }
 0x149   : > { %v6722_v16 = vpop.xlane.xlu0 %1644 }
 0x14c   : > { %v6728_v21 = vpop.xlane.xlu1 %1544 }
 0x14d   : > { %v6726_v20 = vpop.xlane.xlu0 %1692 }
 0x14e   : > { %v1723_v9 = vmul.f32 %v6726_v20, %v6716_v12 }
 0x150   : > { %v6732_v25 = vpop.xlane.xlu1 %1592 }
 0x151   : > { %v6730_v24 = vpop.xlane.xlu0 %1546 }
 0x154   : > { %v6736_v29 = vpop.xlane.xlu1 %1646 }
 0x155   : > { %v6734_v28 = vpop.xlane.xlu0 %1594 }
 0x158   : > { %v6740_v36 = vpop.xlane.xlu1 %1694 }
 0x159   : > { %v6738_v32 = vpop.xlane.xlu0 %1648 }
 0x15c   : > { %v6753_v62 = vpop.xlane.xlu1 %1548 }
 0x15d   : > { %v6745_v44 = vpop.xlane.xlu0 %1696 }
 0x15e   : > { %v1725_v45 = vmul.f32 %v6745_v44, %v6730_v24 }
 0x18a   : > { %v5490_v33 = vpop.f32.mrb[0].mxu0 }
 0x18b   : > { %v1260_v37 = vpop.f32.mrb[1].mxu0  ;;  %v1422_v40 = vsel %vm8946_vm1, %v5490_v33, 0.0  ;;  %vm8949_vm1 = vcmp.eq.s32.totalorder %v6206_v46, %v6262_v57  ;;  %v6758_v33 = vpop.xlane.xlu0 %1550 }
 0x18c   : > { %1440 = vadd.xlane.f32.xlu1 %v1422_v40  ;;  %v5491_v41 = vpop.f32.mrb[2].mxu0  ;;  %v6766_v40 = vpop.xlane.xlu1 %1596 }
 0x18d   : > { %v1263_v50 = vpop.f32.mrb[3].mxu0  ;;  %v1423_v59 = vsel %vm8947_vm0, %v5491_v41, 0.0  ;;  %vm8950_vm0 = vcmp.eq.s32.totalorder %v6206_v46, %v6213_v48 }
 0x18e   : > { %v5522_v60 = vpop.f32.mrb[0].mxu1  ;;  %1442 = vadd.xlane.f32.xlu0 %v1423_v59  ;;  %v1420_v61 = vsel %vm8950_vm0, %v1260_v37, 0.0  ;;  %vm8957_vm0 = vcmp.eq.s32.totalorder %v6206_v46, %v6310_v2 }
 0x18f   : > { %v1357_v63 = vpop.f32.mrb[1].mxu1  ;;  %v1470_v54 = vsel %vm8948_vm13, %v5522_v60, 0.0  ;;  %vm8951_vm13 = vcmp.eq.s32.totalorder %v6206_v46, %v6225_v51  ;;  %v6771_v41 = vpop.xlane.xlu0 %1598 }
 0x190   : > { %v5523_v0 = vpop.f32.mrb[2].mxu1  ;;  %1488 = vadd.xlane.f32.xlu1 %v1470_v54  ;;  %v1421_v58 = vsel %vm8951_vm13, %v1263_v50, 0.0  ;;  %v1468_v57 = vsel %vm8952_vm14, %v1357_v63, 0.0  ;;  %v6782_v60 = vpop.xlane.xlu1 %1650  ;;  %vm8955_vm14 = vcmp.eq.s32.totalorder %v6206_v46, %v6333_v7  ;;  %vm8959_vm13 = vcmp.eq.s32.totalorder %v6206_v46, %v6469_v30 }
 0x191   : > { %v1471_v3 = vsel %vm8949_vm1, %v5523_v0, 0.0  ;;  %v1360_v4 = vpop.f32.mrb[3].mxu1  ;;  %vm8953_vm1 = vcmp.eq.s32.totalorder %v6206_v46, %v6227_v52 }
 0x192   : > { %1490 = vadd.xlane.f32.xlu0 %v1471_v3  ;;  %v1469_v48 = vsel %vm8953_vm1, %v1360_v4, 0.0 }
 0x193   : > { %v6787_v0 = vpop.xlane.xlu0 %1652 }
 0x194   : > { %1436 = vadd.xlane.f32.xlu1 %v1420_v61 }
 0x196   : > { %1438 = vadd.xlane.f32.xlu0 %v1421_v58  ;;  %v6795_v58 = vpop.xlane.xlu1 %1698 }
 0x198   : > { %1484 = vadd.xlane.f32.xlu1 %v1468_v57 }
 0x19a   : > { %1486 = vadd.xlane.f32.xlu0 %v1469_v48  ;;  %v5494_v37 = vpop.f32.mrb[4].mxu0  ;;  %v6800_v48 = vpop.xlane.xlu0 %1700 }
 0x19b   : > { %v1426_v51 = vsel %vm1072_vm4, %v5494_v37, 0.0  ;;  %v1276_v50 = vpop.f32.mrb[5].mxu0  ;;  %vm8954_vm4 = vcmp.eq.s32.totalorder %v6206_v46, %v6356_v11  ;;  %v5623_v37 = vld [vmem:[%s8945_s2 + $0x10] sm:$0xff]  }
 0x19c   : > { %1448 = vadd.xlane.f32.xlu1 %v1426_v51  ;;  %v5495_v59 = vpop.f32.mrb[6].mxu0  ;;  %v1424_v57 = vsel %vm8955_vm14, %v1276_v50, 0.0  ;;  %v6811_v51 = vpop.xlane.xlu1 %1552  ;;  %5540 = vmatprep.subr.bf16.mxu0 %v5623_v37 }
 0x19d   : > { %v1427_v52 = vsel %vm1073_vm6, %v5495_v59, 0.0  ;;  %v1279_v63 = vpop.f32.mrb[7].mxu0  ;;  %vm8956_vm6 = vcmp.eq.s32.totalorder %v6206_v46, %v6331_v5  ;;  %5541 = vmatpush3.bf16.msra.mxu0 %v5623_v37 }
 0x19e   : > { %v5526_v54 = vpop.f32.mrb[4].mxu1  ;;  %1450 = vadd.xlane.f32.xlu0 %v1427_v52  ;;  %v1425_v11 = vsel %vm8956_vm6, %v1279_v63, 0.0  ;;  %v6816_v5 = vpop.xlane.xlu0 %1554 }
 0x19f   : > { %v1474_v15 = vsel %vm8954_vm4, %v5526_v54, 0.0  ;;  %v1373_v3 = vpop.f32.mrb[5].mxu1  ;;  %v5624_v54 = vld [vmem:[%s8945_s2 + $0x18] sm:$0xff]  }
 0x1a0   : > { %v5527_v4 = vpop.f32.mrb[6].mxu1  ;;  %1496 = vadd.xlane.f32.xlu1 %v1474_v15  ;;  %v1472_v10 = vsel %vm8957_vm0, %v1373_v3, 0.0  ;;  %v6827_v15 = vpop.xlane.xlu1 %1600  ;;  %5542 = vmatprep.subr.bf16.mxu0 %v5624_v54 }
 0x1a1   : > { %v1475_v61 = vsel %vm993_vm9, %v5527_v4, 0.0  ;;  %v1376_v14 = vpop.f32.mrb[7].mxu1  ;;  %vm8958_vm9 = vcmp.eq.s32.totalorder %v6206_v46, %v6308_v1  ;;  %5543 = vmatpush3.bf16.msra.mxu0 %v5624_v54 }
 0x1a2   : > { %1498 = vadd.xlane.f32.xlu0 %v1475_v61  ;;  %v1473_v7 = vsel %vm8958_vm9, %v1376_v14, 0.0  ;;  %v6832_v61 = vpop.xlane.xlu0 %1602 }
 0x1a4   : > { %1444 = vadd.xlane.f32.xlu1 %v1424_v57  ;;  %v6840_v27 = vpop.xlane.xlu1 %1654 }
 0x1a5   : > { %v1776_v12 = vmul.f32 %v6840_v27, %v6827_v15 }
 0x1a6   : > { %1446 = vadd.xlane.f32.xlu0 %v1425_v11 }
 0x1a8   : > { %1492 = vadd.xlane.f32.xlu1 %v1472_v10  ;;  %v6845_v10 = vpop.xlane.xlu0 %1656 }
 0x1aa   : > { %1494 = vadd.xlane.f32.xlu0 %v1473_v7  ;;  %v5498_v50 = vpop.f32.mrb[8].mxu0  ;;  %v6853_v7 = vpop.xlane.xlu1 %1702 }
 0x1ab   : > { %v1430_v2 = vsel %vm1076_vm11, %v5498_v50, 0.0  ;;  %v1292_v59 = vpop.f32.mrb[9].mxu0  ;;  %vm8960_vm11 = vcmp.eq.s32.totalorder %v6206_v46, %v6446_v26 }
 0x1ac   : > { %1456 = vadd.xlane.f32.xlu1 %v1430_v2  ;;  %v5499_v49 = vpop.f32.mrb[10].mxu0  ;;  %v1428_v57 = vsel %vm1074_vm7, %v1292_v59, 0.0  ;;  %v6859_v59 = vpop.xlane.xlu0 %1704  ;;  %vm8963_vm7 = vcmp.eq.s32.totalorder %v6206_v46, %v6492_v34 }
 0x1ad   : > { %v1431_v52 = vsel %vm8959_vm13, %v5499_v49, 0.0  ;;  %v1295_v63 = vpop.f32.mrb[11].mxu0 }
 0x1ae   : > { %v5530_v1 = vpop.f32.mrb[8].mxu1  ;;  %1458 = vadd.xlane.f32.xlu0 %v1431_v52  ;;  %v1429_v11 = vsel %vm1075_vm2, %v1295_v63, 0.0  ;;  %v6868_v54 = vpop.xlane.xlu1 %1556  ;;  %vm8961_vm2 = vcmp.eq.s32.totalorder %v6206_v46, %v6515_v38 }
 0x1af   : > { %v1478_v31 = vsel %vm996_vm10, %v5530_v1, 0.0  ;;  %v1389_v3 = vpop.f32.mrb[9].mxu1  ;;  %vm8964_vm10 = vcmp.eq.s32.totalorder %v6206_v46, %v6540_v43 }
 0x1b0   : > { %v5531_v4 = vpop.f32.mrb[10].mxu1  ;;  %1504 = vadd.xlane.f32.xlu1 %v1478_v31  ;;  %v1476_v26 = vsel %vm994_vm3, %v1389_v3, 0.0  ;;  %vm8962_vm3 = vcmp.eq.s32.totalorder %v6206_v46, %v6494_v35 }
 0x1b1   : > { %v1479_v30 = vsel %vm8960_vm11, %v5531_v4, 0.0  ;;  %v1392_v14 = vpop.f32.mrb[11].mxu1  ;;  %v6873_v4 = vpop.xlane.xlu0 %1558 }
 0x1b2   : > { %1506 = vadd.xlane.f32.xlu0 %v1479_v30  ;;  %v1477_v23 = vsel %vm995_vm15, %v1392_v14, 0.0  ;;  %v6881_v30 = vpop.xlane.xlu1 %1604  ;;  %vm4537_vm15 = vcmask 261120  }
 0x1b4   : > { %1452 = vadd.xlane.f32.xlu1 %v1428_v57 }
 0x1b5   : > { %v6886_v14 = vpop.xlane.xlu0 %1606 }
 0x1b6   : > { %1454 = vadd.xlane.f32.xlu0 %v1429_v11  ;;  %v6894_v57 = vpop.xlane.xlu1 %1658 }
 0x1b8   : > { %1500 = vadd.xlane.f32.xlu1 %v1476_v26 }
 0x1b9   : > { %v6899_v11 = vpop.xlane.xlu0 %1660 }
 0x1ba   : > { %1502 = vadd.xlane.f32.xlu0 %v1477_v23  ;;  %v5502_v37 = vpop.f32.mrb[12].mxu0  ;;  %v6901_v26 = vpop.xlane.xlu1 %1706 }
 0x1bb   : > { %v1308_v50 = vpop.f32.mrb[13].mxu0  ;;  %v1434_v52 = vsel %vm1080_vm8, %v5502_v37, 0.0  ;;  %vm4659_vm8 = vcmask 7168  }
 0x1bc   : > { %1718 = vadd.xlane.f32.xlu1 %v1688_v22  ;;  %v5503_v2 = vpop.f32.mrb[14].mxu0  ;;  %v1432_v56 = vsel %vm1078_vm5, %v1308_v50, 0.0  ;;  %vm8965_vm5 = vcmp.eq.s32.totalorder %v6206_v46, %v6538_v42 }
 0x1bd   : > { %v1311_v19 = vpop.f32.mrb[15].mxu0  ;;  %v1435_v31 = vsel %vm1081_vm12, %v5503_v2, 0.0  ;;  %v6903_v23 = vpop.xlane.xlu0 %1708  ;;  %vm1927_vm12 = vcmask 523264  }
 0x1be   : > { %v5534_v49 = vpop.f32.mrb[12].mxu1  ;;  %1720 = vadd.xlane.f32.xlu0 %v1689_v18  ;;  %v1433_v55 = vsel %vm8961_vm2, %v1311_v19, 0.0  ;;  %v6905_v34 = vpop.xlane.xlu1 %1560 }
 0x1bf   : > { %v1405_v63 = vpop.f32.mrb[13].mxu1  ;;  %v1482_v38 = vsel %vm8964_vm10, %v5534_v49, 0.0 }
 0x1c0   : > { %v5535_v1 = vpop.f32.mrb[14].mxu1  ;;  %1464 = vadd.xlane.f32.xlu1 %v1434_v52  ;;  %v1480_v53 = vsel %vm8962_vm3, %v1405_v63, 0.0 }
 0x1c1   : > { %v1408_v3 = vpop.f32.mrb[15].mxu1  ;;  %v1483_v35 = vsel %vm8965_vm5, %v5535_v1, 0.0  ;;  %v6907_v37 = vpop.xlane.xlu0 %1562 }
 0x1c2   : > { %1466 = vadd.xlane.f32.xlu0 %v1435_v31  ;;  %v1481_v39 = vsel %vm8963_vm7, %v1408_v3, 0.0  ;;  %v6909_v43 = vpop.xlane.xlu1 %1608 }
 0x1c4   : > { %1460 = vadd.xlane.f32.xlu1 %v1432_v56 }
 0x1c5   : > { %v6911_v50 = vpop.xlane.xlu0 %1610 }
 0x1c6   : > { %1462 = vadd.xlane.f32.xlu0 %v1433_v55  ;;  %v6913_v22 = vpop.xlane.xlu1 %1662 }
 0x1c8   : > { %1508 = vadd.xlane.f32.xlu1 %v1480_v53 }
 0x1c9   : > { %v6915_v2 = vpop.xlane.xlu0 %1664 }
 0x1ca   : > { %1510 = vadd.xlane.f32.xlu0 %v1481_v39  ;;  %v6917_v46 = vpop.xlane.xlu1 %1710 }
 0x1cc   : > { %1512 = vadd.xlane.f32.xlu1 %v1482_v38  ;;  %v1773_v38 = vmul.f32 %v6738_v32, %v6734_v28 }
 0x1cd   : > { %v6919_v42 = vpop.xlane.xlu0 %1712 }
 0x1ce   : > { %1514 = vadd.xlane.f32.xlu0 %v1483_v35  ;;  %v6921_v19 = vpop.xlane.xlu1 %1564  ;;  %v1772_v35 = vmul.f32 %v6736_v29, %v6732_v25  ;;  %5685 = vrcp.f32 %v1773_v38  ;;  %v1771_v25 = vmul.f32 %v6722_v16, %v6718_v47 }
 0x1d0   : > { %5687 = vrcp.f32 %v1772_v35  ;;  %v1774_v35 = vmul.f32 %v6782_v60, %v6766_v40  ;;  %v6982_v60 = vld [vmem:[%s8969_s1] ss:$0 sm:$0xff]  ;;  %s8978_s1 = sld [smem:[#allocation19_spill]] }
 0x1d1   : > { %v6923_v18 = vpop.xlane.xlu0 %1566  ;;  %5689 = vrcp.f32 %v1725_v45  ;;  %v1777_v45 = vmul.f32 %v6845_v10, %v6832_v61  ;;  %v1728_v61 = vmul.f32 %v6853_v7, %v6811_v51 }
 0x1d2   : > { %v6925_v49 = vpop.xlane.xlu1 %1612  ;;  %5691 = vrcp.f32 %v1770_v6 }
 0x1d5   : > { %v6927_v52 = vpop.xlane.xlu0 %1614 }
 0x1d6   : > { %v6929_v63 = vpop.xlane.xlu1 %1666 }
 0x1d9   : > { %v6931_v1 = vpop.xlane.xlu0 %1668 }
 0x1da   : > { %v6933_v31 = vpop.xlane.xlu1 %1714 }
 0x1dd   : > { %v6935_v3 = vpop.xlane.xlu0 %1716 }
 0x1de   : > { %8966 = vst [vmem:[#allocation6_spill] sm:$0xff] %v6935_v3  ;;  %v6937_v56 = vpop.xlane.xlu1 %1568 }
 0x1e1   : > { %v6939_v55 = vpop.xlane.xlu0 %1570 }
 0x1e2   : > { %8967 = vst [vmem:[#allocation7_spill] sm:$0xff] %v6939_v55  ;;  %v6941_v53 = vpop.xlane.xlu1 %1616  ;;  %v1724_v55 = vmul.f32 %v6740_v36, %v6728_v21 }
 0x1e4   : > { %5693 = vrcp.f32 %v1724_v55 }
 0x1e5   : > { %v6943_v39 = vpop.xlane.xlu0 %1618 }
 0x1e6   : > { %8968 = vst [vmem:[#allocation8_spill] sm:$0xff] %v6943_v39  ;;  %v6953_v3 = vpop.xlane.xlu1 %1670  ;;  %v1722_v39 = vmul.f32 %v6724_v17, %v6712_v8  ;;  %v5686_v8 = vpop.eup %5685 }
 0x1e7   : > { %v5688_v17 = vpop.eup %5687 }
 0x1e8   : > { %5695 = vrcp.f32 %v1722_v39  ;;  %v5690_v44 = vpop.eup %5689  ;;  %v1729_v39 = vmul.f32 %v6859_v59, %v6816_v5  ;;  %v1775_v5 = vmul.f32 %v6787_v0, %v6771_v41 }
 0x1e9   : > { %v6959_v28 = vpop.xlane.xlu0 %1672  ;;  %5697 = vrcp.f32 %v1771_v25  ;;  %v5692_v6 = vpop.eup %5691 }
 0x1ea   : > { %5699 = vrcp.f32 %v1723_v9 }
 0x1eb   : > { %5701 = vrcp.f32 %v1777_v45 }
 0x1ec   : > { %5703 = vrcp.f32 %v1776_v12 }
 0x1ed   : > { %5705 = vrcp.f32 %v1729_v39 }
 0x1ee   : > { %v5694_v55 = vpop.eup %5693  ;;  %5707 = vrcp.f32 %v1774_v35 }
 0x1ef   : > { %5709 = vrcp.f32 %v1728_v61 }
 0x1f2   : > { %v5696_v38 = vpop.eup %5695 }
 0x219   : > { %v1441_v13 = vpop.xlane.xlu1 %1440 }
 0x21a   : > { %v1743_v25 = vmul.f32 %v5694_v55, %v1441_v13 }
 0x21b   : > { %v1443_v24 = vpop.xlane.xlu0 %1442 }
 0x21c   : > { %v1745_v47 = vmul.f32 %v5690_v44, %v1443_v24  ;;  %v1726_v24 = vmul.f32 %v6795_v58, %v6753_v62 }
 0x21d   : > { %v1489_v21 = vpop.xlane.xlu1 %1488 }
 0x21e   : > { %v1791_v16 = vmul.f32 %v5688_v17, %v1489_v21  ;;  %v1727_v21 = vmul.f32 %v6800_v48, %v6758_v33  ;;  %5711 = vrcp.f32 %v1726_v24  ;;  %v1733_v24 = vmul.f32 %v6919_v42, %v6907_v37 }
 0x21f   : > { %v1491_v29 = vpop.xlane.xlu0 %1490  ;;  %5713 = vrcp.f32 %v1775_v5  ;;  %v1779_v37 = vmul.f32 %v6899_v11, %v6886_v14 }
 0x220   : > { %v1793_v32 = vmul.f32 %v5686_v8, %v1491_v29  ;;  %v5698_v8 = vpop.eup %5697  ;;  %v1820_v59 = vadd.f32 %v1791_v16, %v1743_v25  ;;  %5715 = vrcp.f32 %v1727_v21  ;;  %v1730_v21 = vmul.f32 %v6901_v26, %v6868_v54 }
 0x221   : > { %v1437_v36 = vpop.xlane.xlu1 %1436  ;;  %v5700_v10 = vpop.eup %5699 }
 0x222   : > { %v1821_v9 = vadd.f32 %v1793_v32, %v1745_v47  ;;  %v1739_v15 = vmul.f32 %v5696_v38, %v1437_v36  ;;  %v1843_v17 = vmul.f32 %v6982_v60, %v1820_v59  ;;  %v6992_v36 = vld [vmem:[%s8970_s11] ss:$0 sm:$0xff]  ;;  %v5702_v16 = vpop.eup %5701  ;;  %v1778_v59 = vmul.f32 %v6894_v57, %v6881_v30 }
 0x223   : > { %v1439_v20 = vpop.xlane.xlu0 %1438  ;;  %v5704_v55 = vpop.eup %5703 }
 0x224   : > { %v1741_v51 = vmul.f32 %v5700_v10, %v1439_v20  ;;  %v1844_v62 = vmul.f32 %v6982_v60, %v1821_v9  ;;  %v7005_v12 = vadd.f32 %v6992_v36, %v1843_v17  ;;  %v5706_v25 = vpop.eup %5705  ;;  %v1781_v9 = vmul.f32 %v6915_v2, %v6911_v50 }
 0x225   : > { %v1485_v29 = vpop.xlane.xlu1 %1484 }
 0x226   : > { %v1787_v27 = vmul.f32 %v5692_v6, %v1485_v29  ;;  %v6996_v33 = vadd.f32 %v6992_v36, %v1844_v62  ;;  %v5708_v29 = vpop.eup %5707  ;;  %5717 = vrcp.f32 %v1781_v9  ;;  %v1782_v9 = vmul.f32 %v6929_v63, %v6925_v49 }
 0x227   : > { %v1487_v40 = vpop.xlane.xlu0 %1486  ;;  %v5710_v10 = vpop.eup %5709  ;;  %v1783_v49 = vmul.f32 %v6931_v1, %v6927_v52 }
 0x228   : > { %v1818_v7 = vadd.f32 %v1787_v27, %v1739_v15  ;;  %v1789_v13 = vmul.f32 %v5698_v8, %v1487_v40  ;;  %v1881_v39 = vpack.c.bf16 %v6996_v33, %v7005_v12  ;;  %v1780_v8 = vmul.f32 %v6913_v22, %v6909_v43  ;;  %v5712_v5 = vpop.eup %5711 }
 0x229   : > { %v1449_v58 = vpop.xlane.xlu1 %1448  ;;  %v1732_v43 = vmul.f32 %v6917_v46, %v6905_v34  ;;  %v1731_v34 = vmul.f32 %v6903_v23, %v6873_v4 }
 0x22a   : > { %v1841_v41 = vmul.f32 %v6982_v60, %v1818_v7  ;;  %v1819_v0 = vadd.f32 %v1789_v13, %v1741_v51  ;;  %v1751_v50 = vmul.f32 %v5710_v10, %v1449_v58  ;;  %v5714_v51 = vpop.eup %5713  ;;  %5719 = vrcp.f32 %v1780_v8 }
 0x22b   : > { %v1451_v32 = vpop.xlane.xlu0 %1450  ;;  %v5716_v13 = vpop.eup %5715  ;;  %5721 = vrcp.f32 %v1733_v24  ;;  %v1734_v10 = vmul.f32 %v6933_v31, %v6921_v19 }
 0x22c   : > { %v1842_v44 = vmul.f32 %v6982_v60, %v1819_v0  ;;  %v6999_v45 = vadd.f32 %v6992_v36, %v1841_v41  ;;  %v1753_v61 = vmul.f32 %v5706_v25, %v1451_v32  ;;  %5723 = vrcp.f32 %v1778_v59 }
 0x22d   : > { %v1497_v48 = vpop.xlane.xlu1 %1496  ;;  %5725 = vrcp.f32 %v1732_v43 }
 0x22e   : > { %v7002_v6 = vadd.f32 %v6992_v36, %v1842_v44  ;;  %v1799_v15 = vmul.f32 %v5704_v55, %v1497_v48  ;;  %5727 = vrcp.f32 %v1730_v21 }
 0x22f   : > { %v1499_v47 = vpop.xlane.xlu0 %1498  ;;  %5729 = vrcp.f32 %v1779_v37 }
 0x230   : > { %v1880_v20 = vpack.c.bf16 %v7002_v6, %v6999_v45  ;;  %v1801_v38 = vmul.f32 %v5702_v16, %v1499_v47  ;;  %v1824_v42 = vadd.f32 %v1799_v15, %v1751_v50  ;;  %5731 = vrcp.f32 %v1731_v34  ;;  %v5718_v47 = vpop.eup %5717 }
 0x231   : > { %v1445_v35 = vpop.xlane.xlu1 %1444  ;;  %5733 = vrcp.f32 %v1782_v9 }
 0x232   : > { %5544 = vmatprep.mubr.msk.bf16.mxu0 %vm1927_vm12, %v1880_v20  ;;  %v1825_v2 = vadd.f32 %v1801_v38, %v1753_v61  ;;  %v1747_v22 = vmul.f32 %v5712_v5, %v1445_v35  ;;  %v1847_v14 = vmul.f32 %v6982_v60, %v1824_v42  ;;  %5735 = vrcp.f32 %v1734_v10 }
 0x233   : > { %5545 = vmatmul.mubr.msk.bf16.vlgmr.msra.gmra.mrb[16].mxu0 %vm1927_vm12, %v1881_v39  ;;  %v1447_v27 = vpop.xlane.xlu0 %1446  ;;  %v1784_v42 = vmul.f32 %v6953_v3, %v6941_v53  ;;  %5737 = vrcp.f32 %v1783_v49 }
 0x234   : > { %v1749_v57 = vmul.f32 %v5716_v13, %v1447_v27  ;;  %v1848_v46 = vmul.f32 %v6982_v60, %v1825_v2  ;;  %v7043_v44 = vadd.f32 %v6992_v36, %v1847_v14  ;;  %v5720_v20 = vpop.eup %5719 }
 0x235   : > { %v1493_v40 = vpop.xlane.xlu1 %1492  ;;  %v5722_v35 = vpop.eup %5721 }
 0x236   : > { %v1795_v7 = vmul.f32 %v5708_v29, %v1493_v40  ;;  %v7034_v17 = vadd.f32 %v6992_v36, %v1848_v46  ;;  %v5724_v25 = vpop.eup %5723  ;;  %v8973_v46 = vld [vmem:[#allocation8_spill] sm:$0xff] }
 0x237   : > { %v1495_v30 = vpop.xlane.xlu0 %1494  ;;  %v5726_v15 = vpop.eup %5725 }
 0x238   : > { %v1822_v62 = vadd.f32 %v1795_v7, %v1747_v22  ;;  %v1797_v58 = vmul.f32 %v5714_v51, %v1495_v30  ;;  %v1883_v38 = vpack.c.bf16 %v7034_v17, %v7043_v44  ;;  %v5728_v27 = vpop.eup %5727  ;;  %v8971_v22 = vld [vmem:[#allocation6_spill] sm:$0xff] }
 0x239   : > { %v1457_v41 = vpop.xlane.xlu1 %1456  ;;  %v5730_v50 = vpop.eup %5729  ;;  %v1735_v7 = vmul.f32 %v8971_v22, %v6923_v18 }
 0x23a   : > { %v1845_v54 = vmul.f32 %v6982_v60, %v1822_v62  ;;  %v1823_v26 = vadd.f32 %v1797_v58, %v1749_v57  ;;  %v1759_v24 = vmul.f32 %v5726_v15, %v1457_v41  ;;  %v5732_v51 = vpop.eup %5731  ;;  %v8972_v58 = vld [vmem:[#allocation7_spill] sm:$0xff]  ;;  %v1785_v41 = vmul.f32 %v6959_v28, %v8973_v46 }
 0x23b   : > { %v1459_v11 = vpop.xlane.xlu0 %1458  ;;  %5739 = vrcp.f32 %v1735_v7 }
 0x23c   : > { %v1846_v0 = vmul.f32 %v6982_v60, %v1823_v26  ;;  %v7037_v4 = vadd.f32 %v6992_v36, %v1845_v54  ;;  %v1761_v29 = vmul.f32 %v5722_v35, %v1459_v11  ;;  %v5734_v11 = vpop.eup %5733 }
 0x23d   : > { %v1505_v32 = vpop.xlane.xlu1 %1504 }
 0x23e   : > { %v7040_v23 = vadd.f32 %v6992_v36, %v1846_v0  ;;  %v1807_v8 = vmul.f32 %v5720_v20, %v1505_v32 }
 0x23f   : > { %v1507_v48 = vpop.xlane.xlu0 %1506 }
 0x240   : > { %v1882_v16 = vpack.c.bf16 %v7040_v23, %v7037_v4  ;;  %v1809_v55 = vmul.f32 %v5718_v47, %v1507_v48  ;;  %v1828_v63 = vadd.f32 %v1807_v8, %v1759_v24  ;;  %v5736_v48 = vpop.eup %5735 }
 0x241   : > { %v1453_v39 = vpop.xlane.xlu1 %1452 }
 0x242   : > { %5548 = vmatprep.mubr.msk.bf16.mxu0 %vm1927_vm12, %v1882_v16  ;;  %v1829_v5 = vadd.f32 %v1809_v55, %v1761_v29  ;;  %v1755_v2 = vmul.f32 %v5728_v27, %v1453_v39  ;;  %v1851_v1 = vmul.f32 %v6982_v60, %v1828_v63  ;;  %v5738_v16 = vpop.eup %5737 }
 0x243   : > { %5549 = vmatmul.mubr.msk.bf16.gmra.mrb[20].mxu0 %vm1927_vm12, %v1883_v38  ;;  %v1455_v61 = vpop.xlane.xlu0 %1454 }
 0x244   : > { %v1757_v13 = vmul.f32 %v5732_v51, %v1455_v61  ;;  %v1852_v19 = vmul.f32 %v6982_v60, %v1829_v5  ;;  %v7079_v26 = vadd.f32 %v6992_v36, %v1851_v1 }
 0x245   : > { %v1501_v59 = vpop.xlane.xlu1 %1500  ;;  %v5740_v55 = vpop.eup %5739 }
 0x246   : > { %v1803_v40 = vmul.f32 %v5724_v25, %v1501_v59  ;;  %v7070_v54 = vadd.f32 %v6992_v36, %v1852_v19 }
 0x247   : > { %v1503_v43 = vpop.xlane.xlu0 %1502 }
 0x248   : > { %v1826_v21 = vadd.f32 %v1803_v40, %v1755_v2  ;;  %v1805_v37 = vmul.f32 %v5730_v50, %v1503_v43  ;;  %v1885_v32 = vpack.c.bf16 %v7070_v54, %v7079_v26 }
 0x249   : > { %v1719_v31 = vpop.xlane.xlu1 %1718 }
 0x24a   : > { %v1849_v30 = vmul.f32 %v6982_v60, %v1826_v21  ;;  %v1827_v57 = vadd.f32 %v1805_v37, %v1757_v13  ;;  %v1736_v52 = vmul.f32 %v1719_v31, %v6937_v56 }
 0x24b   : > { %v1721_v62 = vpop.xlane.xlu0 %1720 }
 0x24c   : > { %v1850_v18 = vmul.f32 %v6982_v60, %v1827_v57  ;;  %v1737_v34 = vmul.f32 %v1721_v62, %v8972_v58  ;;  %5741 = vrcp.f32 %v1736_v52  ;;  %v7073_v56 = vadd.f32 %v6992_v36, %v1849_v30 }
 0x24d   : > { %v1465_v3 = vpop.xlane.xlu1 %1464  ;;  %5743 = vrcp.f32 %v1784_v42 }
 0x24e   : > { %v7076_v53 = vadd.f32 %v6992_v36, %v1850_v18  ;;  %5745 = vrcp.f32 %v1737_v34 }
 0x24f   : > { %v1467_v14 = vpop.xlane.xlu0 %1466  ;;  %5747 = vrcp.f32 %v1785_v41 }
 0x250   : > { %v1884_v28 = vpack.c.bf16 %v7076_v53, %v7073_v56 }
 0x251   : > { %v1461_v0 = vpop.xlane.xlu1 %1460 }
 0x252   : > { %5552 = vmatprep.mubr.msk.bf16.mxu0 %vm1927_vm12, %v1884_v28  ;;  %v1763_v39 = vmul.f32 %v5736_v48, %v1461_v0 }
 0x253   : > { %5553 = vmatmul.mubr.msk.bf16.gmra.mrb[24].mxu0 %vm1927_vm12, %v1885_v32  ;;  %v1463_v47 = vpop.xlane.xlu0 %1462 }
 0x254   : > { %v1765_v29 = vmul.f32 %v5740_v55, %v1463_v47 }
 0x255   : > { %v1509_v20 = vpop.xlane.xlu1 %1508 }
 0x256   : > { %v1811_v38 = vmul.f32 %v5734_v11, %v1509_v20  ;;  %v5742_v35 = vpop.eup %5741 }
 0x257   : > { %v1511_v25 = vpop.xlane.xlu0 %1510  ;;  %v5744_v9 = vpop.eup %5743  ;;  %v1767_v10 = vmul.f32 %v5742_v35, %v1465_v3 }
 0x258   : > { %v1830_v8 = vadd.f32 %v1811_v38, %v1763_v39  ;;  %v1813_v61 = vmul.f32 %v5738_v16, %v1511_v25  ;;  %v5746_v15 = vpop.eup %5745 }
 0x259   : > { %v1513_v27 = vpop.xlane.xlu1 %1512  ;;  %v5748_v50 = vpop.eup %5747  ;;  %v1769_v40 = vmul.f32 %v5746_v15, %v1467_v14 }
 0x25a   : > { %v1853_v24 = vmul.f32 %v6982_v60, %v1830_v8  ;;  %v1831_v5 = vadd.f32 %v1813_v61, %v1765_v29  ;;  %v1815_v59 = vmul.f32 %v5744_v9, %v1513_v27 }
 0x25b   : > { %v1515_v2 = vpop.xlane.xlu0 %1514 }
 0x25c   : > { %v1854_v51 = vmul.f32 %v6982_v60, %v1831_v5  ;;  %v1832_v49 = vadd.f32 %v1815_v59, %v1767_v10  ;;  %v1817_v63 = vmul.f32 %v5748_v50, %v1515_v2  ;;  %v7090_v43 = vadd.f32 %v6992_v36, %v1853_v24 }
 0x25e   : > { %v7093_v22 = vadd.f32 %v6992_v36, %v1854_v51  ;;  %v1855_v7 = vmul.f32 %v6982_v60, %v1832_v49  ;;  %v1833_v13 = vadd.f32 %v1817_v63, %v1769_v40 }
 0x260   : > { %v1856_v21 = vmul.f32 %v6982_v60, %v1833_v13  ;;  %v1886_v37 = vpack.c.bf16 %v7093_v22, %v7090_v43  ;;  %v7100_v19 = vadd.f32 %v6992_v36, %v1855_v7  ;;  %v7112_v60 = vld [vmem:[%s8974_s8] ss:$0 sm:$0xff] }
 0x262   : > { %v7103_v31 = vadd.f32 %v6992_v36, %v1856_v21  ;;  %5556 = vmatprep.mubr.msk.bf16.mxu0 %vm1927_vm12, %v1886_v37 }
 0x264   : > { %v1887_v42 = vpack.c.bf16 %v7103_v31, %v7100_v19 }
 0x266   : > { %5557 = vmatmul.mubr.msk.bf16.gmra.mrb[28].mxu0 %vm1927_vm12, %v1887_v42 }
 0x306   : > { %v5546_v30 = vpop.f32.mrb[16].mxu0 }
 0x307   : > { %v1986_v57 = vpop.f32.mrb[17].mxu0  ;;  %v1995_v52 = vadd.f32 %v5546_v30, %v7112_v60 }
 0x308   : > { %v1987_v1 = vadd.f32 %v7112_v60, %v1986_v57  ;;  %v5547_v36 = vpop.f32.mrb[18].mxu0 }
 0x309   : > { %v1989_v62 = vpop.f32.mrb[19].mxu0  ;;  %v1998_v58 = vadd.f32 %v5547_v36, %v7112_v60  ;;  %v7122_v46 = vadd.f32 %v1995_v52, %v7005_v12 }
 0x30a   : > { %v7117_v18 = vadd.f32 %v1987_v1, %v6999_v45  ;;  %v1990_v34 = vadd.f32 %v7112_v60, %v1989_v62 }
 0x30b   : > { %v7130_v14 = vadd.f32 %v1998_v58, %v6996_v33  ;;  %v2073_v28 = vsel %vm1927_vm12, %v7122_v46, 0.0 }
 0x30c   : > { %v7125_v41 = vadd.f32 %v1990_v34, %v7002_v6  ;;  %v2067_v3 = vsel %vm1927_vm12, %v7117_v18, 0.0 }
 0x30d   : > { %2068 = vadd.xlane.f32.xlu1 %v2067_v3  ;;  %v2076_v12 = vsel %vm1927_vm12, %v7130_v14, 0.0 }
 0x30e   : > { %v2070_v45 = vsel %vm1927_vm12, %v7125_v41, 0.0 }
 0x30f   : > { %2071 = vadd.xlane.f32.xlu0 %v2070_v45 }
 0x311   : > { %2074 = vadd.xlane.f32.xlu1 %v2073_v28 }
 0x313   : > { %2077 = vadd.xlane.f32.xlu0 %v2076_v12 }
 0x316   : > { %v5550_v6 = vpop.f32.mrb[20].mxu0 }
 0x317   : > { %v2002_v11 = vpop.f32.mrb[21].mxu0  ;;  %v2011_v0 = vadd.f32 %v5550_v6, %v7112_v60 }
 0x318   : > { %v2003_v32 = vadd.f32 %v7112_v60, %v2002_v11  ;;  %v5551_v33 = vpop.f32.mrb[22].mxu0 }
 0x319   : > { %v2005_v48 = vpop.f32.mrb[23].mxu0  ;;  %v2014_v16 = vadd.f32 %v5551_v33, %v7112_v60  ;;  %v7146_v55 = vadd.f32 %v2011_v0, %v7043_v44 }
 0x31a   : > { %v7141_v47 = vadd.f32 %v2003_v32, %v7037_v4  ;;  %v2006_v20 = vadd.f32 %v7112_v60, %v2005_v48 }
 0x31b   : > { %v7154_v35 = vadd.f32 %v2014_v16, %v7034_v17  ;;  %v2085_v25 = vsel %vm1927_vm12, %v7146_v55, 0.0 }
 0x31c   : > { %v7149_v39 = vadd.f32 %v2006_v20, %v7040_v23  ;;  %v2079_v38 = vsel %vm1927_vm12, %v7141_v47, 0.0 }
 0x31d   : > { %2080 = vadd.xlane.f32.xlu1 %v2079_v38  ;;  %v2088_v44 = vsel %vm1927_vm12, %v7154_v35, 0.0 }
 0x31e   : > { %v2082_v4 = vsel %vm1927_vm12, %v7149_v39, 0.0 }
 0x31f   : > { %2083 = vadd.xlane.f32.xlu0 %v2082_v4 }
 0x321   : > { %2086 = vadd.xlane.f32.xlu1 %v2085_v25 }
 0x323   : > { %2089 = vadd.xlane.f32.xlu0 %v2088_v44 }
 0x326   : > { %v5554_v23 = vpop.f32.mrb[24].mxu0 }
 0x327   : > { %v2018_v9 = vpop.f32.mrb[25].mxu0  ;;  %v2027_v29 = vadd.f32 %v5554_v23, %v7112_v60 }
 0x328   : > { %v2019_v8 = vadd.f32 %v7112_v60, %v2018_v9  ;;  %v5555_v17 = vpop.f32.mrb[26].mxu0 }
 0x329   : > { %v2021_v61 = vpop.f32.mrb[27].mxu0  ;;  %v2030_v27 = vadd.f32 %v5555_v17, %v7112_v60  ;;  %v7170_v24 = vadd.f32 %v2027_v29, %v7079_v26 }
 0x32a   : > { %v7165_v15 = vadd.f32 %v2019_v8, %v7073_v56  ;;  %v2022_v10 = vadd.f32 %v7112_v60, %v2021_v61 }
 0x32b   : > { %v7178_v50 = vadd.f32 %v2030_v27, %v7070_v54  ;;  %v2097_v2 = vsel %vm1927_vm12, %v7170_v24, 0.0 }
 0x32c   : > { %v7173_v5 = vadd.f32 %v2022_v10, %v7076_v53  ;;  %v2091_v59 = vsel %vm1927_vm12, %v7165_v15, 0.0 }
 0x32d   : > { %2092 = vadd.xlane.f32.xlu1 %v2091_v59  ;;  %v2100_v26 = vsel %vm1927_vm12, %v7178_v50, 0.0 }
 0x32e   : > { %v2094_v56 = vsel %vm1927_vm12, %v7173_v5, 0.0 }
 0x32f   : > { %2095 = vadd.xlane.f32.xlu0 %v2094_v56 }
 0x331   : > { %2098 = vadd.xlane.f32.xlu1 %v2097_v2 }
 0x333   : > { %2101 = vadd.xlane.f32.xlu0 %v2100_v26 }
 0x339   : > { %v5558_v53 = vpop.f32.mrb[28].mxu0 }
 0x33a   : > { %v2034_v40 = vpop.f32.mrb[29].mxu0  ;;  %v2043_v51 = vadd.f32 %v5558_v53, %v7112_v60 }
 0x33b   : > { %v2035_v49 = vadd.f32 %v7112_v60, %v2034_v40  ;;  %v5559_v54 = vpop.f32.mrb[30].mxu0 }
 0x33c   : > { %v2037_v63 = vpop.f32.mrb[31].mxu0  ;;  %v2046_v13 = vadd.f32 %v5559_v54, %v7112_v60  ;;  %v7194_v37 = vadd.f32 %v2043_v51, %v7100_v19  ;;  %v5628_v54 = vld [vmem:[%s8976_s29 + $0x10] ss:$8 sps:$4 sm:$0xff]  }
 0x33d   : > { %v7189_v7 = vadd.f32 %v2035_v49, %v7090_v43  ;;  %v2038_v21 = vadd.f32 %v7112_v60, %v2037_v63 }
 0x33e   : > { %v7202_v57 = vadd.f32 %v2046_v13, %v7103_v31  ;;  %v2109_v60 = vsel %vm1927_vm12, %v7194_v37, 0.0  ;;  %v5627_v31 = vld [vmem:[%s8976_s29 + $0x4] ss:$8 sps:$4 sm:$0xff]  }
 0x33f   : > { %v7197_v42 = vadd.f32 %v2038_v21, %v7093_v22  ;;  %v2103_v30 = vsel %vm1927_vm12, %v7189_v7, 0.0  ;;  %v5625_v22 = vld [vmem:[%s8975_s28] ss:$8 sps:$4 sm:$0xff]   ;;  %2412 = vmatprep.subr.bf16.mxu1 %v5627_v31 }
 0x340   : > { %2104 = vadd.xlane.f32.xlu1 %v2103_v30  ;;  %v2112_v19 = vsel %vm1927_vm12, %v7202_v57, 0.0  ;;  %2413 = vmatpush1.bf16.msra.mxu1 %v5625_v22  ;;  %v5631_v31 = vld [vmem:[%s8976_s29 + $0x20] ss:$8 sps:$4 sm:$0xff]  }
 0x341   : > { %v2106_v43 = vsel %vm1927_vm12, %v7197_v42, 0.0 }
 0x342   : > { %2107 = vadd.xlane.f32.xlu0 %v2106_v43 }
 0x344   : > { %2110 = vadd.xlane.f32.xlu1 %v2109_v60 }
 0x346   : > { %2113 = vadd.xlane.f32.xlu0 %v2112_v19 }
 0x39a   : > { %v2069_v52 = vpop.xlane.xlu1 %2068 }
 0x39b   : > { %v2116_v1 = vmul.f32 0.015625, %v2069_v52 }
 0x39c   : > { %v2072_v36 = vpop.xlane.xlu0 %2071 }
 0x39d   : > { %v7217_v62 = vsub.f32 %v7117_v18, %v2116_v1  ;;  %v2117_v58 = vmul.f32 0.015625, %v2072_v36  ;;  %v5636_v36 = vld [vmem:[%s8976_s29 + $0x34] ss:$8 sps:$4 sm:$0xff]  }
 0x39e   : > { %v2075_v34 = vpop.xlane.xlu1 %2074 }
 0x39f   : > { %v7220_v3 = vsub.f32 %v7125_v41, %v2117_v58  ;;  %v2118_v45 = vmul.f32 0.015625, %v2075_v34  ;;  %v2148_v28 = vmul.f32 %v7217_v62, %v7217_v62 }
 0x3a0   : > { %v2078_v12 = vpop.xlane.xlu0 %2077 }
 0x3a1   : > { %v7225_v6 = vsub.f32 %v7122_v46, %v2118_v45  ;;  %v2119_v11 = vmul.f32 0.015625, %v2078_v12  ;;  %v2164_v0 = vsel %vm1927_vm12, %v2148_v28, 0.0  ;;  %v2149_v18 = vmul.f32 %v7220_v3, %v7220_v3 }
 0x3a2   : > { %2165 = vadd.xlane.f32.xlu1 %v2164_v0 }
 0x3a3   : > { %v7231_v32 = vsub.f32 %v7130_v14, %v2119_v11  ;;  %v2167_v41 = vsel %vm1927_vm12, %v2149_v18, 0.0  ;;  %v2150_v33 = vmul.f32 %v7225_v6, %v7225_v6 }
 0x3a4   : > { %2168 = vadd.xlane.f32.xlu0 %v2167_v41 }
 0x3a5   : > { %v2170_v48 = vsel %vm1927_vm12, %v2150_v33, 0.0  ;;  %v2151_v46 = vmul.f32 %v7231_v32, %v7231_v32 }
 0x3a6   : > { %2171 = vadd.xlane.f32.xlu1 %v2170_v48 }
 0x3a7   : > { %v2173_v16 = vsel %vm1927_vm12, %v2151_v46, 0.0 }
 0x3a8   : > { %2174 = vadd.xlane.f32.xlu0 %v2173_v16 }
 0x3aa   : > { %v2081_v20 = vpop.xlane.xlu1 %2080 }
 0x3ab   : > { %v2120_v38 = vmul.f32 0.015625, %v2081_v20 }
 0x3ac   : > { %v2084_v4 = vpop.xlane.xlu0 %2083 }
 0x3ad   : > { %v7241_v14 = vsub.f32 %v7141_v47, %v2120_v38  ;;  %v2121_v25 = vmul.f32 0.015625, %v2084_v4 }
 0x3ae   : > { %v2087_v44 = vpop.xlane.xlu1 %2086 }
 0x3af   : > { %v7244_v23 = vsub.f32 %v7149_v39, %v2121_v25  ;;  %v2122_v9 = vmul.f32 0.015625, %v2087_v44  ;;  %v2152_v29 = vmul.f32 %v7241_v14, %v7241_v14 }
 0x3b0   : > { %v2090_v8 = vpop.xlane.xlu0 %2089 }
 0x3b1   : > { %v7249_v17 = vsub.f32 %v7146_v55, %v2122_v9  ;;  %v2123_v61 = vmul.f32 0.015625, %v2090_v8  ;;  %v2176_v27 = vsel %vm1927_vm12, %v2152_v29, 0.0  ;;  %v2153_v47 = vmul.f32 %v7244_v23, %v7244_v23  ;;  %v5638_v8 = vld [vmem:[%s8874_s13] sm:$0xff]  }
 0x3b2   : > { %2177 = vadd.xlane.f32.xlu1 %v2176_v27  ;;  %v5640_v27 = vld [vmem:[%s8874_s13 + $0x8] sm:$0xff]  }
 0x3b3   : > { %v7255_v10 = vsub.f32 %v7154_v35, %v2123_v61  ;;  %v2179_v39 = vsel %vm1927_vm12, %v2153_v47, 0.0  ;;  %v2154_v59 = vmul.f32 %v7249_v17, %v7249_v17  ;;  %v5630_v35 = vld [vmem:[%s8976_s29 + $0x14] ss:$8 sps:$4 sm:$0xff]   ;;  %v5639_v61 = vld [vmem:[%s8874_s13 + $0x48] sm:$0xff]  }
 0x3b4   : > { %2180 = vadd.xlane.f32.xlu0 %v2179_v39  ;;  %2414 = vmatprep.subr.bf16.mxu1 %v5630_v35  ;;  %v5641_v47 = vld [vmem:[%s8874_s13 + $0x50] sm:$0xff]  }
 0x3b5   : > { %v2182_v56 = vsel %vm1927_vm12, %v2154_v59, 0.0  ;;  %v2155_v55 = vmul.f32 %v7255_v10, %v7255_v10  ;;  %2415 = vmatpush1.bf16.msra.mxu1 %v5628_v54  ;;  %v5642_v39 = vld [vmem:[%s8874_s13 + $0x10] sm:$0xff]   ;;  %v5643_v59 = vld [vmem:[%s8874_s13 + $0x58] sm:$0xff]  }
 0x3b6   : > { %2183 = vadd.xlane.f32.xlu1 %v2182_v56  ;;  %v5644_v56 = vld [vmem:[%s8874_s13 + $0x18] sm:$0xff]  }
 0x3b7   : > { %v2185_v2 = vsel %vm1927_vm12, %v2155_v55, 0.0  ;;  %v5645_v55 = vld [vmem:[%s8874_s13 + $0x60] sm:$0xff]  }
 0x3b8   : > { %2186 = vadd.xlane.f32.xlu0 %v2185_v2  ;;  %v5646_v2 = vld [vmem:[%s8874_s13 + $0x20] sm:$0xff]  }
 0x3ba   : > { %v2093_v26 = vpop.xlane.xlu1 %2092 }
 0x3bb   : > { %v2124_v53 = vmul.f32 0.015625, %v2093_v26  ;;  %v5647_v26 = vld [vmem:[%s8874_s13 + $0x68] sm:$0xff]  }
 0x3bc   : > { %v2096_v40 = vpop.xlane.xlu0 %2095 }
 0x3bd   : > { %v7268_v51 = vsub.f32 %v7165_v15, %v2124_v53  ;;  %v2125_v49 = vmul.f32 0.015625, %v2096_v40  ;;  %v5633_v15 = vld [vmem:[%s8976_s29 + $0x24] ss:$8 sps:$4 sm:$0xff]  }
 0x3be   : > { %v2099_v63 = vpop.xlane.xlu1 %2098  ;;  %2416 = vmatprep.subr.bf16.mxu1 %v5633_v15 }
 0x3bf   : > { %v7274_v13 = vsub.f32 %v7173_v5, %v2125_v49  ;;  %v2126_v21 = vmul.f32 0.015625, %v2099_v63  ;;  %v2156_v30 = vmul.f32 %v7268_v51, %v7268_v51  ;;  %2417 = vmatpush1.bf16.msra.mxu1 %v5631_v31  ;;  %v7366_v31 = vld [vmem:[%s8977_s5] ss:$0 sm:$0xff] }
 0x3c0   : > { %v2102_v43 = vpop.xlane.xlu0 %2101  ;;  %2418 = vmatprep.subr.bf16.mxu1 %v5636_v36 }
 0x3c1   : > { %v7282_v60 = vsub.f32 %v7170_v24, %v2126_v21  ;;  %v2127_v19 = vmul.f32 0.015625, %v2102_v43  ;;  %v2188_v22 = vsel %vm1927_vm12, %v2156_v30, 0.0  ;;  %v2157_v5 = vmul.f32 %v7274_v13, %v7274_v13 }
 0x3c2   : > { %2189 = vadd.xlane.f32.xlu1 %v2188_v22 }
 0x3c3   : > { %v7291_v52 = vsub.f32 %v7178_v50, %v2127_v19  ;;  %v2191_v1 = vsel %vm1927_vm12, %v2157_v5, 0.0  ;;  %v2158_v24 = vmul.f32 %v7282_v60, %v7282_v60  ;;  %v5634_v50 = vld [vmem:[%s8976_s29 + $0x30] ss:$8 sps:$4 sm:$0xff]  }
 0x3c4   : > { %2192 = vadd.xlane.f32.xlu0 %v2191_v1  ;;  %2419 = vmatpush1.bf16.msra.mxu1 %v5634_v50 }
 0x3c5   : > { %v2194_v58 = vsel %vm1927_vm12, %v2158_v24, 0.0  ;;  %v2159_v34 = vmul.f32 %v7291_v52, %v7291_v52 }
 0x3c6   : > { %2195 = vadd.xlane.f32.xlu1 %v2194_v58 }
 0x3c7   : > { %v2197_v45 = vsel %vm1927_vm12, %v2159_v34, 0.0 }
 0x3c8   : > { %2198 = vadd.xlane.f32.xlu0 %v2197_v45 }
 0x3cd   : > { %v2105_v28 = vpop.xlane.xlu1 %2104 }
 0x3ce   : > { %v2128_v12 = vmul.f32 0.015625, %v2105_v28 }
 0x3cf   : > { %v2108_v11 = vpop.xlane.xlu0 %2107 }
 0x3d0   : > { %v7307_v0 = vsub.f32 %v7189_v7, %v2128_v12  ;;  %v2129_v18 = vmul.f32 0.015625, %v2108_v11  ;;  %v7374_v12 = vld [vmem:[%s8978_s1] ss:$0 sm:$0xff] }
 0x3d1   : > { %v2111_v41 = vpop.xlane.xlu1 %2110 }
 0x3d2   : > { %v7310_v33 = vsub.f32 %v7197_v42, %v2129_v18  ;;  %v2130_v48 = vmul.f32 0.015625, %v2111_v41  ;;  %v2160_v46 = vmul.f32 %v7307_v0, %v7307_v0 }
 0x3d3   : > { %v2114_v16 = vpop.xlane.xlu0 %2113 }
 0x3d4   : > { %v7315_v20 = vsub.f32 %v7194_v37, %v2130_v48  ;;  %v2131_v38 = vmul.f32 0.015625, %v2114_v16  ;;  %v2200_v4 = vsel %vm1927_vm12, %v2160_v46, 0.0  ;;  %v2161_v7 = vmul.f32 %v7310_v33, %v7310_v33 }
 0x3d5   : > { %2201 = vadd.xlane.f32.xlu1 %v2200_v4 }
 0x3d6   : > { %v7321_v25 = vsub.f32 %v7202_v57, %v2131_v38  ;;  %v2203_v42 = vsel %vm1927_vm12, %v2161_v7, 0.0  ;;  %v2162_v44 = vmul.f32 %v7315_v20, %v7315_v20  ;;  %v5637_v57 = vld [vmem:[%s8874_s13 + $0x40] sm:$0xff]  }
 0x3d7   : > { %2204 = vadd.xlane.f32.xlu0 %v2203_v42  ;;  %5332 = vmatprep.subr.bf16.mxu0 %v5637_v57 }
 0x3d8   : > { %v2206_v9 = vsel %vm1927_vm12, %v2162_v44, 0.0  ;;  %v2163_v37 = vmul.f32 %v7321_v25, %v7321_v25  ;;  %5333 = vmatpush3.bf16.msra.mxu0 %v5638_v8 }
 0x3d9   : > { %2207 = vadd.xlane.f32.xlu1 %v2206_v9  ;;  %5334 = vmatprep.subr.bf16.mxu0 %v5639_v61  ;;  %v8979_v61 = vmov 0  }
 0x3da   : > { %v2209_v29 = vsel %vm1927_vm12, %v2163_v37, 0.0 }
 0x3db   : > { %2210 = vadd.xlane.f32.xlu0 %v2209_v29 }
 0x3dc   : > { %5335 = vmatpush3.bf16.msra.mxu0 %v5640_v27 }
 0x3dd   : > { %5336 = vmatprep.subr.bf16.mxu0 %v5641_v47 }
 0x3e0   : > { %5337 = vmatpush3.bf16.msra.mxu0 %v5642_v39 }
 0x3e1   : > { %5338 = vmatprep.subr.bf16.mxu0 %v5643_v59 }
 0x3e4   : > { %5339 = vmatpush3.bf16.msra.mxu0 %v5644_v56 }
 0x3e5   : > { %5340 = vmatprep.subr.bf16.mxu0 %v5645_v55 }
 0x3e8   : > { %5341 = vmatpush3.bf16.msra.mxu0 %v5646_v2 }
 0x3e9   : > { %5342 = vmatprep.subr.bf16.mxu0 %v5647_v26 }
 0x42f   : > { %v2166_v53 = vpop.xlane.xlu1 %2165 }
 0x430   : > { %v2212_v40 = vmul.f32 0.015625, %v2166_v53 }
 0x431   : > { %v2169_v35 = vpop.xlane.xlu0 %2168 }
 0x432   : > { %v2228_v49 = vadd.f32 1e-05, %v2212_v40  ;;  %v2213_v54 = vmul.f32 0.015625, %v2169_v35 }
 0x433   : > { %v2172_v63 = vpop.xlane.xlu1 %2171 }
 0x434   : > { %5749 = vrsqrt.f32 %v2228_v49  ;;  %v2229_v21 = vadd.f32 1e-05, %v2213_v54  ;;  %v2214_v30 = vmul.f32 0.015625, %v2172_v63 }
 0x435   : > { %v2175_v43 = vpop.xlane.xlu0 %2174 }
 0x436   : > { %5751 = vrsqrt.f32 %v2229_v21  ;;  %v2230_v15 = vadd.f32 1e-05, %v2214_v30  ;;  %v2215_v19 = vmul.f32 0.015625, %v2175_v43 }
 0x438   : > { %5753 = vrsqrt.f32 %v2230_v15  ;;  %v2231_v22 = vadd.f32 1e-05, %v2215_v19 }
 0x43a   : > { %5755 = vrsqrt.f32 %v2231_v22 }
 0x43e   : > { %v5750_v5 = vpop.eup %5749 }
 0x43f   : > { %v2260_v1 = vmul.f32 %v5750_v5, %v7217_v62  ;;  %v2178_v24 = vpop.xlane.xlu1 %2177 }
 0x440   : > { %v5752_v36 = vpop.eup %5751  ;;  %v2216_v58 = vmul.f32 0.015625, %v2178_v24 }
 0x441   : > { %v2282_v34 = vmul.f32 %v7366_v31, %v2260_v1  ;;  %v2261_v50 = vmul.f32 %v5752_v36, %v7220_v3  ;;  %v2181_v45 = vpop.xlane.xlu0 %2180 }
 0x442   : > { %v5754_v28 = vpop.eup %5753  ;;  %v2232_v11 = vadd.f32 1e-05, %v2216_v58  ;;  %v2217_v18 = vmul.f32 0.015625, %v2181_v45 }
 0x443   : > { %v2283_v41 = vmul.f32 %v7366_v31, %v2261_v50  ;;  %v2184_v48 = vpop.xlane.xlu1 %2183  ;;  %v7378_v38 = vadd.f32 %v7374_v12, %v2282_v34  ;;  %v2262_v7 = vmul.f32 %v5754_v28, %v7225_v6 }
 0x444   : > { %v5756_v62 = vpop.eup %5755  ;;  %5757 = vrsqrt.f32 %v2232_v11  ;;  %v2233_v46 = vadd.f32 1e-05, %v2217_v18  ;;  %v2218_v16 = vmul.f32 0.015625, %v2184_v48 }
 0x445   : > { %v7381_v3 = vadd.f32 %v7374_v12, %v2283_v41  ;;  %v2187_v4 = vpop.xlane.xlu0 %2186  ;;  %v2263_v42 = vmul.f32 %v5756_v62, %v7231_v32  ;;  %v2284_v8 = vmul.f32 %v7366_v31, %v2262_v7 }
 0x446   : > { %5759 = vrsqrt.f32 %v2233_v46  ;;  %v2234_v44 = vadd.f32 1e-05, %v2218_v16  ;;  %v2219_v9 = vmul.f32 0.015625, %v2187_v4 }
 0x447   : > { %v2320_v37 = vpack.c.bf16 %v7381_v3, %v7378_v38  ;;  %v2285_v29 = vmul.f32 %v7366_v31, %v2263_v42  ;;  %v7395_v32 = vadd.f32 %v7374_v12, %v2284_v8 }
 0x448   : > { %5761 = vrsqrt.f32 %v2234_v44  ;;  %v2235_v57 = vadd.f32 1e-05, %v2219_v9 }
 0x449   : > { %5141 = vmatmul.mubr.msk.bf16.vlgmr.msra.gmra.mrb[16].mxu1 %vm1927_vm12, %v2320_v37  ;;  %v7392_v6 = vadd.f32 %v7374_v12, %v2285_v29 }
 0x44a   : > { %5763 = vrsqrt.f32 %v2235_v57  ;;  %2454 = vmatprep.mubr.bf16.mxu1 %v8979_v61 }
 0x44b   : > { %v2321_v39 = vpack.c.bf16 %v7392_v6, %v7395_v32 }
 0x44e   : > { %v5758_v27 = vpop.eup %5757 }
 0x44f   : > { %v2190_v47 = vpop.xlane.xlu1 %2189  ;;  %v2264_v59 = vmul.f32 %v5758_v27, %v7241_v14 }
 0x450   : > { %v5760_v56 = vpop.eup %5759  ;;  %v2220_v55 = vmul.f32 0.015625, %v2190_v47 }
 0x451   : > { %5142 = vmatmul.mubr.msk.bf16.gmra.mrb[20].mxu1 %vm1927_vm12, %v2321_v39  ;;  %v2193_v2 = vpop.xlane.xlu0 %2192  ;;  %v2265_v26 = vmul.f32 %v5760_v56, %v7244_v23  ;;  %v2286_v53 = vmul.f32 %v7366_v31, %v2264_v59 }
 0x452   : > { %v5762_v40 = vpop.eup %5761  ;;  %v2236_v35 = vadd.f32 1e-05, %v2220_v55  ;;  %v2221_v49 = vmul.f32 0.015625, %v2193_v2  ;;  %2464 = vmatprep.mubr.bf16.mxu1 %v8979_v61 }
 0x453   : > { %v2196_v54 = vpop.xlane.xlu1 %2195  ;;  %v2287_v63 = vmul.f32 %v7366_v31, %v2265_v26  ;;  %v7406_v15 = vadd.f32 %v7374_v12, %v2286_v53  ;;  %v2266_v19 = vmul.f32 %v5762_v40, %v7249_v17 }
 0x454   : > { %v5764_v21 = vpop.eup %5763  ;;  %5765 = vrsqrt.f32 %v2236_v35  ;;  %v2237_v14 = vadd.f32 1e-05, %v2221_v49  ;;  %v2222_v30 = vmul.f32 0.015625, %v2196_v54 }
 0x455   : > { %v2199_v43 = vpop.xlane.xlu0 %2198  ;;  %v7409_v23 = vadd.f32 %v7374_v12, %v2287_v63  ;;  %v2267_v22 = vmul.f32 %v5764_v21, %v7255_v10  ;;  %v2288_v34 = vmul.f32 %v7366_v31, %v2266_v19 }
 0x456   : > { %5767 = vrsqrt.f32 %v2237_v14  ;;  %v2238_v5 = vadd.f32 1e-05, %v2222_v30  ;;  %v2223_v1 = vmul.f32 0.015625, %v2199_v43 }
 0x457   : > { %v2322_v24 = vpack.c.bf16 %v7409_v23, %v7406_v15  ;;  %v2289_v36 = vmul.f32 %v7366_v31, %v2267_v22  ;;  %v7423_v10 = vadd.f32 %v7374_v12, %v2288_v34  ;;  %v8980_v34 = vlaneseq }
 0x458   : > { %5769 = vrsqrt.f32 %v2238_v5  ;;  %v2239_v58 = vadd.f32 1e-05, %v2223_v1 }
 0x459   : > { %5143 = vmatmul.mubr.msk.bf16.gmra.mrb[24].mxu1 %vm1927_vm12, %v2322_v24  ;;  %v7420_v17 = vadd.f32 %v7374_v12, %v2289_v36  ;;  %v5650_v36 = vld [vmem:[%s8874_s13 + $0x30] sm:$0xff]  }
 0x45a   : > { %5771 = vrsqrt.f32 %v2239_v58  ;;  %2474 = vmatprep.mubr.bf16.mxu1 %v8979_v61  ;;  %v5652_v58 = vld [vmem:[%s8874_s13 + $0x38] sm:$0xff]  }
 0x45b   : > { %v2323_v45 = vpack.c.bf16 %v7420_v17, %v7423_v10 }
 0x45e   : > { %v5766_v50 = vpop.eup %5765 }
 0x45f   : > { %v2268_v28 = vmul.f32 %v5766_v50, %v7268_v51  ;;  %v7500_v50 = vshrl.u32 %v8980_v34, 7 }
 0x460   : > { %v5768_v11 = vpop.eup %5767 }
 0x461   : > { %5144 = vmatmul.mubr.msk.bf16.gmra.mrb[28].mxu1 %vm1927_vm12, %v2323_v45  ;;  %v2269_v18 = vmul.f32 %v5768_v11, %v7274_v13  ;;  %v2290_v41 = vmul.f32 %v7366_v31, %v2268_v28  ;;  %v2340_v45 = vsub.s32 0, %v7500_v50  ;;  %v2336_v28 = vld [vmem:[%s8873_s12] sm:$0x3]  ;;  %v2344_v11 = vsub.s32 1, %v7500_v50 }
 0x462   : > { %v5770_v48 = vpop.eup %5769  ;;  %v2202_v62 = vpop.xlane.xlu1 %2201  ;;  %2484 = vmatprep.mubr.bf16.mxu1 %v8979_v61 }
 0x463   : > { %v2224_v46 = vmul.f32 0.015625, %v2202_v62  ;;  %v2291_v16 = vmul.f32 %v7366_v31, %v2269_v18  ;;  %v7434_v42 = vadd.f32 %v7374_v12, %v2290_v41  ;;  %v2270_v51 = vmul.f32 %v5770_v48, %v7282_v60 }
 0x464   : > { %v5772_v4 = vpop.eup %5771  ;;  %v2205_v7 = vpop.xlane.xlu0 %2204  ;;  %v7509_v18 = vrot.slane %v2336_v28, %v2340_v45  ;;  %v7513_v41 = vrot.slane %v2336_v28, %v2344_v11 }
 0x465   : > { %v2240_v44 = vadd.f32 1e-05, %v2224_v46  ;;  %v2225_v9 = vmul.f32 0.015625, %v2205_v7  ;;  %v7438_v13 = vadd.f32 %v7374_v12, %v2291_v16  ;;  %v2271_v37 = vmul.f32 %v5772_v4, %v7291_v52 }
 0x466   : > { %v2208_v29 = vpop.xlane.xlu1 %2207  ;;  %v2292_v56 = vmul.f32 %v7366_v31, %v2270_v51 }
 0x467   : > { %5773 = vrsqrt.f32 %v2240_v44  ;;  %v2241_v57 = vadd.f32 1e-05, %v2225_v9  ;;  %v2226_v8 = vmul.f32 0.015625, %v2208_v29  ;;  %v2324_v27 = vpack.c.bf16 %v7438_v13, %v7434_v42 }
 0x468   : > { %v2211_v47 = vpop.xlane.xlu0 %2210  ;;  %v2293_v39 = vmul.f32 %v7366_v31, %v2271_v37  ;;  %v7451_v2 = vadd.f32 %v7374_v12, %v2292_v56 }
 0x469   : > { %5775 = vrsqrt.f32 %v2241_v57  ;;  %v2242_v59 = vadd.f32 1e-05, %v2226_v8  ;;  %v2227_v60 = vmul.f32 0.015625, %v2211_v47  ;;  %5145 = vmatmul.mubr.msk.bf16.gmra.mrb[32].mxu1 %vm1927_vm12, %v2324_v27 }
 0x46a   : > { %2494 = vmatprep.mubr.bf16.mxu1 %v8979_v61  ;;  %v7448_v55 = vadd.f32 %v7374_v12, %v2293_v39 }
 0x46b   : > { %5777 = vrsqrt.f32 %v2242_v59  ;;  %v2243_v52 = vadd.f32 1e-05, %v2227_v60 }
 0x46c   : > { %v2325_v26 = vpack.c.bf16 %v7448_v55, %v7451_v2 }
 0x46d   : > { %5779 = vrsqrt.f32 %v2243_v52 }
 0x471   : > { %v5774_v53 = vpop.eup %5773  ;;  %5146 = vmatmul.mubr.msk.bf16.gmra.mrb[36].mxu1 %vm1927_vm12, %v2325_v26 }
 0x472   : > { %2504 = vmatprep.mubr.bf16.mxu1 %v8979_v61  ;;  %v2272_v40 = vmul.f32 %v5774_v53, %v7307_v0 }
 0x473   : > { %v5776_v35 = vpop.eup %5775 }
 0x474   : > { %v2273_v49 = vmul.f32 %v5776_v35, %v7310_v33  ;;  %v2294_v54 = vmul.f32 %v7366_v31, %v2272_v40 }
 0x475   : > { %v5778_v63 = vpop.eup %5777 }
 0x476   : > { %v2295_v21 = vmul.f32 %v7366_v31, %v2273_v49  ;;  %v7462_v30 = vadd.f32 %v7374_v12, %v2294_v54  ;;  %v2274_v19 = vmul.f32 %v5778_v63, %v7315_v20 }
 0x477   : > { %v5780_v14 = vpop.eup %5779 }
 0x478   : > { %v7465_v43 = vadd.f32 %v7374_v12, %v2295_v21  ;;  %v2275_v22 = vmul.f32 %v5780_v14, %v7321_v25  ;;  %v2296_v5 = vmul.f32 %v7366_v31, %v2274_v19  ;;  %v5648_v25 = vld [vmem:[%s8874_s13 + $0x28] sm:$0xff]  }
 0x479   : > { %5343 = vmatpush3.bf16.msra.mxu0 %v5648_v25 }
 0x47a   : > { %v2326_v0 = vpack.c.bf16 %v7465_v43, %v7462_v30  ;;  %v2297_v33 = vmul.f32 %v7366_v31, %v2275_v22  ;;  %v7479_v24 = vadd.f32 %v7374_v12, %v2296_v5  ;;  %v5649_v31 = vld [vmem:[%s8874_s13 + $0x70] sm:$0xff]  }
 0x47b   : > { %5344 = vmatprep.subr.bf16.mxu0 %v5649_v31 }
 0x47c   : > { %5147 = vmatmul.mubr.msk.bf16.gmra.mrb[40].mxu1 %vm1927_vm12, %v2326_v0  ;;  %v7476_v1 = vadd.f32 %v7374_v12, %v2297_v33  ;;  %v5651_v12 = vld [vmem:[%s8874_s13 + $0x78] sm:$0xff]  }
 0x47d   : > { %2514 = vmatprep.mubr.bf16.mxu1 %v8979_v61  ;;  %5345 = vmatpush3.bf16.msra.mxu0 %v5650_v36 }
 0x47e   : > { %v2327_v20 = vpack.c.bf16 %v7476_v1, %v7479_v24  ;;  %5346 = vmatprep.subr.bf16.mxu0 %v5651_v12 }
 0x481   : > { %5347 = vmatpush3.bf16.msra.mxu0 %v5652_v58 }
 0x484   : > { %5148 = vmatmul.mubr.msk.bf16.gmra.mrb[44].mxu1 %vm1927_vm12, %v2327_v20 }
 0x51c   : > { %v2446_v48 = vpop.f32.mrb[16].mxu1 }
 0x51d   : > { %v2447_v62 = vadd.f32 %v2446_v48, %v7509_v18  ;;  %v2448_v46 = vpop.f32.mrb[17].mxu1 }
 0x51e   : > { %v2449_v16 = vadd.f32 %v2448_v46, %v7513_v41  ;;  %v2450_v4 = vpop.f32.mrb[18].mxu1 }
 0x51f   : > { %v2451_v7 = vadd.f32 %v2450_v4, %v7509_v18  ;;  %v2452_v51 = vpop.f32.mrb[19].mxu1  ;;  %v2525_v9 = vmax.f32 %v2447_v62, 0.0 }
 0x520   : > { %v2453_v44 = vadd.f32 %v2452_v51, %v7513_v41  ;;  %v2526_v29 = vmax.f32 %v2449_v16, 0.0 }
 0x521   : > { %v2527_v37 = vmax.f32 %v2451_v7, 0.0 }
 0x522   : > { %v2528_v57 = vmax.f32 %v2453_v44, 0.0 }
 0x523   : > { %v2557_v8 = vpack.c.bf16 %v2527_v37, %v2525_v9 }
 0x524   : > { %v2558_v27 = vpack.c.bf16 %v2528_v57, %v2526_v29  ;;  %v2456_v47 = vpop.f32.mrb[20].mxu1 }
 0x525   : > { %v2457_v39 = vadd.f32 %v2456_v47, %v7509_v18  ;;  %v2458_v59 = vpop.f32.mrb[21].mxu1 }
 0x526   : > { %v2459_v60 = vadd.f32 %v2458_v59, %v7513_v41  ;;  %v2460_v56 = vpop.f32.mrb[22].mxu1  ;;  %2740 = vmatprep.mubr.bf16.mxu0 %v2558_v27 }
 0x527   : > { %v2461_v52 = vadd.f32 %v2460_v56, %v7509_v18  ;;  %v2462_v26 = vpop.f32.mrb[23].mxu1  ;;  %2741 = vmatmul.mubr.bf16.vlgmr.msra.gmra.mrb[32].mxu0 %v2557_v8  ;;  %v2529_v40 = vmax.f32 %v2457_v39, 0.0 }
 0x528   : > { %v2463_v53 = vadd.f32 %v2462_v26, %v7513_v41  ;;  %v2530_v49 = vmax.f32 %v2459_v60, 0.0 }
 0x529   : > { %v2531_v35 = vmax.f32 %v2461_v52, 0.0 }
 0x52a   : > { %v2532_v54 = vmax.f32 %v2463_v53, 0.0 }
 0x52b   : > { %v2559_v63 = vpack.c.bf16 %v2531_v35, %v2529_v40 }
 0x52c   : > { %v2560_v21 = vpack.c.bf16 %v2532_v54, %v2530_v49  ;;  %v2466_v14 = vpop.f32.mrb[24].mxu1 }
 0x52d   : > { %v2467_v19 = vadd.f32 %v2466_v14, %v7509_v18  ;;  %v2468_v22 = vpop.f32.mrb[25].mxu1 }
 0x52e   : > { %v2469_v0 = vadd.f32 %v2468_v22, %v7513_v41  ;;  %v2470_v33 = vpop.f32.mrb[26].mxu1  ;;  %2748 = vmatprep.mubr.bf16.mxu0 %v2560_v21 }
 0x52f   : > { %v2471_v5 = vadd.f32 %v2470_v33, %v7509_v18  ;;  %v2472_v20 = vpop.f32.mrb[27].mxu1  ;;  %2749 = vmatmul.mubr.bf16.gmra.mrb[36].mxu0 %v2559_v63  ;;  %v2533_v31 = vmax.f32 %v2467_v19, 0.0 }
 0x530   : > { %v2473_v25 = vadd.f32 %v2472_v20, %v7513_v41  ;;  %v2534_v12 = vmax.f32 %v2469_v0, 0.0 }
 0x531   : > { %v2535_v36 = vmax.f32 %v2471_v5, 0.0 }
 0x532   : > { %v2536_v58 = vmax.f32 %v2473_v25, 0.0 }
 0x533   : > { %v2561_v34 = vpack.c.bf16 %v2535_v36, %v2533_v31 }
 0x534   : > { %v2562_v28 = vpack.c.bf16 %v2536_v58, %v2534_v12  ;;  %v2476_v48 = vpop.f32.mrb[28].mxu1 }
 0x535   : > { %v2477_v62 = vadd.f32 %v2476_v48, %v7509_v18  ;;  %v2478_v46 = vpop.f32.mrb[29].mxu1 }
 0x536   : > { %v2479_v16 = vadd.f32 %v2478_v46, %v7513_v41  ;;  %v2480_v4 = vpop.f32.mrb[30].mxu1  ;;  %2756 = vmatprep.mubr.bf16.mxu0 %v2562_v28 }
 0x537   : > { %v2481_v7 = vadd.f32 %v2480_v4, %v7509_v18  ;;  %v2482_v51 = vpop.f32.mrb[31].mxu1  ;;  %2757 = vmatmul.mubr.bf16.gmra.mrb[40].mxu0 %v2561_v34  ;;  %v2537_v9 = vmax.f32 %v2477_v62, 0.0 }
 0x538   : > { %v2483_v44 = vadd.f32 %v2482_v51, %v7513_v41  ;;  %v2538_v29 = vmax.f32 %v2479_v16, 0.0 }
 0x539   : > { %v2539_v37 = vmax.f32 %v2481_v7, 0.0 }
 0x53a   : > { %v2540_v57 = vmax.f32 %v2483_v44, 0.0 }
 0x53b   : > { %v2563_v8 = vpack.c.bf16 %v2539_v37, %v2537_v9 }
 0x53c   : > { %v2564_v27 = vpack.c.bf16 %v2540_v57, %v2538_v29  ;;  %v2486_v47 = vpop.f32.mrb[32].mxu1 }
 0x53d   : > { %v2487_v39 = vadd.f32 %v2486_v47, %v7509_v18  ;;  %v2488_v59 = vpop.f32.mrb[33].mxu1 }
 0x53e   : > { %v2489_v60 = vadd.f32 %v2488_v59, %v7513_v41  ;;  %v2490_v56 = vpop.f32.mrb[34].mxu1  ;;  %2764 = vmatprep.mubr.bf16.mxu0 %v2564_v27 }
 0x53f   : > { %v2491_v52 = vadd.f32 %v2490_v56, %v7509_v18  ;;  %v2492_v26 = vpop.f32.mrb[35].mxu1  ;;  %2765 = vmatmul.mubr.bf16.gmra.mrb[44].mxu0 %v2563_v8  ;;  %v2541_v40 = vmax.f32 %v2487_v39, 0.0 }
 0x540   : > { %v2493_v53 = vadd.f32 %v2492_v26, %v7513_v41  ;;  %v2542_v49 = vmax.f32 %v2489_v60, 0.0 }
 0x541   : > { %v2543_v35 = vmax.f32 %v2491_v52, 0.0 }
 0x542   : > { %v2544_v54 = vmax.f32 %v2493_v53, 0.0 }
 0x543   : > { %v2565_v63 = vpack.c.bf16 %v2543_v35, %v2541_v40 }
 0x544   : > { %v2566_v21 = vpack.c.bf16 %v2544_v54, %v2542_v49  ;;  %v2496_v14 = vpop.f32.mrb[36].mxu1 }
 0x545   : > { %v2497_v19 = vadd.f32 %v2496_v14, %v7509_v18  ;;  %v2498_v22 = vpop.f32.mrb[37].mxu1 }
 0x546   : > { %v2499_v0 = vadd.f32 %v2498_v22, %v7513_v41  ;;  %v2500_v33 = vpop.f32.mrb[38].mxu1  ;;  %2772 = vmatprep.mubr.bf16.mxu0 %v2566_v21 }
 0x547   : > { %v2501_v5 = vadd.f32 %v2500_v33, %v7509_v18  ;;  %v2502_v20 = vpop.f32.mrb[39].mxu1  ;;  %2773 = vmatmul.mubr.bf16.gmra.mrb[48].mxu0 %v2565_v63  ;;  %v2545_v31 = vmax.f32 %v2497_v19, 0.0  ;;  %v7551_v19 = vld [vmem:[%s8875_s14] ss:$0 sm:$0xff] }
 0x548   : > { %v2503_v25 = vadd.f32 %v2502_v20, %v7513_v41  ;;  %v2546_v12 = vmax.f32 %v2499_v0, 0.0 }
 0x549   : > { %v2547_v36 = vmax.f32 %v2501_v5, 0.0 }
 0x54a   : > { %v2548_v58 = vmax.f32 %v2503_v25, 0.0 }
 0x54b   : > { %v2567_v34 = vpack.c.bf16 %v2547_v36, %v2545_v31 }
 0x54c   : > { %v2568_v28 = vpack.c.bf16 %v2548_v58, %v2546_v12 }
 0x54e   : > { %2780 = vmatprep.mubr.bf16.mxu0 %v2568_v28 }
 0x54f   : > { %v2506_v48 = vpop.f32.mrb[40].mxu1  ;;  %2781 = vmatmul.mubr.bf16.gmra.mrb[52].mxu0 %v2567_v34 }
 0x550   : > { %v2507_v62 = vadd.f32 %v2506_v48, %v7509_v18  ;;  %v2508_v46 = vpop.f32.mrb[41].mxu1 }
 0x551   : > { %v2509_v16 = vadd.f32 %v2508_v46, %v7513_v41  ;;  %v2510_v4 = vpop.f32.mrb[42].mxu1 }
 0x552   : > { %v2511_v7 = vadd.f32 %v2510_v4, %v7509_v18  ;;  %v2512_v51 = vpop.f32.mrb[43].mxu1  ;;  %v2549_v9 = vmax.f32 %v2507_v62, 0.0 }
 0x553   : > { %v2513_v44 = vadd.f32 %v2512_v51, %v7513_v41  ;;  %v2550_v29 = vmax.f32 %v2509_v16, 0.0 }
 0x554   : > { %v2551_v37 = vmax.f32 %v2511_v7, 0.0 }
 0x555   : > { %v2552_v57 = vmax.f32 %v2513_v44, 0.0 }
 0x556   : > { %v2569_v8 = vpack.c.bf16 %v2551_v37, %v2549_v9 }
 0x557   : > { %v2570_v27 = vpack.c.bf16 %v2552_v57, %v2550_v29  ;;  %v2516_v47 = vpop.f32.mrb[44].mxu1 }
 0x558   : > { %v2517_v39 = vadd.f32 %v2516_v47, %v7509_v18  ;;  %v2518_v59 = vpop.f32.mrb[45].mxu1 }
 0x559   : > { %v2519_v60 = vadd.f32 %v2518_v59, %v7513_v41  ;;  %v2520_v56 = vpop.f32.mrb[46].mxu1  ;;  %2788 = vmatprep.mubr.bf16.mxu0 %v2570_v27 }
 0x55a   : > { %v2521_v52 = vadd.f32 %v2520_v56, %v7509_v18  ;;  %v2522_v26 = vpop.f32.mrb[47].mxu1  ;;  %2789 = vmatmul.mubr.bf16.gmra.mrb[56].mxu0 %v2569_v8  ;;  %v2553_v40 = vmax.f32 %v2517_v39, 0.0 }
 0x55b   : > { %v2523_v53 = vadd.f32 %v2522_v26, %v7513_v41  ;;  %v2554_v49 = vmax.f32 %v2519_v60, 0.0 }
 0x55c   : > { %v2555_v35 = vmax.f32 %v2521_v52, 0.0 }
 0x55d   : > { %v2556_v54 = vmax.f32 %v2523_v53, 0.0 }
 0x55e   : > { %v2571_v63 = vpack.c.bf16 %v2555_v35, %v2553_v40 }
 0x55f   : > { %v2572_v21 = vpack.c.bf16 %v2556_v54, %v2554_v49 }
 0x561   : > { %2796 = vmatprep.mubr.bf16.mxu0 %v2572_v21 }
 0x562   : > { %2797 = vmatmul.mubr.bf16.gmra.mrb[60].mxu0 %v2571_v63 }
 0x563   : > { %3643 = vmatprep.mubr.bf16.mxu0 %v8979_v61 }
 0x5fa   : > { %v5348_v14 = vpop.f32.mrb[32].mxu0 }
 0x5fb   : > { %v5349_v18 = vpop.f32.mrb[33].mxu0 }
 0x5fc   : > { %v5350_v22 = vadd.f32 %v5349_v18, %v5348_v14  ;;  %v5351_v0 = vpop.f32.mrb[34].mxu0 }
 0x5fd   : > { %v5352_v41 = vpop.f32.mrb[35].mxu0 }
 0x5fe   : > { %v2743_v33 = vadd.f32 %v5350_v22, %v7551_v19  ;;  %v5353_v5 = vadd.f32 %v5352_v41, %v5351_v0 }
 0x600   : > { %v2746_v20 = vadd.f32 %v5353_v5, %v7551_v19  ;;  %v7556_v25 = vadd.f32 %v2743_v33, %v7378_v38 }
 0x602   : > { %v5354_v31 = vpop.f32.mrb[36].mxu0  ;;  %v2823_v36 = vsel %vm1927_vm12, %v7556_v25, 0.0  ;;  %v7561_v12 = vadd.f32 %v2746_v20, %v7381_v3 }
 0x603   : > { %2824 = vadd.xlane.f32.xlu1 %v2823_v36  ;;  %v5355_v58 = vpop.f32.mrb[37].mxu0 }
 0x604   : > { %v5356_v34 = vadd.f32 %v5355_v58, %v5354_v31  ;;  %v5357_v28 = vpop.f32.mrb[38].mxu0  ;;  %v2826_v48 = vsel %vm1927_vm12, %v7561_v12, 0.0 }
 0x605   : > { %2827 = vadd.xlane.f32.xlu0 %v2826_v48  ;;  %v5358_v62 = vpop.f32.mrb[39].mxu0 }
 0x606   : > { %v2751_v46 = vadd.f32 %v5356_v34, %v7551_v19  ;;  %v5359_v38 = vadd.f32 %v5358_v62, %v5357_v28 }
 0x608   : > { %v2754_v16 = vadd.f32 %v5359_v38, %v7551_v19  ;;  %v7568_v4 = vadd.f32 %v2751_v46, %v7395_v32 }
 0x60a   : > { %v5360_v7 = vpop.f32.mrb[40].mxu0  ;;  %v2829_v3 = vsel %vm1927_vm12, %v7568_v4, 0.0  ;;  %v7573_v51 = vadd.f32 %v2754_v16, %v7392_v6 }
 0x60b   : > { %2830 = vadd.xlane.f32.xlu1 %v2829_v3  ;;  %v5361_v44 = vpop.f32.mrb[41].mxu0 }
 0x60c   : > { %v5362_v9 = vadd.f32 %v5361_v44, %v5360_v7  ;;  %v5363_v37 = vpop.f32.mrb[42].mxu0  ;;  %v2832_v29 = vsel %vm1927_vm12, %v7573_v51, 0.0 }
 0x60d   : > { %2833 = vadd.xlane.f32.xlu0 %v2832_v29  ;;  %v5364_v57 = vpop.f32.mrb[43].mxu0 }
 0x60e   : > { %v2759_v8 = vadd.f32 %v5362_v9, %v7551_v19  ;;  %v5365_v32 = vadd.f32 %v5364_v57, %v5363_v37 }
 0x610   : > { %v2762_v27 = vadd.f32 %v5365_v32, %v7551_v19  ;;  %v7580_v47 = vadd.f32 %v2759_v8, %v7406_v15 }
 0x612   : > { %v5366_v39 = vpop.f32.mrb[44].mxu0  ;;  %v2835_v6 = vsel %vm1927_vm12, %v7580_v47, 0.0  ;;  %v7585_v59 = vadd.f32 %v2762_v27, %v7409_v23 }
 0x613   : > { %2836 = vadd.xlane.f32.xlu1 %v2835_v6  ;;  %v5367_v60 = vpop.f32.mrb[45].mxu0 }
 0x614   : > { %v5368_v56 = vadd.f32 %v5367_v60, %v5366_v39  ;;  %v5369_v52 = vpop.f32.mrb[46].mxu0  ;;  %v2838_v26 = vsel %vm1927_vm12, %v7585_v59, 0.0 }
 0x615   : > { %2839 = vadd.xlane.f32.xlu0 %v2838_v26  ;;  %v5370_v53 = vpop.f32.mrb[47].mxu0 }
 0x616   : > { %v2767_v40 = vadd.f32 %v5368_v56, %v7551_v19  ;;  %v5371_v15 = vadd.f32 %v5370_v53, %v5369_v52 }
 0x618   : > { %v2770_v35 = vadd.f32 %v5371_v15, %v7551_v19  ;;  %v7592_v49 = vadd.f32 %v2767_v40, %v7423_v10 }
 0x61a   : > { %v5372_v54 = vpop.f32.mrb[48].mxu0  ;;  %v2841_v23 = vsel %vm1927_vm12, %v7592_v49, 0.0  ;;  %v7597_v63 = vadd.f32 %v2770_v35, %v7420_v17 }
 0x61b   : > { %2842 = vadd.xlane.f32.xlu1 %v2841_v23  ;;  %v5373_v21 = vpop.f32.mrb[49].mxu0  ;;  %v5653_v23 = vld [vmem:[%s8945_s2 + $0x20] sm:$0xff]  }
 0x61c   : > { %v5374_v14 = vadd.f32 %v5373_v21, %v5372_v54  ;;  %v5375_v18 = vpop.f32.mrb[50].mxu0  ;;  %v2844_v22 = vsel %vm1927_vm12, %v7597_v63, 0.0  ;;  %5560 = vmatprep.subr.bf16.mxu1 %v5653_v23 }
 0x61d   : > { %2845 = vadd.xlane.f32.xlu0 %v2844_v22  ;;  %v5376_v0 = vpop.f32.mrb[51].mxu0  ;;  %5561 = vmatpush3.bf16.msra.mxu1 %v5653_v23 }
 0x61e   : > { %v2775_v41 = vadd.f32 %v5374_v14, %v7551_v19  ;;  %v5377_v10 = vadd.f32 %v5376_v0, %v5375_v18 }
 0x620   : > { %v2778_v33 = vadd.f32 %v5377_v10, %v7551_v19  ;;  %v7604_v5 = vadd.f32 %v2775_v41, %v7434_v42 }
 0x622   : > { %v5378_v20 = vpop.f32.mrb[52].mxu0  ;;  %v2847_v17 = vsel %vm1927_vm12, %v7604_v5, 0.0  ;;  %v7609_v31 = vadd.f32 %v2778_v33, %v7438_v13 }
 0x623   : > { %2848 = vadd.xlane.f32.xlu1 %v2847_v17  ;;  %v5379_v36 = vpop.f32.mrb[53].mxu0 }
 0x624   : > { %v5380_v58 = vadd.f32 %v5379_v36, %v5378_v20  ;;  %v5381_v34 = vpop.f32.mrb[54].mxu0  ;;  %v2850_v28 = vsel %vm1927_vm12, %v7609_v31, 0.0 }
 0x625   : > { %2851 = vadd.xlane.f32.xlu0 %v2850_v28  ;;  %v5382_v48 = vpop.f32.mrb[55].mxu0 }
 0x626   : > { %v2783_v62 = vadd.f32 %v5380_v58, %v7551_v19  ;;  %v5383_v42 = vadd.f32 %v5382_v48, %v5381_v34 }
 0x628   : > { %v2786_v46 = vadd.f32 %v5383_v42, %v7551_v19  ;;  %v7616_v38 = vadd.f32 %v2783_v62, %v7451_v2 }
 0x62a   : > { %v2853_v13 = vsel %vm1927_vm12, %v7616_v38, 0.0  ;;  %v7621_v16 = vadd.f32 %v2786_v46, %v7448_v55 }
 0x62b   : > { %2854 = vadd.xlane.f32.xlu1 %v2853_v13 }
 0x62c   : > { %v2856_v7 = vsel %vm1927_vm12, %v7621_v16, 0.0 }
 0x62d   : > { %2857 = vadd.xlane.f32.xlu0 %v2856_v7  ;;  %v5384_v3 = vpop.f32.mrb[56].mxu0 }
 0x62e   : > { %v5385_v44 = vpop.f32.mrb[57].mxu0 }
 0x62f   : > { %v5386_v9 = vadd.f32 %v5385_v44, %v5384_v3  ;;  %v5387_v37 = vpop.f32.mrb[58].mxu0 }
 0x630   : > { %v5388_v29 = vpop.f32.mrb[59].mxu0 }
 0x631   : > { %v2791_v57 = vadd.f32 %v5386_v9, %v7551_v19  ;;  %v5389_v2 = vadd.f32 %v5388_v29, %v5387_v37 }
 0x633   : > { %v2794_v8 = vadd.f32 %v5389_v2, %v7551_v19  ;;  %v7628_v32 = vadd.f32 %v2791_v57, %v7462_v30 }
 0x635   : > { %v5390_v55 = vpop.f32.mrb[60].mxu0  ;;  %v2859_v27 = vsel %vm1927_vm12, %v7628_v32, 0.0  ;;  %v7633_v39 = vadd.f32 %v2794_v8, %v7465_v43  ;;  %v5655_v8 = vld [vmem:[%s8945_s2 + $0x30] sm:$0xff]  }
 0x636   : > { %2860 = vadd.xlane.f32.xlu1 %v2859_v27  ;;  %v5391_v6 = vpop.f32.mrb[61].mxu0 }
 0x637   : > { %v5392_v60 = vadd.f32 %v5391_v6, %v5390_v55  ;;  %v5393_v56 = vpop.f32.mrb[62].mxu0  ;;  %v2862_v52 = vsel %vm1927_vm12, %v7633_v39, 0.0 }
 0x638   : > { %2863 = vadd.xlane.f32.xlu0 %v2862_v52  ;;  %v5394_v26 = vpop.f32.mrb[63].mxu0 }
 0x639   : > { %v2799_v53 = vadd.f32 %v5392_v60, %v7551_v19  ;;  %v5395_v30 = vadd.f32 %v5394_v26, %v5393_v56 }
 0x63b   : > { %v2802_v40 = vadd.f32 %v5395_v30, %v7551_v19  ;;  %v7640_v15 = vadd.f32 %v2799_v53, %v7479_v24  ;;  %v5654_v24 = vld [vmem:[%s8945_s2 + $0x28] sm:$0xff]  }
 0x63c   : > { %5562 = vmatprep.subr.bf16.mxu1 %v5654_v24 }
 0x63d   : > { %v2865_v43 = vsel %vm1927_vm12, %v7640_v15, 0.0  ;;  %v7645_v35 = vadd.f32 %v2802_v40, %v7476_v1  ;;  %5563 = vmatpush3.bf16.msra.mxu1 %v5654_v24 }
 0x63e   : > { %2866 = vadd.xlane.f32.xlu1 %v2865_v43  ;;  %5564 = vmatprep.subr.bf16.mxu1 %v5655_v8 }
 0x63f   : > { %v2868_v54 = vsel %vm1927_vm12, %v7645_v35, 0.0 }
 0x640   : > { %2869 = vadd.xlane.f32.xlu0 %v2868_v54 }
 0x641   : > { %5565 = vmatpush3.bf16.msra.mxu1 %v5655_v8 }
 0x690   : > { %v2825_v19 = vpop.xlane.xlu1 %2824 }
 0x691   : > { %v2871_v1 = vmul.f32 0.015625, %v2825_v19 }
 0x692   : > { %v2828_v21 = vpop.xlane.xlu0 %2827 }
 0x693   : > { %v7656_v14 = vsub.f32 %v7556_v25, %v2871_v1  ;;  %v2872_v18 = vmul.f32 0.015625, %v2828_v21 }
 0x695   : > { %v7659_v22 = vsub.f32 %v7561_v12, %v2872_v18  ;;  %v2903_v0 = vmul.f32 %v7656_v14, %v7656_v14 }
 0x697   : > { %v2919_v41 = vsel %vm1927_vm12, %v2903_v0, 0.0  ;;  %v2904_v10 = vmul.f32 %v7659_v22, %v7659_v22 }
 0x698   : > { %v2831_v33 = vpop.xlane.xlu1 %2830  ;;  %2920 = vadd.xlane.f32.xlu1 %v2919_v41 }
 0x699   : > { %v2873_v20 = vmul.f32 0.015625, %v2831_v33  ;;  %v2922_v17 = vsel %vm1927_vm12, %v2904_v10, 0.0 }
 0x69a   : > { %2923 = vadd.xlane.f32.xlu0 %v2922_v17  ;;  %v2834_v25 = vpop.xlane.xlu0 %2833 }
 0x69b   : > { %v7668_v36 = vsub.f32 %v7568_v4, %v2873_v20  ;;  %v2874_v12 = vmul.f32 0.015625, %v2834_v25 }
 0x69d   : > { %v7671_v58 = vsub.f32 %v7573_v51, %v2874_v12  ;;  %v2905_v34 = vmul.f32 %v7668_v36, %v7668_v36 }
 0x69f   : > { %v2925_v28 = vsel %vm1927_vm12, %v2905_v34, 0.0  ;;  %v2906_v48 = vmul.f32 %v7671_v58, %v7671_v58 }
 0x6a0   : > { %v2837_v62 = vpop.xlane.xlu1 %2836  ;;  %2926 = vadd.xlane.f32.xlu1 %v2925_v28 }
 0x6a1   : > { %v2875_v42 = vmul.f32 0.015625, %v2837_v62  ;;  %v2928_v46 = vsel %vm1927_vm12, %v2906_v48, 0.0 }
 0x6a2   : > { %2929 = vadd.xlane.f32.xlu0 %v2928_v46  ;;  %v2840_v4 = vpop.xlane.xlu0 %2839 }
 0x6a3   : > { %v7680_v13 = vsub.f32 %v7580_v47, %v2875_v42  ;;  %v2876_v51 = vmul.f32 0.015625, %v2840_v4 }
 0x6a5   : > { %v7683_v7 = vsub.f32 %v7585_v59, %v2876_v51  ;;  %v2907_v3 = vmul.f32 %v7680_v13, %v7680_v13 }
 0x6a7   : > { %v2931_v44 = vsel %vm1927_vm12, %v2907_v3, 0.0  ;;  %v2908_v9 = vmul.f32 %v7683_v7, %v7683_v7 }
 0x6a8   : > { %v2843_v37 = vpop.xlane.xlu1 %2842  ;;  %2932 = vadd.xlane.f32.xlu1 %v2931_v44 }
 0x6a9   : > { %v2877_v29 = vmul.f32 0.015625, %v2843_v37  ;;  %v2934_v57 = vsel %vm1927_vm12, %v2908_v9, 0.0 }
 0x6aa   : > { %2935 = vadd.xlane.f32.xlu0 %v2934_v57  ;;  %v2846_v47 = vpop.xlane.xlu0 %2845 }
 0x6ab   : > { %v7692_v2 = vsub.f32 %v7592_v49, %v2877_v29  ;;  %v2878_v59 = vmul.f32 0.015625, %v2846_v47 }
 0x6ad   : > { %v7698_v55 = vsub.f32 %v7597_v63, %v2878_v59  ;;  %v2909_v27 = vmul.f32 %v7692_v2, %v7692_v2 }
 0x6af   : > { %v2937_v6 = vsel %vm1927_vm12, %v2909_v27, 0.0  ;;  %v2910_v60 = vmul.f32 %v7698_v55, %v7698_v55 }
 0x6b0   : > { %v2849_v49 = vpop.xlane.xlu1 %2848  ;;  %2938 = vadd.xlane.f32.xlu1 %v2937_v6 }
 0x6b1   : > { %v2879_v56 = vmul.f32 0.015625, %v2849_v49  ;;  %v2940_v52 = vsel %vm1927_vm12, %v2910_v60, 0.0 }
 0x6b2   : > { %2941 = vadd.xlane.f32.xlu0 %v2940_v52  ;;  %v2852_v26 = vpop.xlane.xlu0 %2851 }
 0x6b3   : > { %v7707_v63 = vsub.f32 %v7604_v5, %v2879_v56  ;;  %v2880_v53 = vmul.f32 0.015625, %v2852_v26  ;;  %v7760_v26 = vld [vmem:[%s8876_s15] ss:$0 sm:$0xff] }
 0x6b5   : > { %v7710_v30 = vsub.f32 %v7609_v31, %v2880_v53  ;;  %v2911_v40 = vmul.f32 %v7707_v63, %v7707_v63 }
 0x6b7   : > { %v2943_v43 = vsel %vm1927_vm12, %v2911_v40, 0.0  ;;  %v2912_v54 = vmul.f32 %v7710_v30, %v7710_v30 }
 0x6b8   : > { %v2855_v23 = vpop.xlane.xlu1 %2854  ;;  %2944 = vadd.xlane.f32.xlu1 %v2943_v43 }
 0x6b9   : > { %v2881_v24 = vmul.f32 0.015625, %v2855_v23  ;;  %v2946_v19 = vsel %vm1927_vm12, %v2912_v54, 0.0 }
 0x6ba   : > { %2947 = vadd.xlane.f32.xlu0 %v2946_v19  ;;  %v2858_v5 = vpop.xlane.xlu0 %2857 }
 0x6bb   : > { %v7719_v1 = vsub.f32 %v7616_v38, %v2881_v24  ;;  %v2882_v31 = vmul.f32 0.015625, %v2858_v5  ;;  %v5656_v38 = vld [vmem:[%s8945_s2 + $0x38] sm:$0xff]   ;;  %v7768_v5 = vld [vmem:[%s8877_s16] ss:$0 sm:$0xff] }
 0x6bc   : > { %5566 = vmatprep.subr.bf16.mxu1 %v5656_v38 }
 0x6bd   : > { %v7722_v21 = vsub.f32 %v7621_v16, %v2882_v31  ;;  %v2913_v18 = vmul.f32 %v7719_v1, %v7719_v1  ;;  %5567 = vmatpush3.bf16.msra.mxu1 %v5656_v38 }
 0x6bf   : > { %v2949_v0 = vsel %vm1927_vm12, %v2913_v18, 0.0  ;;  %v2914_v41 = vmul.f32 %v7722_v21, %v7722_v21 }
 0x6c0   : > { %2950 = vadd.xlane.f32.xlu1 %v2949_v0 }
 0x6c1   : > { %v2952_v10 = vsel %vm1927_vm12, %v2914_v41, 0.0 }
 0x6c2   : > { %2953 = vadd.xlane.f32.xlu0 %v2952_v10 }
 0x6c3   : > { %v2861_v33 = vpop.xlane.xlu1 %2860 }
 0x6c4   : > { %v2883_v20 = vmul.f32 0.015625, %v2861_v33 }
 0x6c5   : > { %v2864_v16 = vpop.xlane.xlu0 %2863 }
 0x6c6   : > { %v7734_v17 = vsub.f32 %v7628_v32, %v2883_v20  ;;  %v2884_v25 = vmul.f32 0.015625, %v2864_v16 }
 0x6c8   : > { %v7737_v12 = vsub.f32 %v7633_v39, %v2884_v25  ;;  %v2915_v34 = vmul.f32 %v7734_v17, %v7734_v17 }
 0x6ca   : > { %v2955_v28 = vsel %vm1927_vm12, %v2915_v34, 0.0  ;;  %v2916_v48 = vmul.f32 %v7737_v12, %v7737_v12 }
 0x6cb   : > { %2956 = vadd.xlane.f32.xlu1 %v2955_v28  ;;  %v2867_v62 = vpop.xlane.xlu1 %2866 }
 0x6cc   : > { %v2885_v42 = vmul.f32 0.015625, %v2867_v62  ;;  %v2958_v46 = vsel %vm1927_vm12, %v2916_v48, 0.0 }
 0x6cd   : > { %2959 = vadd.xlane.f32.xlu0 %v2958_v46  ;;  %v2870_v32 = vpop.xlane.xlu0 %2869 }
 0x6ce   : > { %v7746_v4 = vsub.f32 %v7640_v15, %v2885_v42  ;;  %v2886_v39 = vmul.f32 0.015625, %v2870_v32 }
 0x6d0   : > { %v7749_v51 = vsub.f32 %v7645_v35, %v2886_v39  ;;  %v2917_v3 = vmul.f32 %v7746_v4, %v7746_v4 }
 0x6d2   : > { %v2961_v44 = vsel %vm1927_vm12, %v2917_v3, 0.0  ;;  %v2918_v9 = vmul.f32 %v7749_v51, %v7749_v51 }
 0x6d3   : > { %2962 = vadd.xlane.f32.xlu1 %v2961_v44 }
 0x6d4   : > { %v2964_v37 = vsel %vm1927_vm12, %v2918_v9, 0.0 }
 0x6d5   : > { %2965 = vadd.xlane.f32.xlu0 %v2964_v37 }
 0x725   : > { %v2921_v29 = vpop.xlane.xlu1 %2920 }
 0x726   : > { %v2967_v57 = vmul.f32 0.015625, %v2921_v29 }
 0x727   : > { %v2924_v15 = vpop.xlane.xlu0 %2923 }
 0x728   : > { %v2983_v47 = vadd.f32 1e-05, %v2967_v57  ;;  %v2968_v59 = vmul.f32 0.015625, %v2924_v15 }
 0x72a   : > { %5781 = vrsqrt.f32 %v2983_v47  ;;  %v2984_v35 = vadd.f32 1e-05, %v2968_v59 }
 0x72c   : > { %5783 = vrsqrt.f32 %v2984_v35 }
 0x72d   : > { %v2927_v8 = vpop.xlane.xlu1 %2926 }
 0x72e   : > { %v2969_v27 = vmul.f32 0.015625, %v2927_v8 }
 0x72f   : > { %v2930_v6 = vpop.xlane.xlu0 %2929 }
 0x730   : > { %v2985_v60 = vadd.f32 1e-05, %v2969_v27  ;;  %v2970_v49 = vmul.f32 0.015625, %v2930_v6 }
 0x732   : > { %5785 = vrsqrt.f32 %v2985_v60  ;;  %v2986_v56 = vadd.f32 1e-05, %v2970_v49 }
 0x734   : > { %v5782_v52 = vpop.eup %5781  ;;  %5787 = vrsqrt.f32 %v2986_v56 }
 0x735   : > { %v2933_v53 = vpop.xlane.xlu1 %2932  ;;  %v3015_v40 = vmul.f32 %v5782_v52, %v7656_v14 }
 0x736   : > { %v5784_v43 = vpop.eup %5783  ;;  %v2971_v54 = vmul.f32 0.015625, %v2933_v53 }
 0x737   : > { %v2936_v23 = vpop.xlane.xlu0 %2935  ;;  %v3016_v24 = vmul.f32 %v5784_v43, %v7659_v22  ;;  %v3037_v19 = vmul.f32 %v7760_v26, %v3015_v40 }
 0x738   : > { %v2987_v31 = vadd.f32 1e-05, %v2971_v54  ;;  %v2972_v18 = vmul.f32 0.015625, %v2936_v23 }
 0x739   : > { %v3038_v0 = vmul.f32 %v7760_v26, %v3016_v24  ;;  %v7772_v14 = vadd.f32 %v7768_v5, %v3037_v19 }
 0x73a   : > { %5789 = vrsqrt.f32 %v2987_v31  ;;  %v2988_v41 = vadd.f32 1e-05, %v2972_v18 }
 0x73b   : > { %v7775_v10 = vadd.f32 %v7768_v5, %v3038_v0 }
 0x73c   : > { %v5786_v22 = vpop.eup %5785  ;;  %5791 = vrsqrt.f32 %v2988_v41 }
 0x73d   : > { %v3017_v38 = vmul.f32 %v5786_v22, %v7668_v36  ;;  %v2939_v33 = vpop.xlane.xlu1 %2938  ;;  %v3075_v20 = vpack.c.bf16 %v7775_v10, %v7772_v14 }
 0x73e   : > { %v5788_v16 = vpop.eup %5787  ;;  %v2973_v25 = vmul.f32 0.015625, %v2939_v33 }
 0x73f   : > { %v3039_v34 = vmul.f32 %v7760_v26, %v3017_v38  ;;  %v3018_v28 = vmul.f32 %v5788_v16, %v7671_v58  ;;  %5568 = vmatprep.mubr.msk.bf16.mxu1 %vm1927_vm12, %v3075_v20  ;;  %v2942_v48 = vpop.xlane.xlu0 %2941 }
 0x740   : > { %v2989_v62 = vadd.f32 1e-05, %v2973_v25  ;;  %v2974_v42 = vmul.f32 0.015625, %v2942_v48 }
 0x741   : > { %v3040_v46 = vmul.f32 %v7760_v26, %v3018_v28  ;;  %v7785_v36 = vadd.f32 %v7768_v5, %v3039_v34 }
 0x742   : > { %5793 = vrsqrt.f32 %v2989_v62  ;;  %v2990_v32 = vadd.f32 1e-05, %v2974_v42 }
 0x743   : > { %v7788_v39 = vadd.f32 %v7768_v5, %v3040_v46 }
 0x744   : > { %v5790_v3 = vpop.eup %5789  ;;  %5795 = vrsqrt.f32 %v2990_v32 }
 0x745   : > { %v2945_v44 = vpop.xlane.xlu1 %2944  ;;  %v3076_v58 = vpack.c.bf16 %v7788_v39, %v7785_v36  ;;  %v3019_v9 = vmul.f32 %v5790_v3, %v7680_v13 }
 0x746   : > { %v5792_v37 = vpop.eup %5791  ;;  %v2975_v29 = vmul.f32 0.015625, %v2945_v44 }
 0x747   : > { %5569 = vmatmul.mubr.msk.bf16.vlgmr.msra.gmra.mrb[48].mxu1 %vm1927_vm12, %v3076_v58  ;;  %v2948_v57 = vpop.xlane.xlu0 %2947  ;;  %v3020_v15 = vmul.f32 %v5792_v37, %v7683_v7  ;;  %v3041_v47 = vmul.f32 %v7760_v26, %v3019_v9 }
 0x748   : > { %v2991_v59 = vadd.f32 1e-05, %v2975_v29  ;;  %v2976_v35 = vmul.f32 0.015625, %v2948_v57 }
 0x749   : > { %v3042_v8 = vmul.f32 %v7760_v26, %v3020_v15  ;;  %v7798_v6 = vadd.f32 %v7768_v5, %v3041_v47 }
 0x74a   : > { %5797 = vrsqrt.f32 %v2991_v59  ;;  %v2992_v27 = vadd.f32 1e-05, %v2976_v35 }
 0x74b   : > { %v7801_v13 = vadd.f32 %v7768_v5, %v3042_v8 }
 0x74c   : > { %v5794_v60 = vpop.eup %5793  ;;  %5799 = vrsqrt.f32 %v2992_v27 }
 0x74d   : > { %v2951_v49 = vpop.xlane.xlu1 %2950  ;;  %v3077_v7 = vpack.c.bf16 %v7801_v13, %v7798_v6  ;;  %v3021_v56 = vmul.f32 %v5794_v60, %v7692_v2 }
 0x74e   : > { %v5796_v52 = vpop.eup %5795  ;;  %v2977_v53 = vmul.f32 0.015625, %v2951_v49 }
 0x74f   : > { %5572 = vmatprep.mubr.msk.bf16.mxu1 %vm1927_vm12, %v3077_v7  ;;  %v2954_v40 = vpop.xlane.xlu0 %2953  ;;  %v3022_v43 = vmul.f32 %v5796_v52, %v7698_v55  ;;  %v3043_v54 = vmul.f32 %v7760_v26, %v3021_v56 }
 0x750   : > { %v2993_v23 = vadd.f32 1e-05, %v2977_v53  ;;  %v2978_v24 = vmul.f32 0.015625, %v2954_v40 }
 0x751   : > { %v3044_v19 = vmul.f32 %v7760_v26, %v3022_v43  ;;  %v7811_v18 = vadd.f32 %v7768_v5, %v3043_v54 }
 0x752   : > { %5801 = vrsqrt.f32 %v2993_v23  ;;  %v2994_v31 = vadd.f32 1e-05, %v2978_v24 }
 0x753   : > { %v7814_v2 = vadd.f32 %v7768_v5, %v3044_v19 }
 0x754   : > { %v5798_v0 = vpop.eup %5797  ;;  %5803 = vrsqrt.f32 %v2994_v31 }
 0x755   : > { %v3078_v41 = vpack.c.bf16 %v7814_v2, %v7811_v18  ;;  %v3023_v55 = vmul.f32 %v5798_v0, %v7707_v63 }
 0x756   : > { %v5800_v22 = vpop.eup %5799 }
 0x757   : > { %5573 = vmatmul.mubr.msk.bf16.gmra.mrb[52].mxu1 %vm1927_vm12, %v3078_v41  ;;  %v3024_v38 = vmul.f32 %v5800_v22, %v7710_v30  ;;  %v3045_v33 = vmul.f32 %v7760_v26, %v3023_v55 }
 0x758   : > { %v2957_v20 = vpop.xlane.xlu1 %2956 }
 0x759   : > { %v2979_v16 = vmul.f32 0.015625, %v2957_v20  ;;  %v3046_v25 = vmul.f32 %v7760_v26, %v3024_v38  ;;  %v7824_v62 = vadd.f32 %v7768_v5, %v3045_v33 }
 0x75a   : > { %v2960_v34 = vpop.xlane.xlu0 %2959 }
 0x75b   : > { %v2995_v28 = vadd.f32 1e-05, %v2979_v16  ;;  %v2980_v48 = vmul.f32 0.015625, %v2960_v34  ;;  %v7827_v42 = vadd.f32 %v7768_v5, %v3046_v25 }
 0x75c   : > { %v5802_v63 = vpop.eup %5801 }
 0x75d   : > { %5805 = vrsqrt.f32 %v2995_v28  ;;  %v2996_v46 = vadd.f32 1e-05, %v2980_v48  ;;  %v3079_v30 = vpack.c.bf16 %v7827_v42, %v7824_v62  ;;  %v3025_v32 = vmul.f32 %v5802_v63, %v7719_v1 }
 0x75e   : > { %v5804_v3 = vpop.eup %5803 }
 0x75f   : > { %5807 = vrsqrt.f32 %v2996_v46  ;;  %5576 = vmatprep.mubr.msk.bf16.mxu1 %vm1927_vm12, %v3079_v30  ;;  %v3026_v44 = vmul.f32 %v5804_v3, %v7722_v21  ;;  %v3047_v58 = vmul.f32 %v7760_v26, %v3025_v32 }
 0x760   : > { %v2963_v9 = vpop.xlane.xlu1 %2962 }
 0x761   : > { %v2981_v37 = vmul.f32 0.015625, %v2963_v9  ;;  %v3048_v29 = vmul.f32 %v7760_v26, %v3026_v44  ;;  %v7837_v59 = vadd.f32 %v7768_v5, %v3047_v58 }
 0x762   : > { %v2966_v57 = vpop.xlane.xlu0 %2965 }
 0x763   : > { %v2997_v15 = vadd.f32 1e-05, %v2981_v37  ;;  %v2982_v47 = vmul.f32 0.015625, %v2966_v57  ;;  %v7840_v1 = vadd.f32 %v7768_v5, %v3048_v29 }
 0x765   : > { %5809 = vrsqrt.f32 %v2997_v15  ;;  %v2998_v35 = vadd.f32 1e-05, %v2982_v47  ;;  %v3080_v21 = vpack.c.bf16 %v7840_v1, %v7837_v59 }
 0x767   : > { %v5806_v8 = vpop.eup %5805  ;;  %5811 = vrsqrt.f32 %v2998_v35  ;;  %5577 = vmatmul.mubr.msk.bf16.gmra.mrb[56].mxu1 %vm1927_vm12, %v3080_v21 }
 0x768   : > { %v3027_v27 = vmul.f32 %v5806_v8, %v7734_v17 }
 0x769   : > { %v5808_v60 = vpop.eup %5807 }
 0x76a   : > { %v3028_v49 = vmul.f32 %v5808_v60, %v7737_v12  ;;  %v3049_v7 = vmul.f32 %v7760_v26, %v3027_v27 }
 0x76c   : > { %v3050_v56 = vmul.f32 %v7760_v26, %v3028_v49  ;;  %v7850_v52 = vadd.f32 %v7768_v5, %v3049_v7 }
 0x76e   : > { %v7853_v53 = vadd.f32 %v7768_v5, %v3050_v56 }
 0x76f   : > { %v5810_v40 = vpop.eup %5809 }
 0x770   : > { %v3081_v43 = vpack.c.bf16 %v7853_v53, %v7850_v52  ;;  %v3029_v54 = vmul.f32 %v5810_v40, %v7746_v4  ;;  %v7874_v4 = vld [vmem:[%s8974_s8 + $0x1] ss:$0 sm:$0xff] }
 0x771   : > { %v5812_v17 = vpop.eup %5811 }
 0x772   : > { %5580 = vmatprep.mubr.msk.bf16.mxu1 %vm1927_vm12, %v3081_v43  ;;  %v3030_v12 = vmul.f32 %v5812_v17, %v7749_v51  ;;  %v3051_v23 = vmul.f32 %v7760_v26, %v3029_v54 }
 0x774   : > { %v3052_v24 = vmul.f32 %v7760_v26, %v3030_v12  ;;  %v7863_v19 = vadd.f32 %v7768_v5, %v3051_v23 }
 0x776   : > { %v7866_v31 = vadd.f32 %v7768_v5, %v3052_v24 }
 0x778   : > { %v3082_v0 = vpack.c.bf16 %v7866_v31, %v7863_v19 }
 0x77a   : > { %5581 = vmatmul.mubr.msk.bf16.gmra.mrb[60].mxu1 %vm1927_vm12, %v3082_v0 }
 0x81a   : > { %v5570_v51 = vpop.f32.mrb[48].mxu1 }
 0x81b   : > { %v3182_v41 = vpop.f32.mrb[49].mxu1  ;;  %v3191_v26 = vadd.f32 %v5570_v51, %v7874_v4 }
 0x81c   : > { %v3183_v55 = vadd.f32 %v7874_v4, %v3182_v41  ;;  %v5571_v22 = vpop.f32.mrb[50].mxu1 }
 0x81d   : > { %v3185_v38 = vpop.f32.mrb[51].mxu1  ;;  %v3194_v33 = vadd.f32 %v5571_v22, %v7874_v4  ;;  %v7884_v16 = vadd.f32 %v3191_v26, %v7785_v36 }
 0x81e   : > { %v7879_v5 = vadd.f32 %v3183_v55, %v7772_v14  ;;  %v3186_v20 = vadd.f32 %v7874_v4, %v3185_v38 }
 0x81f   : > { %v7892_v28 = vadd.f32 %v3194_v33, %v7788_v39  ;;  %v3271_v48 = vsel %vm1927_vm12, %v7884_v16, 0.0  ;;  %v5662_v33 = vld [vmem:[%s8976_s29 + $0x54] ss:$8 sps:$4 sm:$0xff]  }
 0x820   : > { %v7887_v25 = vadd.f32 %v3186_v20, %v7775_v10  ;;  %v3265_v34 = vsel %vm1927_vm12, %v7879_v5, 0.0  ;;  %v5660_v20 = vld [vmem:[%s8976_s29 + $0x50] ss:$8 sps:$4 sm:$0xff]  }
 0x821   : > { %3266 = vadd.xlane.f32.xlu1 %v3265_v34  ;;  %v3274_v36 = vsel %vm1927_vm12, %v7892_v28, 0.0  ;;  %v5665_v34 = vld [vmem:[%s8976_s29 + $0x64] ss:$8 sps:$4 sm:$0xff]  }
 0x822   : > { %v3268_v14 = vsel %vm1927_vm12, %v7887_v25, 0.0 }
 0x823   : > { %3269 = vadd.xlane.f32.xlu0 %v3268_v14  ;;  %v5663_v14 = vld [vmem:[%s8976_s29 + $0x60] ss:$8 sps:$4 sm:$0xff]  }
 0x825   : > { %3272 = vadd.xlane.f32.xlu1 %v3271_v48 }
 0x827   : > { %3275 = vadd.xlane.f32.xlu0 %v3274_v36 }
 0x82a   : > { %v5574_v10 = vpop.f32.mrb[52].mxu1 }
 0x82b   : > { %v3198_v63 = vpop.f32.mrb[53].mxu1  ;;  %v3207_v46 = vadd.f32 %v5574_v10, %v7874_v4 }
 0x82c   : > { %v3199_v30 = vadd.f32 %v7874_v4, %v3198_v63  ;;  %v5575_v39 = vpop.f32.mrb[54].mxu1 }
 0x82d   : > { %v3201_v32 = vpop.f32.mrb[55].mxu1  ;;  %v3210_v44 = vadd.f32 %v5575_v39, %v7874_v4  ;;  %v7908_v9 = vadd.f32 %v3207_v46, %v7811_v18 }
 0x82e   : > { %v7903_v3 = vadd.f32 %v3199_v30, %v7798_v6  ;;  %v3202_v58 = vadd.f32 %v7874_v4, %v3201_v32 }
 0x82f   : > { %v7916_v57 = vadd.f32 %v3210_v44, %v7814_v2  ;;  %v3283_v15 = vsel %vm1927_vm12, %v7908_v9, 0.0 }
 0x830   : > { %v7911_v37 = vadd.f32 %v3202_v58, %v7801_v13  ;;  %v3277_v29 = vsel %vm1927_vm12, %v7903_v3, 0.0 }
 0x831   : > { %3278 = vadd.xlane.f32.xlu1 %v3277_v29  ;;  %v3286_v18 = vsel %vm1927_vm12, %v7916_v57, 0.0 }
 0x832   : > { %v3280_v6 = vsel %vm1927_vm12, %v7911_v37, 0.0 }
 0x833   : > { %3281 = vadd.xlane.f32.xlu0 %v3280_v6 }
 0x835   : > { %3284 = vadd.xlane.f32.xlu1 %v3283_v15 }
 0x837   : > { %3287 = vadd.xlane.f32.xlu0 %v3286_v18 }
 0x83a   : > { %v5578_v13 = vpop.f32.mrb[56].mxu1 }
 0x83b   : > { %v3214_v47 = vpop.f32.mrb[57].mxu1  ;;  %v3223_v35 = vadd.f32 %v5578_v13, %v7874_v4 }
 0x83c   : > { %v3215_v21 = vadd.f32 %v7874_v4, %v3214_v47  ;;  %v5579_v2 = vpop.f32.mrb[58].mxu1 }
 0x83d   : > { %v3217_v8 = vpop.f32.mrb[59].mxu1  ;;  %v3226_v60 = vadd.f32 %v5579_v2, %v7874_v4  ;;  %v7932_v7 = vadd.f32 %v3223_v35, %v7837_v59 }
 0x83e   : > { %v7927_v27 = vadd.f32 %v3215_v21, %v7824_v62  ;;  %v3218_v49 = vadd.f32 %v7874_v4, %v3217_v8 }
 0x83f   : > { %v7940_v43 = vadd.f32 %v3226_v60, %v7840_v1  ;;  %v3295_v54 = vsel %vm1927_vm12, %v7932_v7, 0.0 }
 0x840   : > { %v7935_v56 = vadd.f32 %v3218_v49, %v7827_v42  ;;  %v3289_v40 = vsel %vm1927_vm12, %v7927_v27, 0.0 }
 0x841   : > { %3290 = vadd.xlane.f32.xlu1 %v3289_v40  ;;  %v3298_v59 = vsel %vm1927_vm12, %v7940_v43, 0.0 }
 0x842   : > { %v3292_v62 = vsel %vm1927_vm12, %v7935_v56, 0.0 }
 0x843   : > { %3293 = vadd.xlane.f32.xlu0 %v3292_v62 }
 0x845   : > { %3296 = vadd.xlane.f32.xlu1 %v3295_v54 }
 0x847   : > { %3299 = vadd.xlane.f32.xlu0 %v3298_v59 }
 0x84d   : > { %v5582_v42 = vpop.f32.mrb[60].mxu1 }
 0x84e   : > { %v3230_v17 = vpop.f32.mrb[61].mxu1  ;;  %v3239_v12 = vadd.f32 %v5582_v42, %v7874_v4 }
 0x84f   : > { %v3231_v23 = vadd.f32 %v7874_v4, %v3230_v17  ;;  %v5583_v1 = vpop.f32.mrb[62].mxu1 }
 0x850   : > { %v3233_v24 = vpop.f32.mrb[63].mxu1  ;;  %v3242_v51 = vadd.f32 %v5583_v1, %v7874_v4  ;;  %v7956_v26 = vadd.f32 %v3239_v12, %v7863_v19 }
 0x851   : > { %v7951_v0 = vadd.f32 %v3231_v23, %v7850_v52  ;;  %v3234_v41 = vadd.f32 %v7874_v4, %v3233_v24 }
 0x852   : > { %v7964_v38 = vadd.f32 %v3242_v51, %v7866_v31  ;;  %v3307_v4 = vsel %vm1927_vm12, %v7956_v26, 0.0  ;;  %v5659_v31 = vld [vmem:[%s8976_s29 + $0x44] ss:$8 sps:$4 sm:$0xff]  }
 0x853   : > { %v7959_v55 = vadd.f32 %v3234_v41, %v7853_v53  ;;  %v3301_v22 = vsel %vm1927_vm12, %v7951_v0, 0.0  ;;  %v5657_v53 = vld [vmem:[%s8976_s29 + $0x40] ss:$8 sps:$4 sm:$0xff]   ;;  %3611 = vmatprep.subr.bf16.mxu0 %v5659_v31 }
 0x854   : > { %3302 = vadd.xlane.f32.xlu1 %v3301_v22  ;;  %v3310_v19 = vsel %vm1927_vm12, %v7964_v38, 0.0  ;;  %3612 = vmatpush1.bf16.msra.mxu0 %v5657_v53 }
 0x855   : > { %v3304_v52 = vsel %vm1927_vm12, %v7959_v55, 0.0  ;;  %3613 = vmatprep.subr.bf16.mxu0 %v5662_v33 }
 0x856   : > { %3305 = vadd.xlane.f32.xlu0 %v3304_v52 }
 0x858   : > { %3308 = vadd.xlane.f32.xlu1 %v3307_v4  ;;  %3614 = vmatpush1.bf16.msra.mxu0 %v5660_v20 }
 0x859   : > { %3615 = vmatprep.subr.bf16.mxu0 %v5665_v34 }
 0x85a   : > { %3311 = vadd.xlane.f32.xlu0 %v3310_v19 }
 0x85c   : > { %3616 = vmatpush1.bf16.msra.mxu0 %v5663_v14 }
 0x8ae   : > { %v3267_v48 = vpop.xlane.xlu1 %3266 }
 0x8af   : > { %v3313_v36 = vmul.f32 0.015625, %v3267_v48 }
 0x8b0   : > { %v3270_v10 = vpop.xlane.xlu0 %3269 }
 0x8b1   : > { %v7991_v63 = vsub.f32 %v7879_v5, %v3313_v36  ;;  %v3314_v46 = vmul.f32 0.015625, %v3270_v10 }
 0x8b2   : > { %v3273_v30 = vpop.xlane.xlu1 %3272 }
 0x8b3   : > { %v7994_v39 = vsub.f32 %v7887_v25, %v3314_v46  ;;  %v3315_v32 = vmul.f32 0.015625, %v3273_v30  ;;  %v3345_v44 = vmul.f32 %v7991_v63, %v7991_v63 }
 0x8b4   : > { %v3276_v58 = vpop.xlane.xlu0 %3275 }
 0x8b5   : > { %v7999_v29 = vsub.f32 %v7884_v16, %v3315_v32  ;;  %v3316_v6 = vmul.f32 0.015625, %v3276_v58  ;;  %v3361_v15 = vsel %vm1927_vm12, %v3345_v44, 0.0  ;;  %v3346_v5 = vmul.f32 %v7994_v39, %v7994_v39 }
 0x8b6   : > { %3362 = vadd.xlane.f32.xlu1 %v3361_v15 }
 0x8b7   : > { %v8005_v18 = vsub.f32 %v7892_v28, %v3316_v6  ;;  %v3364_v25 = vsel %vm1927_vm12, %v3346_v5, 0.0  ;;  %v3347_v13 = vmul.f32 %v7999_v29, %v7999_v29 }
 0x8b8   : > { %3365 = vadd.xlane.f32.xlu0 %v3364_v25 }
 0x8b9   : > { %v3367_v47 = vsel %vm1927_vm12, %v3347_v13, 0.0  ;;  %v3348_v16 = vmul.f32 %v8005_v18, %v8005_v18 }
 0x8ba   : > { %3368 = vadd.xlane.f32.xlu1 %v3367_v47 }
 0x8bb   : > { %v3370_v35 = vsel %vm1927_vm12, %v3348_v16, 0.0 }
 0x8bc   : > { %3371 = vadd.xlane.f32.xlu0 %v3370_v35 }
 0x8be   : > { %v3279_v21 = vpop.xlane.xlu1 %3278 }
 0x8bf   : > { %v3317_v2 = vmul.f32 0.015625, %v3279_v21 }
 0x8c0   : > { %v3282_v8 = vpop.xlane.xlu0 %3281 }
 0x8c1   : > { %v8015_v28 = vsub.f32 %v7903_v3, %v3317_v2  ;;  %v3318_v60 = vmul.f32 0.015625, %v3282_v8 }
 0x8c2   : > { %v3285_v49 = vpop.xlane.xlu1 %3284 }
 0x8c3   : > { %v8018_v40 = vsub.f32 %v7911_v37, %v3318_v60  ;;  %v3319_v62 = vmul.f32 0.015625, %v3285_v49  ;;  %v3349_v54 = vmul.f32 %v8015_v28, %v8015_v28 }
 0x8c4   : > { %v3288_v59 = vpop.xlane.xlu0 %3287 }
 0x8c5   : > { %v8023_v42 = vsub.f32 %v7908_v9, %v3319_v62  ;;  %v3320_v17 = vmul.f32 0.015625, %v3288_v59  ;;  %v3373_v12 = vsel %vm1927_vm12, %v3349_v54, 0.0  ;;  %v3350_v3 = vmul.f32 %v8018_v40, %v8018_v40  ;;  %v5670_v59 = vld [vmem:[%s8874_s13 + $0x80] sm:$0xff]  }
 0x8c6   : > { %3374 = vadd.xlane.f32.xlu1 %v3373_v12  ;;  %v5672_v12 = vld [vmem:[%s8874_s13 + $0x88] sm:$0xff]  }
 0x8c7   : > { %v8029_v23 = vsub.f32 %v7916_v57, %v3320_v17  ;;  %v3376_v37 = vsel %vm1927_vm12, %v3350_v3, 0.0  ;;  %v3351_v1 = vmul.f32 %v8023_v42, %v8023_v42  ;;  %v5671_v17 = vld [vmem:[%s8874_s13 + $0xc8] sm:$0xff]   ;;  %v5673_v3 = vld [vmem:[%s8874_s13 + $0xd0] sm:$0xff]  }
 0x8c8   : > { %3377 = vadd.xlane.f32.xlu0 %v3376_v37  ;;  %v5674_v37 = vld [vmem:[%s8874_s13 + $0x90] sm:$0xff]  }
 0x8c9   : > { %v3379_v24 = vsel %vm1927_vm12, %v3351_v1, 0.0  ;;  %v3352_v9 = vmul.f32 %v8029_v23, %v8029_v23  ;;  %v5675_v1 = vld [vmem:[%s8874_s13 + $0xd8] sm:$0xff]  }
 0x8ca   : > { %3380 = vadd.xlane.f32.xlu1 %v3379_v24  ;;  %v5676_v24 = vld [vmem:[%s8874_s13 + $0x98] sm:$0xff]  }
 0x8cb   : > { %v3382_v51 = vsel %vm1927_vm12, %v3352_v9, 0.0  ;;  %v5677_v9 = vld [vmem:[%s8874_s13 + $0xe0] sm:$0xff]  }
 0x8cc   : > { %3383 = vadd.xlane.f32.xlu0 %v3382_v51  ;;  %v5678_v51 = vld [vmem:[%s8874_s13 + $0xa0] sm:$0xff]  }
 0x8ce   : > { %v3291_v41 = vpop.xlane.xlu1 %3290 }
 0x8cf   : > { %v3321_v22 = vmul.f32 0.015625, %v3291_v41  ;;  %v5679_v41 = vld [vmem:[%s8874_s13 + $0xe8] sm:$0xff]  }
 0x8d0   : > { %v3294_v52 = vpop.xlane.xlu0 %3293 }
 0x8d1   : > { %v8039_v57 = vsub.f32 %v7927_v27, %v3321_v22  ;;  %v3322_v4 = vmul.f32 0.015625, %v3294_v52 }
 0x8d2   : > { %v3297_v19 = vpop.xlane.xlu1 %3296 }
 0x8d3   : > { %v8042_v53 = vsub.f32 %v7935_v56, %v3322_v4  ;;  %v3323_v31 = vmul.f32 0.015625, %v3297_v19  ;;  %v3353_v33 = vmul.f32 %v8039_v57, %v8039_v57 }
 0x8d4   : > { %v3300_v20 = vpop.xlane.xlu0 %3299 }
 0x8d5   : > { %v8047_v34 = vsub.f32 %v7932_v7, %v3323_v31  ;;  %v3324_v14 = vmul.f32 0.015625, %v3300_v20  ;;  %v3385_v48 = vsel %vm1927_vm12, %v3353_v33, 0.0  ;;  %v3354_v27 = vmul.f32 %v8042_v53, %v8042_v53  ;;  %v5668_v7 = vld [vmem:[%s8976_s29 + $0x74] ss:$8 sps:$4 sm:$0xff]  }
 0x8d6   : > { %3386 = vadd.xlane.f32.xlu1 %v3385_v48  ;;  %3617 = vmatprep.subr.bf16.mxu0 %v5668_v7 }
 0x8d7   : > { %v8053_v36 = vsub.f32 %v7940_v43, %v3324_v14  ;;  %v3388_v56 = vsel %vm1927_vm12, %v3354_v27, 0.0  ;;  %v3355_v10 = vmul.f32 %v8047_v34, %v8047_v34  ;;  %v5666_v43 = vld [vmem:[%s8976_s29 + $0x70] ss:$8 sps:$4 sm:$0xff]  }
 0x8d8   : > { %3389 = vadd.xlane.f32.xlu0 %v3388_v56  ;;  %3618 = vmatpush1.bf16.msra.mxu0 %v5666_v43 }
 0x8d9   : > { %v3391_v46 = vsel %vm1927_vm12, %v3355_v10, 0.0  ;;  %v3356_v30 = vmul.f32 %v8053_v36, %v8053_v36 }
 0x8da   : > { %3392 = vadd.xlane.f32.xlu1 %v3391_v46  ;;  %v8128_v46 = vld [vmem:[%s8977_s5 + $0x1] ss:$0 sm:$0xff] }
 0x8db   : > { %v3394_v32 = vsel %vm1927_vm12, %v3356_v30, 0.0 }
 0x8dc   : > { %3395 = vadd.xlane.f32.xlu0 %v3394_v32 }
 0x8e1   : > { %v3303_v44 = vpop.xlane.xlu1 %3302 }
 0x8e2   : > { %v3325_v58 = vmul.f32 0.015625, %v3303_v44 }
 0x8e3   : > { %v3306_v6 = vpop.xlane.xlu0 %3305 }
 0x8e4   : > { %v8069_v15 = vsub.f32 %v7951_v0, %v3325_v58  ;;  %v3326_v5 = vmul.f32 0.015625, %v3306_v6 }
 0x8e5   : > { %v3309_v25 = vpop.xlane.xlu1 %3308 }
 0x8e6   : > { %v8072_v13 = vsub.f32 %v7959_v55, %v3326_v5  ;;  %v3327_v47 = vmul.f32 0.015625, %v3309_v25  ;;  %v3357_v16 = vmul.f32 %v8069_v15, %v8069_v15 }
 0x8e7   : > { %v3312_v35 = vpop.xlane.xlu0 %3311 }
 0x8e8   : > { %v8077_v21 = vsub.f32 %v7956_v26, %v3327_v47  ;;  %v3328_v2 = vmul.f32 0.015625, %v3312_v35  ;;  %v3397_v8 = vsel %vm1927_vm12, %v3357_v16, 0.0  ;;  %v3358_v0 = vmul.f32 %v8072_v13, %v8072_v13  ;;  %v8136_v47 = vld [vmem:[%s8978_s1 + $0x1] ss:$0 sm:$0xff] }
 0x8e9   : > { %3398 = vadd.xlane.f32.xlu1 %v3397_v8 }
 0x8ea   : > { %v8083_v60 = vsub.f32 %v7964_v38, %v3328_v2  ;;  %v3400_v55 = vsel %vm1927_vm12, %v3358_v0, 0.0  ;;  %v3359_v49 = vmul.f32 %v8077_v21, %v8077_v21  ;;  %v5669_v38 = vld [vmem:[%s8874_s13 + $0xc0] sm:$0xff]  }
 0x8eb   : > { %3401 = vadd.xlane.f32.xlu0 %v3400_v55  ;;  %5408 = vmatprep.subr.bf16.mxu1 %v5669_v38 }
 0x8ec   : > { %v3403_v62 = vsel %vm1927_vm12, %v3359_v49, 0.0  ;;  %v3360_v26 = vmul.f32 %v8083_v60, %v8083_v60  ;;  %5409 = vmatpush3.bf16.msra.mxu1 %v5670_v59 }
 0x8ed   : > { %3404 = vadd.xlane.f32.xlu1 %v3403_v62  ;;  %5410 = vmatprep.subr.bf16.mxu1 %v5671_v17 }
 0x8ee   : > { %v3406_v54 = vsel %vm1927_vm12, %v3360_v26, 0.0 }
 0x8ef   : > { %3407 = vadd.xlane.f32.xlu0 %v3406_v54 }
 0x8f0   : > { %5411 = vmatpush3.bf16.msra.mxu1 %v5672_v12 }
 0x8f1   : > { %5412 = vmatprep.subr.bf16.mxu1 %v5673_v3 }
 0x8f4   : > { %5413 = vmatpush3.bf16.msra.mxu1 %v5674_v37 }
 0x8f5   : > { %5414 = vmatprep.subr.bf16.mxu1 %v5675_v1 }
 0x8f8   : > { %5415 = vmatpush3.bf16.msra.mxu1 %v5676_v24 }
 0x8f9   : > { %5416 = vmatprep.subr.bf16.mxu1 %v5677_v9 }
 0x8fc   : > { %5417 = vmatpush3.bf16.msra.mxu1 %v5678_v51 }
 0x8fd   : > { %5418 = vmatprep.subr.bf16.mxu1 %v5679_v41 }
 0x943   : > { %v3363_v22 = vpop.xlane.xlu1 %3362 }
 0x944   : > { %v3409_v52 = vmul.f32 0.015625, %v3363_v22 }
 0x945   : > { %v3366_v4 = vpop.xlane.xlu0 %3365 }
 0x946   : > { %v3425_v19 = vadd.f32 1e-05, %v3409_v52  ;;  %v3410_v31 = vmul.f32 0.015625, %v3366_v4 }
 0x947   : > { %v3369_v33 = vpop.xlane.xlu1 %3368 }
 0x948   : > { %5813 = vrsqrt.f32 %v3425_v19  ;;  %v3426_v20 = vadd.f32 1e-05, %v3410_v31  ;;  %v3411_v14 = vmul.f32 0.015625, %v3369_v33 }
 0x949   : > { %v3372_v48 = vpop.xlane.xlu0 %3371 }
 0x94a   : > { %5815 = vrsqrt.f32 %v3426_v20  ;;  %v3427_v27 = vadd.f32 1e-05, %v3411_v14  ;;  %v3412_v56 = vmul.f32 0.015625, %v3372_v48 }
 0x94c   : > { %5817 = vrsqrt.f32 %v3427_v27  ;;  %v3428_v10 = vadd.f32 1e-05, %v3412_v56 }
 0x94e   : > { %5819 = vrsqrt.f32 %v3428_v10 }
 0x952   : > { %v5814_v7 = vpop.eup %5813 }
 0x953   : > { %v3457_v30 = vmul.f32 %v5814_v7, %v7991_v63  ;;  %v3375_v43 = vpop.xlane.xlu1 %3374 }
 0x954   : > { %v5816_v32 = vpop.eup %5815  ;;  %v3413_v44 = vmul.f32 0.015625, %v3375_v43 }
 0x955   : > { %v3479_v58 = vmul.f32 %v8128_v46, %v3457_v30  ;;  %v3458_v6 = vmul.f32 %v5816_v32, %v7994_v39  ;;  %v3378_v5 = vpop.xlane.xlu0 %3377 }
 0x956   : > { %v5818_v25 = vpop.eup %5817  ;;  %v3429_v16 = vadd.f32 1e-05, %v3413_v44  ;;  %v3414_v35 = vmul.f32 0.015625, %v3378_v5 }
 0x957   : > { %v3480_v2 = vmul.f32 %v8128_v46, %v3458_v6  ;;  %v3381_v8 = vpop.xlane.xlu1 %3380  ;;  %v8140_v49 = vadd.f32 %v8136_v47, %v3479_v58  ;;  %v3459_v26 = vmul.f32 %v5818_v25, %v7999_v29 }
 0x958   : > { %v5820_v63 = vpop.eup %5819  ;;  %5821 = vrsqrt.f32 %v3429_v16  ;;  %v3430_v0 = vadd.f32 1e-05, %v3414_v35  ;;  %v3415_v55 = vmul.f32 0.015625, %v3381_v8 }
 0x959   : > { %v8143_v39 = vadd.f32 %v8136_v47, %v3480_v2  ;;  %v3384_v62 = vpop.xlane.xlu0 %3383  ;;  %v3460_v54 = vmul.f32 %v5820_v63, %v8005_v18  ;;  %v3481_v37 = vmul.f32 %v8128_v46, %v3459_v26 }
 0x95a   : > { %5823 = vrsqrt.f32 %v3430_v0  ;;  %v3431_v38 = vadd.f32 1e-05, %v3415_v55  ;;  %v3416_v59 = vmul.f32 0.015625, %v3384_v62 }
 0x95b   : > { %v3517_v17 = vpack.c.bf16 %v8143_v39, %v8140_v49  ;;  %v3482_v12 = vmul.f32 %v8128_v46, %v3460_v54  ;;  %v8157_v18 = vadd.f32 %v8136_v47, %v3481_v37 }
 0x95c   : > { %5825 = vrsqrt.f32 %v3431_v38  ;;  %v3432_v3 = vadd.f32 1e-05, %v3416_v59 }
 0x95d   : > { %5211 = vmatmul.mubr.msk.bf16.vlgmr.msra.gmra.mrb[64].mxu0 %vm1927_vm12, %v3517_v17  ;;  %v8154_v29 = vadd.f32 %v8136_v47, %v3482_v12 }
 0x95e   : > { %5827 = vrsqrt.f32 %v3432_v3  ;;  %3653 = vmatprep.mubr.bf16.mxu0 %v8979_v61 }
 0x95f   : > { %v3518_v9 = vpack.c.bf16 %v8154_v29, %v8157_v18 }
 0x962   : > { %v5822_v1 = vpop.eup %5821 }
 0x963   : > { %v3387_v24 = vpop.xlane.xlu1 %3386  ;;  %v3461_v51 = vmul.f32 %v5822_v1, %v8015_v28 }
 0x964   : > { %v5824_v41 = vpop.eup %5823  ;;  %v3417_v22 = vmul.f32 0.015625, %v3387_v24 }
 0x965   : > { %5212 = vmatmul.mubr.msk.bf16.gmra.mrb[68].mxu0 %vm1927_vm12, %v3518_v9  ;;  %v3390_v52 = vpop.xlane.xlu0 %3389  ;;  %v3462_v4 = vmul.f32 %v5824_v41, %v8018_v40  ;;  %v3483_v19 = vmul.f32 %v8128_v46, %v3461_v51 }
 0x966   : > { %v5826_v31 = vpop.eup %5825  ;;  %v3433_v33 = vadd.f32 1e-05, %v3417_v22  ;;  %v3418_v20 = vmul.f32 0.015625, %v3390_v52  ;;  %3663 = vmatprep.mubr.bf16.mxu0 %v8979_v61 }
 0x967   : > { %v3393_v14 = vpop.xlane.xlu1 %3392  ;;  %v3484_v48 = vmul.f32 %v8128_v46, %v3462_v4  ;;  %v8168_v7 = vadd.f32 %v8136_v47, %v3483_v19  ;;  %v3463_v30 = vmul.f32 %v5826_v31, %v8023_v42 }
 0x968   : > { %v5828_v27 = vpop.eup %5827  ;;  %5829 = vrsqrt.f32 %v3433_v33  ;;  %v3434_v28 = vadd.f32 1e-05, %v3418_v20  ;;  %v3419_v56 = vmul.f32 0.015625, %v3393_v14 }
 0x969   : > { %v3396_v10 = vpop.xlane.xlu0 %3395  ;;  %v8171_v40 = vadd.f32 %v8136_v47, %v3484_v48  ;;  %v3464_v43 = vmul.f32 %v5828_v27, %v8029_v23  ;;  %v3485_v25 = vmul.f32 %v8128_v46, %v3463_v30 }
 0x96a   : > { %5831 = vrsqrt.f32 %v3434_v28  ;;  %v3435_v32 = vadd.f32 1e-05, %v3419_v56  ;;  %v3420_v44 = vmul.f32 0.015625, %v3396_v10 }
 0x96b   : > { %v3519_v58 = vpack.c.bf16 %v8171_v40, %v8168_v7  ;;  %v3486_v6 = vmul.f32 %v8128_v46, %v3464_v43  ;;  %v8185_v23 = vadd.f32 %v8136_v47, %v3485_v25 }
 0x96c   : > { %5833 = vrsqrt.f32 %v3435_v32  ;;  %v3436_v5 = vadd.f32 1e-05, %v3420_v44 }
 0x96d   : > { %5213 = vmatmul.mubr.msk.bf16.gmra.mrb[72].mxu0 %vm1927_vm12, %v3519_v58  ;;  %v8182_v42 = vadd.f32 %v8136_v47, %v3486_v6 }
 0x96e   : > { %5835 = vrsqrt.f32 %v3436_v5  ;;  %3673 = vmatprep.mubr.bf16.mxu0 %v8979_v61 }
 0x96f   : > { %v3520_v35 = vpack.c.bf16 %v8182_v42, %v8185_v23 }
 0x972   : > { %v5830_v16 = vpop.eup %5829 }
 0x973   : > { %v3465_v2 = vmul.f32 %v5830_v16, %v8039_v57  ;;  %v5684_v16 = vld [vmem:[%s8874_s13 + $0xb8] sm:$0xff]  }
 0x974   : > { %v5832_v8 = vpop.eup %5831 }
 0x975   : > { %5214 = vmatmul.mubr.msk.bf16.gmra.mrb[76].mxu0 %vm1927_vm12, %v3520_v35  ;;  %v3466_v63 = vmul.f32 %v5832_v8, %v8042_v53  ;;  %v3487_v0 = vmul.f32 %v8128_v46, %v3465_v2  ;;  %v5202_v35 = vld [vmem:[%s8873_s12 + $0x2] sm:$0x3] }
 0x976   : > { %v5834_v55 = vpop.eup %5833  ;;  %v3399_v62 = vpop.xlane.xlu1 %3398  ;;  %3683 = vmatprep.mubr.bf16.mxu0 %v8979_v61  ;;  %v8266_v2 = vrot.slane %v5202_v35, %v2340_v45  ;;  %v8270_v8 = vrot.slane %v5202_v35, %v2344_v11 }
 0x977   : > { %v3421_v26 = vmul.f32 0.015625, %v3399_v62  ;;  %v3488_v54 = vmul.f32 %v8128_v46, %v3466_v63  ;;  %v8196_v17 = vadd.f32 %v8136_v47, %v3487_v0  ;;  %v3467_v57 = vmul.f32 %v5834_v55, %v8047_v34 }
 0x978   : > { %v5836_v38 = vpop.eup %5835  ;;  %v3402_v59 = vpop.xlane.xlu0 %3401 }
 0x979   : > { %v3437_v12 = vadd.f32 1e-05, %v3421_v26  ;;  %v3422_v3 = vmul.f32 0.015625, %v3402_v59  ;;  %v8200_v53 = vadd.f32 %v8136_v47, %v3488_v54  ;;  %v3468_v37 = vmul.f32 %v5836_v38, %v8053_v36 }
 0x97a   : > { %v3405_v1 = vpop.xlane.xlu1 %3404  ;;  %v3489_v4 = vmul.f32 %v8128_v46, %v3467_v57 }
 0x97b   : > { %5837 = vrsqrt.f32 %v3437_v12  ;;  %v3438_v24 = vadd.f32 1e-05, %v3422_v3  ;;  %v3423_v9 = vmul.f32 0.015625, %v3405_v1  ;;  %v3521_v51 = vpack.c.bf16 %v8200_v53, %v8196_v17 }
 0x97c   : > { %v3408_v41 = vpop.xlane.xlu0 %3407  ;;  %v3490_v22 = vmul.f32 %v8128_v46, %v3468_v37  ;;  %v8213_v31 = vadd.f32 %v8136_v47, %v3489_v4 }
 0x97d   : > { %5839 = vrsqrt.f32 %v3438_v24  ;;  %v3439_v52 = vadd.f32 1e-05, %v3423_v9  ;;  %v3424_v34 = vmul.f32 0.015625, %v3408_v41  ;;  %5215 = vmatmul.mubr.msk.bf16.gmra.mrb[80].mxu0 %vm1927_vm12, %v3521_v51 }
 0x97e   : > { %3693 = vmatprep.mubr.bf16.mxu0 %v8979_v61  ;;  %v8210_v19 = vadd.f32 %v8136_v47, %v3490_v22 }
 0x97f   : > { %5841 = vrsqrt.f32 %v3439_v52  ;;  %v3440_v36 = vadd.f32 1e-05, %v3424_v34 }
 0x980   : > { %v3522_v33 = vpack.c.bf16 %v8210_v19, %v8213_v31 }
 0x981   : > { %5843 = vrsqrt.f32 %v3440_v36 }
 0x985   : > { %v5838_v20 = vpop.eup %5837  ;;  %5216 = vmatmul.mubr.msk.bf16.gmra.mrb[84].mxu0 %vm1927_vm12, %v3522_v33 }
 0x986   : > { %3703 = vmatprep.mubr.bf16.mxu0 %v8979_v61  ;;  %v3469_v14 = vmul.f32 %v5838_v20, %v8069_v15 }
 0x987   : > { %v5840_v48 = vpop.eup %5839 }
 0x988   : > { %v3470_v27 = vmul.f32 %v5840_v48, %v8072_v13  ;;  %v3491_v28 = vmul.f32 %v8128_v46, %v3469_v14 }
 0x989   : > { %v5842_v56 = vpop.eup %5841 }
 0x98a   : > { %v3492_v10 = vmul.f32 %v8128_v46, %v3470_v27  ;;  %v8224_v43 = vadd.f32 %v8136_v47, %v3491_v28  ;;  %v3471_v44 = vmul.f32 %v5842_v56, %v8077_v21 }
 0x98b   : > { %v5844_v30 = vpop.eup %5843 }
 0x98c   : > { %v8227_v32 = vadd.f32 %v8136_v47, %v3492_v10  ;;  %v3472_v58 = vmul.f32 %v5844_v30, %v8083_v60  ;;  %v3493_v6 = vmul.f32 %v8128_v46, %v3471_v44  ;;  %v5680_v60 = vld [vmem:[%s8874_s13 + $0xa8] sm:$0xff]  }
 0x98d   : > { %5419 = vmatpush3.bf16.msra.mxu1 %v5680_v60 }
 0x98e   : > { %v3523_v15 = vpack.c.bf16 %v8227_v32, %v8224_v43  ;;  %v3494_v13 = vmul.f32 %v8128_v46, %v3472_v58  ;;  %v8241_v25 = vadd.f32 %v8136_v47, %v3493_v6  ;;  %v5682_v46 = vld [vmem:[%s8874_s13 + $0xb0] sm:$0xff]  }
 0x990   : > { %5217 = vmatmul.mubr.msk.bf16.gmra.mrb[88].mxu0 %vm1927_vm12, %v3523_v15  ;;  %v8238_v5 = vadd.f32 %v8136_v47, %v3494_v13  ;;  %v5683_v47 = vld [vmem:[%s8874_s13 + $0xf8] sm:$0xff]  }
 0x991   : > { %3713 = vmatprep.mubr.bf16.mxu0 %v8979_v61  ;;  %v5681_v61 = vld [vmem:[%s8874_s13 + $0xf0] sm:$0xff]  }
 0x992   : > { %v3524_v21 = vpack.c.bf16 %v8238_v5, %v8241_v25  ;;  %5420 = vmatprep.subr.bf16.mxu1 %v5681_v61 }
 0x993   : > { %5421 = vmatpush3.bf16.msra.mxu1 %v5682_v46 }
 0x994   : > { %5422 = vmatprep.subr.bf16.mxu1 %v5683_v47 }
 0x997   : > { %5423 = vmatpush3.bf16.msra.mxu1 %v5684_v16 }
 0x998   : > { %5218 = vmatmul.mubr.msk.bf16.gmra.mrb[92].mxu0 %vm1927_vm12, %v3524_v21 }
 0xa30   : > { %v3645_v63 = vpop.f32.mrb[64].mxu0 }
 0xa31   : > { %v3646_v0 = vadd.f32 %v3645_v63, %v8266_v2  ;;  %v3647_v55 = vpop.f32.mrb[65].mxu0 }
 0xa32   : > { %v3648_v62 = vadd.f32 %v3647_v55, %v8270_v8  ;;  %v3649_v26 = vpop.f32.mrb[66].mxu0 }
 0xa33   : > { %v3650_v54 = vadd.f32 %v3649_v26, %v8266_v2  ;;  %v3651_v38 = vpop.f32.mrb[67].mxu0  ;;  %v3724_v57 = vmax.f32 %v3646_v0, 0.0 }
 0xa34   : > { %v3652_v59 = vadd.f32 %v3651_v38, %v8270_v8  ;;  %v3725_v45 = vmax.f32 %v3648_v62, 0.0 }
 0xa35   : > { %v3726_v12 = vmax.f32 %v3650_v54, 0.0 }
 0xa36   : > { %v3727_v3 = vmax.f32 %v3652_v59, 0.0 }
 0xa37   : > { %v3756_v37 = vpack.c.bf16 %v3726_v12, %v3724_v57 }
 0xa38   : > { %v3757_v50 = vpack.c.bf16 %v3727_v3, %v3725_v45  ;;  %v3655_v11 = vpop.f32.mrb[68].mxu0 }
 0xa39   : > { %v3656_v1 = vadd.f32 %v3655_v11, %v8266_v2  ;;  %v3657_v24 = vpop.f32.mrb[69].mxu0 }
 0xa3a   : > { %v3658_v9 = vadd.f32 %v3657_v24, %v8270_v8  ;;  %v3659_v51 = vpop.f32.mrb[70].mxu0  ;;  %3941 = vmatprep.mubr.bf16.mxu1 %v3757_v50 }
 0xa3b   : > { %v3660_v41 = vadd.f32 %v3659_v51, %v8266_v2  ;;  %v3661_v22 = vpop.f32.mrb[71].mxu0  ;;  %3942 = vmatmul.mubr.bf16.vlgmr.msra.gmra.mrb[64].mxu1 %v3756_v37  ;;  %v3728_v34 = vmax.f32 %v3656_v1, 0.0 }
 0xa3c   : > { %v3662_v52 = vadd.f32 %v3661_v22, %v8270_v8  ;;  %v3729_v36 = vmax.f32 %v3658_v9, 0.0 }
 0xa3d   : > { %v3730_v4 = vmax.f32 %v3660_v41, 0.0 }
 0xa3e   : > { %v3731_v33 = vmax.f32 %v3662_v52, 0.0 }
 0xa3f   : > { %v3758_v20 = vpack.c.bf16 %v3730_v4, %v3728_v34 }
 0xa40   : > { %v3759_v14 = vpack.c.bf16 %v3731_v33, %v3729_v36  ;;  %v3665_v48 = vpop.f32.mrb[72].mxu0 }
 0xa41   : > { %v3666_v27 = vadd.f32 %v3665_v48, %v8266_v2  ;;  %v3667_v28 = vpop.f32.mrb[73].mxu0 }
 0xa42   : > { %v3668_v56 = vadd.f32 %v3667_v28, %v8270_v8  ;;  %v3669_v10 = vpop.f32.mrb[74].mxu0  ;;  %3949 = vmatprep.mubr.bf16.mxu1 %v3759_v14 }
 0xa43   : > { %v3670_v30 = vadd.f32 %v3669_v10, %v8266_v2  ;;  %v3671_v44 = vpop.f32.mrb[75].mxu0  ;;  %3950 = vmatmul.mubr.bf16.gmra.mrb[68].mxu1 %v3758_v20  ;;  %v3732_v15 = vmax.f32 %v3666_v27, 0.0 }
 0xa44   : > { %v3672_v58 = vadd.f32 %v3671_v44, %v8270_v8  ;;  %v3733_v6 = vmax.f32 %v3668_v56, 0.0 }
 0xa45   : > { %v3734_v13 = vmax.f32 %v3670_v30, 0.0 }
 0xa46   : > { %v3735_v21 = vmax.f32 %v3672_v58, 0.0 }
 0xa47   : > { %v3760_v60 = vpack.c.bf16 %v3734_v13, %v3732_v15 }
 0xa48   : > { %v3761_v61 = vpack.c.bf16 %v3735_v21, %v3733_v6  ;;  %v3675_v46 = vpop.f32.mrb[76].mxu0 }
 0xa49   : > { %v3676_v47 = vadd.f32 %v3675_v46, %v8266_v2  ;;  %v3677_v16 = vpop.f32.mrb[77].mxu0 }
 0xa4a   : > { %v3678_v35 = vadd.f32 %v3677_v16, %v8270_v8  ;;  %v3679_v63 = vpop.f32.mrb[78].mxu0  ;;  %3957 = vmatprep.mubr.bf16.mxu1 %v3761_v61 }
 0xa4b   : > { %v3680_v0 = vadd.f32 %v3679_v63, %v8266_v2  ;;  %v3681_v55 = vpop.f32.mrb[79].mxu0  ;;  %3958 = vmatmul.mubr.bf16.gmra.mrb[72].mxu1 %v3760_v60  ;;  %v3736_v26 = vmax.f32 %v3676_v47, 0.0 }
 0xa4c   : > { %v3682_v62 = vadd.f32 %v3681_v55, %v8270_v8  ;;  %v3737_v38 = vmax.f32 %v3678_v35, 0.0 }
 0xa4d   : > { %v3738_v54 = vmax.f32 %v3680_v0, 0.0 }
 0xa4e   : > { %v3739_v59 = vmax.f32 %v3682_v62, 0.0 }
 0xa4f   : > { %v3762_v57 = vpack.c.bf16 %v3738_v54, %v3736_v26 }
 0xa50   : > { %v3763_v12 = vpack.c.bf16 %v3739_v59, %v3737_v38  ;;  %v3685_v45 = vpop.f32.mrb[80].mxu0 }
 0xa51   : > { %v3686_v3 = vadd.f32 %v3685_v45, %v8266_v2  ;;  %v3687_v37 = vpop.f32.mrb[81].mxu0 }
 0xa52   : > { %v3688_v50 = vadd.f32 %v3687_v37, %v8270_v8  ;;  %v3689_v11 = vpop.f32.mrb[82].mxu0  ;;  %3965 = vmatprep.mubr.bf16.mxu1 %v3763_v12 }
 0xa53   : > { %v3690_v1 = vadd.f32 %v3689_v11, %v8266_v2  ;;  %v3691_v24 = vpop.f32.mrb[83].mxu0  ;;  %3966 = vmatmul.mubr.bf16.gmra.mrb[76].mxu1 %v3762_v57  ;;  %v3740_v51 = vmax.f32 %v3686_v3, 0.0 }
 0xa54   : > { %v3692_v9 = vadd.f32 %v3691_v24, %v8270_v8  ;;  %v3741_v22 = vmax.f32 %v3688_v50, 0.0 }
 0xa55   : > { %v3742_v41 = vmax.f32 %v3690_v1, 0.0 }
 0xa56   : > { %v3743_v52 = vmax.f32 %v3692_v9, 0.0 }
 0xa57   : > { %v3764_v34 = vpack.c.bf16 %v3742_v41, %v3740_v51 }
 0xa58   : > { %v3765_v4 = vpack.c.bf16 %v3743_v52, %v3741_v22  ;;  %v3695_v36 = vpop.f32.mrb[84].mxu0  ;;  %v8307_v52 = vld [vmem:[%s8875_s14 + $0x1] ss:$0 sm:$0xff] }
 0xa59   : > { %v3696_v33 = vadd.f32 %v3695_v36, %v8266_v2  ;;  %v3697_v20 = vpop.f32.mrb[85].mxu0 }
 0xa5a   : > { %v3698_v14 = vadd.f32 %v3697_v20, %v8270_v8  ;;  %v3699_v48 = vpop.f32.mrb[86].mxu0  ;;  %3973 = vmatprep.mubr.bf16.mxu1 %v3765_v4 }
 0xa5b   : > { %v3700_v27 = vadd.f32 %v3699_v48, %v8266_v2  ;;  %v3701_v28 = vpop.f32.mrb[87].mxu0  ;;  %3974 = vmatmul.mubr.bf16.gmra.mrb[80].mxu1 %v3764_v34  ;;  %v3744_v10 = vmax.f32 %v3696_v33, 0.0 }
 0xa5c   : > { %v3702_v56 = vadd.f32 %v3701_v28, %v8270_v8  ;;  %v3745_v44 = vmax.f32 %v3698_v14, 0.0 }
 0xa5d   : > { %v3746_v30 = vmax.f32 %v3700_v27, 0.0 }
 0xa5e   : > { %v3747_v58 = vmax.f32 %v3702_v56, 0.0 }
 0xa5f   : > { %v3766_v15 = vpack.c.bf16 %v3746_v30, %v3744_v10 }
 0xa60   : > { %v3767_v13 = vpack.c.bf16 %v3747_v58, %v3745_v44 }
 0xa62   : > { %3981 = vmatprep.mubr.bf16.mxu1 %v3767_v13 }
 0xa63   : > { %v3705_v6 = vpop.f32.mrb[88].mxu0  ;;  %3982 = vmatmul.mubr.bf16.gmra.mrb[84].mxu1 %v3766_v15 }
 0xa64   : > { %v3706_v21 = vadd.f32 %v3705_v6, %v8266_v2  ;;  %v3707_v60 = vpop.f32.mrb[89].mxu0 }
 0xa65   : > { %v3708_v61 = vadd.f32 %v3707_v60, %v8270_v8  ;;  %v3709_v46 = vpop.f32.mrb[90].mxu0 }
 0xa66   : > { %v3710_v47 = vadd.f32 %v3709_v46, %v8266_v2  ;;  %v3711_v16 = vpop.f32.mrb[91].mxu0  ;;  %v3748_v63 = vmax.f32 %v3706_v21, 0.0 }
 0xa67   : > { %v3712_v35 = vadd.f32 %v3711_v16, %v8270_v8  ;;  %v3749_v55 = vmax.f32 %v3708_v61, 0.0 }
 0xa68   : > { %v3750_v0 = vmax.f32 %v3710_v47, 0.0 }
 0xa69   : > { %v3751_v62 = vmax.f32 %v3712_v35, 0.0 }
 0xa6a   : > { %v3768_v26 = vpack.c.bf16 %v3750_v0, %v3748_v63 }
 0xa6b   : > { %v3769_v54 = vpack.c.bf16 %v3751_v62, %v3749_v55  ;;  %v3715_v38 = vpop.f32.mrb[92].mxu0 }
 0xa6c   : > { %v3716_v59 = vadd.f32 %v3715_v38, %v8266_v2  ;;  %v3717_v57 = vpop.f32.mrb[93].mxu0 }
 0xa6d   : > { %v3718_v12 = vadd.f32 %v3717_v57, %v8270_v8  ;;  %v3719_v45 = vpop.f32.mrb[94].mxu0  ;;  %3989 = vmatprep.mubr.bf16.mxu1 %v3769_v54 }
 0xa6e   : > { %v3720_v3 = vadd.f32 %v3719_v45, %v8266_v2  ;;  %v3721_v37 = vpop.f32.mrb[95].mxu0  ;;  %3990 = vmatmul.mubr.bf16.gmra.mrb[88].mxu1 %v3768_v26  ;;  %v3752_v11 = vmax.f32 %v3716_v59, 0.0 }
 0xa6f   : > { %v3722_v50 = vadd.f32 %v3721_v37, %v8270_v8  ;;  %v3753_v24 = vmax.f32 %v3718_v12, 0.0 }
 0xa70   : > { %v3754_v1 = vmax.f32 %v3720_v3, 0.0 }
 0xa71   : > { %v3755_v9 = vmax.f32 %v3722_v50, 0.0 }
 0xa72   : > { %v3770_v51 = vpack.c.bf16 %v3754_v1, %v3752_v11 }
 0xa73   : > { %v3771_v41 = vpack.c.bf16 %v3755_v9, %v3753_v24 }
 0xa75   : > { %3997 = vmatprep.mubr.bf16.mxu1 %v3771_v41 }
 0xa76   : > { %3998 = vmatmul.mubr.bf16.gmra.mrb[92].mxu1 %v3770_v51 }
 0xb0e   : > { %v5424_v22 = vpop.f32.mrb[64].mxu1 }
 0xb0f   : > { %v5425_v34 = vpop.f32.mrb[65].mxu1 }
 0xb10   : > { %v5426_v2 = vadd.f32 %v5425_v34, %v5424_v22  ;;  %v5427_v4 = vpop.f32.mrb[66].mxu1 }
 0xb11   : > { %v5428_v36 = vpop.f32.mrb[67].mxu1 }
 0xb12   : > { %v3944_v8 = vadd.f32 %v5426_v2, %v8307_v52  ;;  %v5429_v33 = vadd.f32 %v5428_v36, %v5427_v4 }
 0xb14   : > { %v3947_v20 = vadd.f32 %v5429_v33, %v8307_v52  ;;  %v8312_v14 = vadd.f32 %v3944_v8, %v8140_v49 }
 0xb16   : > { %v5430_v48 = vpop.f32.mrb[68].mxu1  ;;  %v4026_v27 = vsel %vm1927_vm12, %v8312_v14, 0.0  ;;  %v8317_v28 = vadd.f32 %v3947_v20, %v8143_v39 }
 0xb17   : > { %4027 = vadd.xlane.f32.xlu1 %v4026_v27  ;;  %v5431_v56 = vpop.f32.mrb[69].mxu1 }
 0xb18   : > { %v5432_v10 = vadd.f32 %v5431_v56, %v5430_v48  ;;  %v5433_v30 = vpop.f32.mrb[70].mxu1  ;;  %v4029_v44 = vsel %vm1927_vm12, %v8317_v28, 0.0 }
 0xb19   : > { %4030 = vadd.xlane.f32.xlu0 %v4029_v44  ;;  %v5434_v58 = vpop.f32.mrb[71].mxu1 }
 0xb1a   : > { %v3952_v15 = vadd.f32 %v5432_v10, %v8307_v52  ;;  %v5435_v49 = vadd.f32 %v5434_v58, %v5433_v30 }
 0xb1c   : > { %v3955_v13 = vadd.f32 %v5435_v49, %v8307_v52  ;;  %v8324_v6 = vadd.f32 %v3952_v15, %v8157_v18 }
 0xb1e   : > { %v5436_v21 = vpop.f32.mrb[72].mxu1  ;;  %v4032_v39 = vsel %vm1927_vm12, %v8324_v6, 0.0  ;;  %v8329_v60 = vadd.f32 %v3955_v13, %v8154_v29 }
 0xb1f   : > { %4033 = vadd.xlane.f32.xlu1 %v4032_v39  ;;  %v5437_v61 = vpop.f32.mrb[73].mxu1 }
 0xb20   : > { %v5438_v46 = vadd.f32 %v5437_v61, %v5436_v21  ;;  %v5439_v47 = vpop.f32.mrb[74].mxu1  ;;  %v4035_v16 = vsel %vm1927_vm12, %v8329_v60, 0.0 }
 0xb21   : > { %4036 = vadd.xlane.f32.xlu0 %v4035_v16  ;;  %v5440_v35 = vpop.f32.mrb[75].mxu1 }
 0xb22   : > { %v3960_v63 = vadd.f32 %v5438_v46, %v8307_v52  ;;  %v5441_v18 = vadd.f32 %v5440_v35, %v5439_v47 }
 0xb24   : > { %v3963_v0 = vadd.f32 %v5441_v18, %v8307_v52  ;;  %v8336_v55 = vadd.f32 %v3960_v63, %v8168_v7 }
 0xb26   : > { %v5442_v62 = vpop.f32.mrb[76].mxu1  ;;  %v4038_v29 = vsel %vm1927_vm12, %v8336_v55, 0.0  ;;  %v8341_v26 = vadd.f32 %v3963_v0, %v8171_v40 }
 0xb27   : > { %4039 = vadd.xlane.f32.xlu1 %v4038_v29  ;;  %v5443_v54 = vpop.f32.mrb[77].mxu1 }
 0xb28   : > { %v5444_v38 = vadd.f32 %v5443_v54, %v5442_v62  ;;  %v5445_v59 = vpop.f32.mrb[78].mxu1  ;;  %v4041_v57 = vsel %vm1927_vm12, %v8341_v26, 0.0 }
 0xb29   : > { %4042 = vadd.xlane.f32.xlu0 %v4041_v57  ;;  %v5446_v12 = vpop.f32.mrb[79].mxu1 }
 0xb2a   : > { %v3968_v45 = vadd.f32 %v5444_v38, %v8307_v52  ;;  %v5447_v7 = vadd.f32 %v5446_v12, %v5445_v59 }
 0xb2c   : > { %v3971_v3 = vadd.f32 %v5447_v7, %v8307_v52  ;;  %v8348_v37 = vadd.f32 %v3968_v45, %v8185_v23 }
 0xb2e   : > { %v5448_v50 = vpop.f32.mrb[80].mxu1  ;;  %v4044_v40 = vsel %vm1927_vm12, %v8348_v37, 0.0  ;;  %v8353_v11 = vadd.f32 %v3971_v3, %v8182_v42 }
 0xb2f   : > { %4045 = vadd.xlane.f32.xlu1 %v4044_v40  ;;  %v5449_v1 = vpop.f32.mrb[81].mxu1 }
 0xb30   : > { %v5450_v24 = vadd.f32 %v5449_v1, %v5448_v50  ;;  %v5451_v9 = vpop.f32.mrb[82].mxu1  ;;  %v4047_v51 = vsel %vm1927_vm12, %v8353_v11, 0.0 }
 0xb31   : > { %4048 = vadd.xlane.f32.xlu0 %v4047_v51  ;;  %v5452_v41 = vpop.f32.mrb[83].mxu1 }
 0xb32   : > { %v3976_v22 = vadd.f32 %v5450_v24, %v8307_v52  ;;  %v5453_v23 = vadd.f32 %v5452_v41, %v5451_v9 }
 0xb34   : > { %v3979_v34 = vadd.f32 %v5453_v23, %v8307_v52  ;;  %v8360_v2 = vadd.f32 %v3976_v22, %v8196_v17 }
 0xb36   : > { %v5454_v4 = vpop.f32.mrb[84].mxu1  ;;  %v4050_v42 = vsel %vm1927_vm12, %v8360_v2, 0.0  ;;  %v8365_v36 = vadd.f32 %v3979_v34, %v8200_v53 }
 0xb37   : > { %4051 = vadd.xlane.f32.xlu1 %v4050_v42  ;;  %v5455_v8 = vpop.f32.mrb[85].mxu1 }
 0xb38   : > { %v5456_v33 = vadd.f32 %v5455_v8, %v5454_v4  ;;  %v5457_v20 = vpop.f32.mrb[86].mxu1  ;;  %v4053_v48 = vsel %vm1927_vm12, %v8365_v36, 0.0 }
 0xb39   : > { %4054 = vadd.xlane.f32.xlu0 %v4053_v48  ;;  %v5458_v27 = vpop.f32.mrb[87].mxu1 }
 0xb3a   : > { %v3984_v56 = vadd.f32 %v5456_v33, %v8307_v52  ;;  %v5459_v17 = vadd.f32 %v5458_v27, %v5457_v20 }
 0xb3c   : > { %v3987_v10 = vadd.f32 %v5459_v17, %v8307_v52  ;;  %v8372_v30 = vadd.f32 %v3984_v56, %v8213_v31 }
 0xb3e   : > { %v4056_v53 = vsel %vm1927_vm12, %v8372_v30, 0.0  ;;  %v8377_v44 = vadd.f32 %v3987_v10, %v8210_v19 }
 0xb3f   : > { %4057 = vadd.xlane.f32.xlu1 %v4056_v53 }
 0xb40   : > { %v4059_v58 = vsel %vm1927_vm12, %v8377_v44, 0.0 }
 0xb41   : > { %4060 = vadd.xlane.f32.xlu0 %v4059_v58  ;;  %v5460_v15 = vpop.f32.mrb[88].mxu1 }
 0xb42   : > { %v5461_v49 = vpop.f32.mrb[89].mxu1 }
 0xb43   : > { %v5462_v13 = vadd.f32 %v5461_v49, %v5460_v15  ;;  %v5463_v21 = vpop.f32.mrb[90].mxu1 }
 0xb44   : > { %v5464_v39 = vpop.f32.mrb[91].mxu1 }
 0xb45   : > { %v3992_v61 = vadd.f32 %v5462_v13, %v8307_v52  ;;  %v5465_v31 = vadd.f32 %v5464_v39, %v5463_v21 }
 0xb47   : > { %v3995_v46 = vadd.f32 %v5465_v31, %v8307_v52  ;;  %v8384_v47 = vadd.f32 %v3992_v61, %v8224_v43 }
 0xb49   : > { %v5466_v19 = vpop.f32.mrb[92].mxu1  ;;  %v4062_v16 = vsel %vm1927_vm12, %v8384_v47, 0.0  ;;  %v8389_v35 = vadd.f32 %v3995_v46, %v8227_v32 }
 0xb4a   : > { %4063 = vadd.xlane.f32.xlu1 %v4062_v16  ;;  %v5467_v63 = vpop.f32.mrb[93].mxu1 }
 0xb4b   : > { %v5468_v18 = vadd.f32 %v5467_v63, %v5466_v19  ;;  %v5469_v0 = vpop.f32.mrb[94].mxu1  ;;  %v4065_v62 = vsel %vm1927_vm12, %v8389_v35, 0.0 }
 0xb4c   : > { %4066 = vadd.xlane.f32.xlu0 %v4065_v62  ;;  %v5470_v29 = vpop.f32.mrb[95].mxu1 }
 0xb4d   : > { %v4000_v54 = vadd.f32 %v5468_v18, %v8307_v52  ;;  %v5471_v43 = vadd.f32 %v5470_v29, %v5469_v0 }
 0xb4f   : > { %v4003_v38 = vadd.f32 %v5471_v43, %v8307_v52  ;;  %v8396_v59 = vadd.f32 %v4000_v54, %v8241_v25 }
 0xb51   : > { %v4068_v32 = vsel %vm1927_vm12, %v8396_v59, 0.0  ;;  %v8401_v57 = vadd.f32 %v4003_v38, %v8238_v5 }
 0xb52   : > { %4069 = vadd.xlane.f32.xlu1 %v4068_v32 }
 0xb53   : > { %v4071_v12 = vsel %vm1927_vm12, %v8401_v57, 0.0 }
 0xb54   : > { %4072 = vadd.xlane.f32.xlu0 %v4071_v12 }
 0xba4   : > { %v4028_v45 = vpop.xlane.xlu1 %4027 }
 0xba5   : > { %v4074_v7 = vmul.f32 0.015625, %v4028_v45 }
 0xba6   : > { %v4031_v3 = vpop.xlane.xlu0 %4030 }
 0xba7   : > { %v8406_v50 = vsub.f32 %v8312_v14, %v4074_v7  ;;  %v4075_v52 = vmul.f32 0.015625, %v4031_v3 }
 0xba9   : > { %v8409_v25 = vsub.f32 %v8317_v28, %v4075_v52  ;;  %v4106_v40 = vmul.f32 %v8406_v50, %v8406_v50 }
 0xbab   : > { %v4122_v5 = vsel %vm1927_vm12, %v4106_v40, 0.0  ;;  %v4107_v1 = vmul.f32 %v8409_v25, %v8409_v25 }
 0xbac   : > { %v4034_v24 = vpop.xlane.xlu1 %4033  ;;  %4123 = vadd.xlane.f32.xlu1 %v4122_v5 }
 0xbad   : > { %v4076_v9 = vmul.f32 0.015625, %v4034_v24  ;;  %v4125_v51 = vsel %vm1927_vm12, %v4107_v1, 0.0 }
 0xbae   : > { %4126 = vadd.xlane.f32.xlu0 %v4125_v51  ;;  %v4037_v14 = vpop.xlane.xlu0 %4036 }
 0xbaf   : > { %v8418_v41 = vsub.f32 %v8324_v6, %v4076_v9  ;;  %v4077_v28 = vmul.f32 0.015625, %v4037_v14 }
 0xbb1   : > { %v8421_v22 = vsub.f32 %v8329_v60, %v4077_v28  ;;  %v4108_v23 = vmul.f32 %v8418_v41, %v8418_v41 }
 0xbb3   : > { %v4128_v34 = vsel %vm1927_vm12, %v4108_v23, 0.0  ;;  %v4109_v4 = vmul.f32 %v8421_v22, %v8421_v22 }
 0xbb4   : > { %v4040_v42 = vpop.xlane.xlu1 %4039  ;;  %4129 = vadd.xlane.f32.xlu1 %v4128_v34 }
 0xbb5   : > { %v4078_v8 = vmul.f32 0.015625, %v4040_v42  ;;  %v4131_v33 = vsel %vm1927_vm12, %v4109_v4, 0.0 }
 0xbb6   : > { %4132 = vadd.xlane.f32.xlu0 %v4131_v33  ;;  %v4043_v6 = vpop.xlane.xlu0 %4042 }
 0xbb7   : > { %v8430_v20 = vsub.f32 %v8336_v55, %v4078_v8  ;;  %v4079_v60 = vmul.f32 0.015625, %v4043_v6 }
 0xbb9   : > { %v8433_v48 = vsub.f32 %v8341_v26, %v4079_v60  ;;  %v4110_v27 = vmul.f32 %v8430_v20, %v8430_v20 }
 0xbbb   : > { %v4134_v56 = vsel %vm1927_vm12, %v4110_v27, 0.0  ;;  %v4111_v17 = vmul.f32 %v8433_v48, %v8433_v48 }
 0xbbc   : > { %v4046_v10 = vpop.xlane.xlu1 %4045  ;;  %4135 = vadd.xlane.f32.xlu1 %v4134_v56 }
 0xbbd   : > { %v4080_v53 = vmul.f32 0.015625, %v4046_v10  ;;  %v4137_v58 = vsel %vm1927_vm12, %v4111_v17, 0.0 }
 0xbbe   : > { %4138 = vadd.xlane.f32.xlu0 %v4137_v58  ;;  %v4049_v55 = vpop.xlane.xlu0 %4048 }
 0xbbf   : > { %v8442_v15 = vsub.f32 %v8348_v37, %v4080_v53  ;;  %v4081_v26 = vmul.f32 0.015625, %v4049_v55 }
 0xbc1   : > { %v8445_v49 = vsub.f32 %v8353_v11, %v4081_v26  ;;  %v4112_v13 = vmul.f32 %v8442_v15, %v8442_v15 }
 0xbc3   : > { %v4140_v21 = vsel %vm1927_vm12, %v4112_v13, 0.0  ;;  %v4113_v39 = vmul.f32 %v8445_v49, %v8445_v49 }
 0xbc4   : > { %v4052_v61 = vpop.xlane.xlu1 %4051  ;;  %4141 = vadd.xlane.f32.xlu1 %v4140_v21  ;;  %v8504_v21 = vld [vmem:[%s8876_s15 + $0x1] ss:$0 sm:$0xff] }
 0xbc5   : > { %v4082_v31 = vmul.f32 0.015625, %v4052_v61  ;;  %v4143_v46 = vsel %vm1927_vm12, %v4113_v39, 0.0 }
 0xbc6   : > { %4144 = vadd.xlane.f32.xlu0 %v4143_v46  ;;  %v4055_v37 = vpop.xlane.xlu0 %4054 }
 0xbc7   : > { %v8454_v19 = vsub.f32 %v8360_v2, %v4082_v31  ;;  %v4083_v11 = vmul.f32 0.015625, %v4055_v37  ;;  %v8510_v37 = vld [vmem:[%s8877_s16 + $0x1] ss:$0 sm:$0xff] }
 0xbc9   : > { %v8457_v16 = vsub.f32 %v8365_v36, %v4083_v11  ;;  %v4114_v63 = vmul.f32 %v8454_v19, %v8454_v19 }
 0xbcb   : > { %v4146_v18 = vsel %vm1927_vm12, %v4114_v63, 0.0  ;;  %v4115_v0 = vmul.f32 %v8457_v16, %v8457_v16 }
 0xbcc   : > { %v4058_v62 = vpop.xlane.xlu1 %4057  ;;  %4147 = vadd.xlane.f32.xlu1 %v4146_v18 }
 0xbcd   : > { %v4084_v29 = vmul.f32 0.015625, %v4058_v62  ;;  %v4149_v54 = vsel %vm1927_vm12, %v4115_v0, 0.0 }
 0xbce   : > { %4150 = vadd.xlane.f32.xlu0 %v4149_v54  ;;  %v4061_v2 = vpop.xlane.xlu0 %4060 }
 0xbcf   : > { %v8466_v43 = vsub.f32 %v8372_v30, %v4084_v29  ;;  %v4085_v36 = vmul.f32 0.015625, %v4061_v2  ;;  %v8517_v29 = vld [vmem:[%s8878_s17] ss:$0 sm:$0xff] }
 0xbd1   : > { %v8469_v38 = vsub.f32 %v8377_v44, %v4085_v36  ;;  %v4116_v32 = vmul.f32 %v8466_v43, %v8466_v43 }
 0xbd3   : > { %v4152_v12 = vsel %vm1927_vm12, %v4116_v32, 0.0  ;;  %v4117_v45 = vmul.f32 %v8469_v38, %v8469_v38 }
 0xbd4   : > { %4153 = vadd.xlane.f32.xlu1 %v4152_v12 }
 0xbd5   : > { %v4155_v7 = vsel %vm1927_vm12, %v4117_v45, 0.0 }
 0xbd6   : > { %4156 = vadd.xlane.f32.xlu0 %v4155_v7 }
 0xbd7   : > { %v4064_v3 = vpop.xlane.xlu1 %4063 }
 0xbd8   : > { %v4086_v52 = vmul.f32 0.015625, %v4064_v3 }
 0xbd9   : > { %v4067_v30 = vpop.xlane.xlu0 %4066 }
 0xbda   : > { %v8478_v40 = vsub.f32 %v8384_v47, %v4086_v52  ;;  %v4087_v44 = vmul.f32 0.015625, %v4067_v30 }
 0xbdc   : > { %v8481_v5 = vsub.f32 %v8389_v35, %v4087_v44  ;;  %v4118_v1 = vmul.f32 %v8478_v40, %v8478_v40 }
 0xbde   : > { %v4158_v24 = vsel %vm1927_vm12, %v4118_v1, 0.0  ;;  %v4119_v9 = vmul.f32 %v8481_v5, %v8481_v5 }
 0xbdf   : > { %4159 = vadd.xlane.f32.xlu1 %v4158_v24  ;;  %v4070_v51 = vpop.xlane.xlu1 %4069 }
 0xbe0   : > { %v4088_v14 = vmul.f32 0.015625, %v4070_v51  ;;  %v4161_v28 = vsel %vm1927_vm12, %v4119_v9, 0.0 }
 0xbe1   : > { %4162 = vadd.xlane.f32.xlu0 %v4161_v28  ;;  %v4073_v47 = vpop.xlane.xlu0 %4072 }
 0xbe2   : > { %v8490_v23 = vsub.f32 %v8396_v59, %v4088_v14  ;;  %v4089_v35 = vmul.f32 0.015625, %v4073_v47 }
 0xbe4   : > { %v8493_v34 = vsub.f32 %v8401_v57, %v4089_v35  ;;  %v4120_v4 = vmul.f32 %v8490_v23, %v8490_v23 }
 0xbe6   : > { %v4164_v42 = vsel %vm1927_vm12, %v4120_v4, 0.0  ;;  %v4121_v8 = vmul.f32 %v8493_v34, %v8493_v34 }
 0xbe7   : > { %4165 = vadd.xlane.f32.xlu1 %v4164_v42 }
 0xbe8   : > { %v4167_v33 = vsel %vm1927_vm12, %v4121_v8, 0.0 }
 0xbe9   : > { %4168 = vadd.xlane.f32.xlu0 %v4167_v33 }
 0xc39   : > { %v4124_v6 = vpop.xlane.xlu1 %4123 }
 0xc3a   : > { %v4170_v60 = vmul.f32 0.015625, %v4124_v6 }
 0xc3b   : > { %v4127_v59 = vpop.xlane.xlu0 %4126 }
 0xc3c   : > { %v4186_v27 = vadd.f32 1e-05, %v4170_v60  ;;  %v4171_v56 = vmul.f32 0.015625, %v4127_v59 }
 0xc3e   : > { %5845 = vrsqrt.f32 %v4186_v27  ;;  %v4187_v57 = vadd.f32 1e-05, %v4171_v56 }
 0xc40   : > { %5847 = vrsqrt.f32 %v4187_v57 }
 0xc41   : > { %v4130_v17 = vpop.xlane.xlu1 %4129 }
 0xc42   : > { %v4172_v10 = vmul.f32 0.015625, %v4130_v17 }
 0xc43   : > { %v4133_v53 = vpop.xlane.xlu0 %4132 }
 0xc44   : > { %v4188_v58 = vadd.f32 1e-05, %v4172_v10  ;;  %v4173_v55 = vmul.f32 0.015625, %v4133_v53 }
 0xc46   : > { %5849 = vrsqrt.f32 %v4188_v58  ;;  %v4189_v26 = vadd.f32 1e-05, %v4173_v55 }
 0xc48   : > { %v5846_v13 = vpop.eup %5845  ;;  %5851 = vrsqrt.f32 %v4189_v26 }
 0xc49   : > { %v4136_v39 = vpop.xlane.xlu1 %4135  ;;  %v4218_v61 = vmul.f32 %v5846_v13, %v8406_v50 }
 0xc4a   : > { %v5848_v31 = vpop.eup %5847  ;;  %v4174_v46 = vmul.f32 0.015625, %v4136_v39 }
 0xc4b   : > { %v4139_v11 = vpop.xlane.xlu0 %4138  ;;  %v4240_v63 = vmul.f32 %v8504_v21, %v4218_v61  ;;  %v4219_v18 = vmul.f32 %v5848_v31, %v8409_v25 }
 0xc4c   : > { %v4190_v0 = vadd.f32 1e-05, %v4174_v46  ;;  %v4175_v62 = vmul.f32 0.015625, %v4139_v11 }
 0xc4d   : > { %v4262_v50 = vadd.f32 %v8510_v37, %v4240_v63  ;;  %v4241_v54 = vmul.f32 %v8504_v21, %v4219_v18 }
 0xc4e   : > { %5853 = vrsqrt.f32 %v4190_v0  ;;  %v4191_v2 = vadd.f32 1e-05, %v4175_v62 }
 0xc4f   : > { %v4285_v36 = vmul.f32 %v8517_v29, %v4262_v50  ;;  %v4263_v32 = vadd.f32 %v8510_v37, %v4241_v54 }
 0xc50   : > { %v5850_v12 = vpop.eup %5849  ;;  %5855 = vrsqrt.f32 %v4191_v2 }
 0xc51   : > { %v4142_v25 = vpop.xlane.xlu1 %4141  ;;  %v4301_v45 = vsel %vm1927_vm12, %v4285_v36, 0.0  ;;  %v4286_v7 = vmul.f32 %v8517_v29, %v4263_v32  ;;  %v4220_v3 = vmul.f32 %v5850_v12, %v8418_v41 }
 0xc52   : > { %v5852_v52 = vpop.eup %5851  ;;  %v4176_v30 = vmul.f32 0.015625, %v4142_v25  ;;  %4302 = vadd.xlane.f32.xlu1 %v4301_v45 }
 0xc53   : > { %v4145_v44 = vpop.xlane.xlu0 %4144  ;;  %v4304_v1 = vsel %vm1927_vm12, %v4286_v7, 0.0  ;;  %v4242_v24 = vmul.f32 %v8504_v21, %v4220_v3  ;;  %v4221_v9 = vmul.f32 %v5852_v52, %v8421_v22 }
 0xc54   : > { %v4192_v51 = vadd.f32 1e-05, %v4176_v30  ;;  %v4177_v14 = vmul.f32 0.015625, %v4145_v44  ;;  %4305 = vadd.xlane.f32.xlu0 %v4304_v1 }
 0xc55   : > { %v4264_v28 = vadd.f32 %v8510_v37, %v4242_v24  ;;  %v4243_v47 = vmul.f32 %v8504_v21, %v4221_v9 }
 0xc56   : > { %5857 = vrsqrt.f32 %v4192_v51  ;;  %v4193_v35 = vadd.f32 1e-05, %v4177_v14 }
 0xc57   : > { %v4287_v41 = vmul.f32 %v8517_v29, %v4264_v28  ;;  %v4265_v4 = vadd.f32 %v8510_v37, %v4243_v47 }
 0xc58   : > { %v5854_v42 = vpop.eup %5853  ;;  %5859 = vrsqrt.f32 %v4193_v35 }
 0xc59   : > { %v4148_v8 = vpop.xlane.xlu1 %4147  ;;  %v4307_v33 = vsel %vm1927_vm12, %v4287_v41, 0.0  ;;  %v4288_v22 = vmul.f32 %v8517_v29, %v4265_v4  ;;  %v4222_v6 = vmul.f32 %v5854_v42, %v8430_v20 }
 0xc5a   : > { %v5856_v60 = vpop.eup %5855  ;;  %v4178_v59 = vmul.f32 0.015625, %v4148_v8  ;;  %4308 = vadd.xlane.f32.xlu1 %v4307_v33 }
 0xc5b   : > { %v4151_v27 = vpop.xlane.xlu0 %4150  ;;  %v4310_v56 = vsel %vm1927_vm12, %v4288_v22, 0.0  ;;  %v4244_v57 = vmul.f32 %v8504_v21, %v4222_v6  ;;  %v4223_v17 = vmul.f32 %v5856_v60, %v8433_v48 }
 0xc5c   : > { %v4194_v10 = vadd.f32 1e-05, %v4178_v59  ;;  %v4179_v53 = vmul.f32 0.015625, %v4151_v27  ;;  %4311 = vadd.xlane.f32.xlu0 %v4310_v56 }
 0xc5d   : > { %v4266_v58 = vadd.f32 %v8510_v37, %v4244_v57  ;;  %v4245_v55 = vmul.f32 %v8504_v21, %v4223_v17 }
 0xc5e   : > { %5861 = vrsqrt.f32 %v4194_v10  ;;  %v4195_v26 = vadd.f32 1e-05, %v4179_v53 }
 0xc5f   : > { %v4289_v20 = vmul.f32 %v8517_v29, %v4266_v58  ;;  %v4267_v13 = vadd.f32 %v8510_v37, %v4245_v55 }
 0xc60   : > { %v5858_v39 = vpop.eup %5857  ;;  %5863 = vrsqrt.f32 %v4195_v26 }
 0xc61   : > { %v4154_v61 = vpop.xlane.xlu1 %4153  ;;  %v4313_v31 = vsel %vm1927_vm12, %v4289_v20, 0.0  ;;  %v4290_v48 = vmul.f32 %v8517_v29, %v4267_v13  ;;  %v4224_v46 = vmul.f32 %v5858_v39, %v8442_v15 }
 0xc62   : > { %v5860_v11 = vpop.eup %5859  ;;  %v4180_v63 = vmul.f32 0.015625, %v4154_v61  ;;  %4314 = vadd.xlane.f32.xlu1 %v4313_v31 }
 0xc63   : > { %v4157_v18 = vpop.xlane.xlu0 %4156  ;;  %v4316_v0 = vsel %vm1927_vm12, %v4290_v48, 0.0  ;;  %v4246_v62 = vmul.f32 %v8504_v21, %v4224_v46  ;;  %v4225_v50 = vmul.f32 %v5860_v11, %v8445_v49 }
 0xc64   : > { %v4196_v54 = vadd.f32 1e-05, %v4180_v63  ;;  %v4181_v2 = vmul.f32 0.015625, %v4157_v18  ;;  %4317 = vadd.xlane.f32.xlu0 %v4316_v0 }
 0xc65   : > { %v4268_v36 = vadd.f32 %v8510_v37, %v4246_v62  ;;  %v4247_v32 = vmul.f32 %v8504_v21, %v4225_v50 }
 0xc66   : > { %5865 = vrsqrt.f32 %v4196_v54  ;;  %v4197_v12 = vadd.f32 1e-05, %v4181_v2 }
 0xc67   : > { %v4291_v15 = vmul.f32 %v8517_v29, %v4268_v36  ;;  %v4269_v25 = vadd.f32 %v8510_v37, %v4247_v32 }
 0xc68   : > { %v5862_v45 = vpop.eup %5861  ;;  %5867 = vrsqrt.f32 %v4197_v12 }
 0xc69   : > { %v4319_v7 = vsel %vm1927_vm12, %v4291_v15, 0.0  ;;  %v4292_v3 = vmul.f32 %v8517_v29, %v4269_v25  ;;  %v4226_v49 = vmul.f32 %v5862_v45, %v8454_v19 }
 0xc6a   : > { %v5864_v52 = vpop.eup %5863  ;;  %4320 = vadd.xlane.f32.xlu1 %v4319_v7 }
 0xc6b   : > { %v4322_v30 = vsel %vm1927_vm12, %v4292_v3, 0.0  ;;  %v4248_v44 = vmul.f32 %v8504_v21, %v4226_v49  ;;  %v4227_v1 = vmul.f32 %v5864_v52, %v8457_v16  ;;  %v5274_v49 = vld [vmem:[#allocation3] ss:$0 sm:$0xff] }
 0xc6c   : > { %v4160_v24 = vpop.xlane.xlu1 %4159  ;;  %4323 = vadd.xlane.f32.xlu0 %v4322_v30 }
 0xc6d   : > { %v4182_v9 = vmul.f32 0.015625, %v4160_v24  ;;  %v4270_v51 = vadd.f32 %v8510_v37, %v4248_v44  ;;  %v4249_v14 = vmul.f32 %v8504_v21, %v4227_v1 }
 0xc6e   : > { %v4163_v28 = vpop.xlane.xlu0 %4162 }
 0xc6f   : > { %v4198_v47 = vadd.f32 1e-05, %v4182_v9  ;;  %v4183_v35 = vmul.f32 0.015625, %v4163_v28  ;;  %v4293_v19 = vmul.f32 %v8517_v29, %v4270_v51  ;;  %v4271_v41 = vadd.f32 %v8510_v37, %v4249_v14 }
 0xc70   : > { %v5866_v4 = vpop.eup %5865 }
 0xc71   : > { %5869 = vrsqrt.f32 %v4198_v47  ;;  %v4199_v42 = vadd.f32 1e-05, %v4183_v35  ;;  %v4325_v8 = vsel %vm1927_vm12, %v4293_v19, 0.0  ;;  %v4294_v16 = vmul.f32 %v8517_v29, %v4271_v41 }
 0xc72   : > { %v5868_v33 = vpop.eup %5867  ;;  %4326 = vadd.xlane.f32.xlu1 %v4325_v8  ;;  %v4228_v22 = vmul.f32 %v5866_v4, %v8466_v43 }
 0xc73   : > { %5871 = vrsqrt.f32 %v4199_v42  ;;  %v4328_v6 = vsel %vm1927_vm12, %v4294_v16, 0.0  ;;  %v4229_v60 = vmul.f32 %v5868_v33, %v8469_v38 }
 0xc74   : > { %v4166_v59 = vpop.xlane.xlu1 %4165  ;;  %4329 = vadd.xlane.f32.xlu0 %v4328_v6  ;;  %v4250_v27 = vmul.f32 %v8504_v21, %v4228_v22 }
 0xc75   : > { %v4184_v56 = vmul.f32 0.015625, %v4166_v59  ;;  %v4251_v57 = vmul.f32 %v8504_v21, %v4229_v60 }
 0xc76   : > { %v4169_v17 = vpop.xlane.xlu0 %4168  ;;  %v4272_v10 = vadd.f32 %v8510_v37, %v4250_v27 }
 0xc77   : > { %v4200_v53 = vadd.f32 1e-05, %v4184_v56  ;;  %v4185_v58 = vmul.f32 0.015625, %v4169_v17  ;;  %v4273_v55 = vadd.f32 %v8510_v37, %v4251_v57 }
 0xc78   : > { %v4295_v43 = vmul.f32 %v8517_v29, %v4272_v10 }
 0xc79   : > { %5873 = vrsqrt.f32 %v4200_v53  ;;  %v4201_v26 = vadd.f32 1e-05, %v4185_v58  ;;  %v4296_v38 = vmul.f32 %v8517_v29, %v4273_v55  ;;  %v8599_v58 = vld [vmem:[%s8880_s19] ss:$0 sm:$0xff] }
 0xc7a   : > { %v4331_v20 = vsel %vm1927_vm12, %v4295_v43, 0.0  ;;  %v8604_v55 = vld [vmem:[%s8881_s20] ss:$0 sm:$0xff] }
 0xc7b   : > { %v5870_v13 = vpop.eup %5869  ;;  %5875 = vrsqrt.f32 %v4201_v26  ;;  %4332 = vadd.xlane.f32.xlu1 %v4331_v20  ;;  %v4334_v39 = vsel %vm1927_vm12, %v4296_v38, 0.0 }
 0xc7c   : > { %4335 = vadd.xlane.f32.xlu0 %v4334_v39  ;;  %v4230_v61 = vmul.f32 %v5870_v13, %v8478_v40  ;;  %v8612_v39 = vld [vmem:[%s8882_s21] ss:$0 sm:$0xff] }
 0xc7d   : > { %v5872_v31 = vpop.eup %5871 }
 0xc7e   : > { %v4252_v48 = vmul.f32 %v8504_v21, %v4230_v61  ;;  %v4231_v46 = vmul.f32 %v5872_v31, %v8481_v5 }
 0xc80   : > { %v4274_v11 = vadd.f32 %v8510_v37, %v4252_v48  ;;  %v4253_v63 = vmul.f32 %v8504_v21, %v4231_v46 }
 0xc82   : > { %v4297_v18 = vmul.f32 %v8517_v29, %v4274_v11  ;;  %v4275_v0 = vadd.f32 %v8510_v37, %v4253_v63 }
 0xc83   : > { %v5874_v62 = vpop.eup %5873 }
 0xc84   : > { %v4337_v50 = vsel %vm1927_vm12, %v4297_v18, 0.0  ;;  %v4298_v54 = vmul.f32 %v8517_v29, %v4275_v0  ;;  %v4232_v40 = vmul.f32 %v5874_v62, %v8490_v23 }
 0xc85   : > { %v5876_v2 = vpop.eup %5875  ;;  %4338 = vadd.xlane.f32.xlu1 %v4337_v50 }
 0xc86   : > { %v4340_v36 = vsel %vm1927_vm12, %v4298_v54, 0.0  ;;  %v4254_v5 = vmul.f32 %v8504_v21, %v4232_v40  ;;  %v4233_v32 = vmul.f32 %v5876_v2, %v8493_v34 }
 0xc87   : > { %4341 = vadd.xlane.f32.xlu0 %v4340_v36 }
 0xc88   : > { %v4276_v12 = vadd.f32 %v8510_v37, %v4254_v5  ;;  %v4255_v15 = vmul.f32 %v8504_v21, %v4233_v32 }
 0xc8a   : > { %v4299_v25 = vmul.f32 %v8517_v29, %v4276_v12  ;;  %v4277_v45 = vadd.f32 %v8510_v37, %v4255_v15 }
 0xc8c   : > { %v4343_v7 = vsel %vm1927_vm12, %v4299_v25, 0.0  ;;  %v4300_v23 = vmul.f32 %v8517_v29, %v4277_v45 }
 0xc8d   : > { %4344 = vadd.xlane.f32.xlu1 %v4343_v7 }
 0xc8e   : > { %v4346_v3 = vsel %vm1927_vm12, %v4300_v23, 0.0 }
 0xc8f   : > { %4347 = vadd.xlane.f32.xlu0 %v4346_v3 }
 0xcdf   : > { %v4303_v52 = vpop.xlane.xlu1 %4302 }
 0xce0   : > { %v4356_v34 = vadd.f32 %v5274_v49, %v4303_v52 }
 0xce1   : > { %v4306_v30 = vpop.xlane.xlu0 %4305 }
 0xce2   : > { %v4357_v44 = vadd.f32 %v5274_v49, %v4306_v30  ;;  %4375 = vperm.xlu1 %5612, %v4356_v34  }
 0xce4   : > { %4380 = vperm.xlu0 %5611, %v4357_v44  }
 0xce7   : > { %v4309_v21 = vpop.xlane.xlu1 %4308 }
 0xce8   : > { %v4358_v1 = vadd.f32 %v5274_v49, %v4309_v21 }
 0xce9   : > { %v4312_v24 = vpop.xlane.xlu0 %4311 }
 0xcea   : > { %4385 = vperm.xlu1 %5612, %v4358_v1   ;;  %v4359_v37 = vadd.f32 %v5274_v49, %v4312_v24 }
 0xcee   : > { %4390 = vperm.xlu1 %5612, %v4359_v37  }
 0xcef   : > { %v4315_v9 = vpop.xlane.xlu1 %4314 }
 0xcf0   : > { %v4360_v51 = vadd.f32 %v5274_v49, %v4315_v9 }
 0xcf1   : > { %v4318_v29 = vpop.xlane.xlu0 %4317 }
 0xcf2   : > { %v4361_v14 = vadd.f32 %v5274_v49, %v4318_v29  ;;  %4395 = vperm.xlu0 %5611, %v4360_v51  }
 0xcf4   : > { %4400 = vperm.xlu1 %5612, %v4361_v14  }
 0xcf7   : > { %v4321_v28 = vpop.xlane.xlu1 %4320 }
 0xcf8   : > { %v4362_v47 = vadd.f32 %v5274_v49, %v4321_v28 }
 0xcf9   : > { %v4324_v35 = vpop.xlane.xlu0 %4323 }
 0xcfa   : > { %v4363_v19 = vadd.f32 %v5274_v49, %v4324_v35  ;;  %4405 = vperm.xlu0 %5611, %v4362_v47  }
 0xcfc   : > { %4410 = vperm.xlu1 %5612, %v4363_v19  }
 0xcff   : > { %v4327_v41 = vpop.xlane.xlu1 %4326 }
 0xd00   : > { %v4364_v4 = vadd.f32 %v5274_v49, %v4327_v41 }
 0xd01   : > { %v4330_v42 = vpop.xlane.xlu0 %4329 }
 0xd02   : > { %v4365_v8 = vadd.f32 %v5274_v49, %v4330_v42  ;;  %4415 = vperm.xlu0 %5611, %v4364_v4  }
 0xd04   : > { %4420 = vperm.xlu1 %5612, %v4365_v8  }
 0xd08   : > { %v4333_v16 = vpop.xlane.xlu1 %4332 }
 0xd09   : > { %v4366_v33 = vadd.f32 %v5274_v49, %v4333_v16  ;;  %v4336_v22 = vpop.xlane.xlu0 %4335 }
 0xd0a   : > { %v4367_v6 = vadd.f32 %v5274_v49, %v4336_v22 }
 0xd0b   : > { %4425 = vperm.xlu0 %5611, %v4366_v33  }
 0xd0c   : > { %4430 = vperm.xlu1 %5612, %v4367_v6  }
 0xd12   : > { %v4339_v60 = vpop.xlane.xlu1 %4338 }
 0xd13   : > { %v4368_v59 = vadd.f32 %v5274_v49, %v4339_v60 }
 0xd14   : > { %v4342_v27 = vpop.xlane.xlu0 %4341 }
 0xd15   : > { %v4369_v56 = vadd.f32 %v5274_v49, %v4342_v27  ;;  %4435 = vperm.xlu0 %5611, %v4368_v59  }
 0xd17   : > { %4440 = vperm.xlu1 %5612, %v4369_v56  }
 0xd1a   : > { %v4345_v57 = vpop.xlane.xlu1 %4344 }
 0xd1b   : > { %v4370_v17 = vadd.f32 %v5274_v49, %v4345_v57 }
 0xd1c   : > { %v4348_v10 = vpop.xlane.xlu0 %4347 }
 0xd1d   : > { %v4371_v53 = vadd.f32 %v5274_v49, %v4348_v10  ;;  %4445 = vperm.xlu0 %5611, %v4370_v17  }
 0xd1f   : > { %4450 = vperm.xlu1 %5612, %v4371_v53  }
 0xd61   : > { %v4376_v43 = vpop.permute.xlu1 %4375 }
 0xd62   : > { %v4459_v26 = vmul.f32 %v8599_v58, %v4376_v43 }
 0xd63   : > { %v4381_v38 = vpop.permute.xlu0 %4380 }
 0xd64   : > { %v4482_v20 = vadd.f32 %v8604_v55, %v4459_v26  ;;  %v4460_v13 = vmul.f32 %v8599_v58, %v4381_v38 }
 0xd66   : > { %v4498_v61 = vmax.f32 %v4482_v20, 0.0  ;;  %v4483_v31 = vadd.f32 %v8604_v55, %v4460_v13 }
 0xd68   : > { %v4499_v48 = vmax.f32 %v4483_v31, 0.0  ;;  %v4521_v46 = vmul.f32 %v8612_v39, %v4498_v61 }
 0xd69   : > { %v4386_v11 = vpop.permute.xlu1 %4385 }
 0xd6a   : > { %v4461_v63 = vmul.f32 %v8599_v58, %v4386_v11  ;;  %v4538_v18 = vsel %vm4537_vm15, %v4521_v46, 0.0  ;;  %v4522_v0 = vmul.f32 %v8612_v39, %v4499_v48 }
 0xd6b   : > { %4539 = vadd.xlane.f32.xlu0 %v4538_v18 }
 0xd6c   : > { %v4484_v62 = vadd.f32 %v8604_v55, %v4461_v63  ;;  %v4541_v50 = vsel %vm4537_vm15, %v4522_v0, 0.0 }
 0xd6d   : > { %v4391_v54 = vpop.permute.xlu1 %4390  ;;  %4542 = vadd.xlane.f32.xlu1 %v4541_v50 }
 0xd6e   : > { %v4500_v40 = vmax.f32 %v4484_v62, 0.0  ;;  %v4462_v2 = vmul.f32 %v8599_v58, %v4391_v54 }
 0xd70   : > { %v4485_v36 = vadd.f32 %v8604_v55, %v4462_v2  ;;  %v4523_v5 = vmul.f32 %v8612_v39, %v4500_v40 }
 0xd71   : > { %v4396_v32 = vpop.permute.xlu0 %4395 }
 0xd72   : > { %v4501_v12 = vmax.f32 %v4485_v36, 0.0  ;;  %v4463_v15 = vmul.f32 %v8599_v58, %v4396_v32  ;;  %v4544_v25 = vsel %vm4537_vm15, %v4523_v5, 0.0 }
 0xd73   : > { %4545 = vadd.xlane.f32.xlu0 %v4544_v25  ;;  %v4401_v45 = vpop.permute.xlu1 %4400 }
 0xd74   : > { %v4486_v7 = vadd.f32 %v8604_v55, %v4463_v15  ;;  %v4464_v23 = vmul.f32 %v8599_v58, %v4401_v45  ;;  %v4524_v3 = vmul.f32 %v8612_v39, %v4501_v12 }
 0xd76   : > { %v4502_v49 = vmax.f32 %v4486_v7, 0.0  ;;  %v4487_v52 = vadd.f32 %v8604_v55, %v4464_v23  ;;  %v4547_v34 = vsel %vm4537_vm15, %v4524_v3, 0.0 }
 0xd77   : > { %4548 = vadd.xlane.f32.xlu0 %v4547_v34 }
 0xd78   : > { %v4503_v30 = vmax.f32 %v4487_v52, 0.0  ;;  %v4525_v44 = vmul.f32 %v8612_v39, %v4502_v49 }
 0xd79   : > { %v4406_v21 = vpop.permute.xlu0 %4405 }
 0xd7a   : > { %v4465_v1 = vmul.f32 %v8599_v58, %v4406_v21  ;;  %v4550_v24 = vsel %vm4537_vm15, %v4525_v44, 0.0  ;;  %v4526_v37 = vmul.f32 %v8612_v39, %v4503_v30 }
 0xd7b   : > { %v4411_v9 = vpop.permute.xlu1 %4410  ;;  %4551 = vadd.xlane.f32.xlu1 %v4550_v24  ;;  %v8675_v24 = vld [vmem:[#allocation4] ss:$0 sm:$0xff] }
 0xd7c   : > { %v4488_v51 = vadd.f32 %v8604_v55, %v4465_v1  ;;  %v4466_v29 = vmul.f32 %v8599_v58, %v4411_v9  ;;  %v4553_v14 = vsel %vm4537_vm15, %v4526_v37, 0.0  ;;  %v4611_v9 = vld [vmem:[#allocation2] sm:$0xff] }
 0xd7d   : > { %4554 = vadd.xlane.f32.xlu0 %v4553_v14  ;;  %v4612_v14 = vld [vmem:[#allocation2 + $0x8] sm:$0xff] }
 0xd7e   : > { %v4504_v28 = vmax.f32 %v4488_v51, 0.0  ;;  %v4489_v47 = vadd.f32 %v8604_v55, %v4466_v29 }
 0xd80   : > { %v4505_v35 = vmax.f32 %v4489_v47, 0.0  ;;  %v4527_v19 = vmul.f32 %v8612_v39, %v4504_v28 }
 0xd81   : > { %v4416_v41 = vpop.permute.xlu0 %4415 }
 0xd82   : > { %v4467_v4 = vmul.f32 %v8599_v58, %v4416_v41  ;;  %v4556_v42 = vsel %vm4537_vm15, %v4527_v19, 0.0  ;;  %v4528_v8 = vmul.f32 %v8612_v39, %v4505_v35  ;;  %v4613_v41 = vld [vmem:[#allocation2 + $0x10] sm:$0xff] }
 0xd83   : > { %v4421_v16 = vpop.permute.xlu1 %4420  ;;  %4557 = vadd.xlane.f32.xlu1 %v4556_v42 }
 0xd84   : > { %v4490_v33 = vadd.f32 %v8604_v55, %v4467_v4  ;;  %v4468_v22 = vmul.f32 %v8599_v58, %v4421_v16  ;;  %v4559_v6 = vsel %vm4537_vm15, %v4528_v8, 0.0 }
 0xd85   : > { %4560 = vadd.xlane.f32.xlu0 %v4559_v6 }
 0xd86   : > { %v4506_v60 = vmax.f32 %v4490_v33, 0.0  ;;  %v4491_v59 = vadd.f32 %v8604_v55, %v4468_v22  ;;  %v4614_v33 = vld [vmem:[#allocation2 + $0x18] sm:$0xff] }
 0xd88   : > { %v4507_v27 = vmax.f32 %v4491_v59, 0.0  ;;  %v4529_v56 = vmul.f32 %v8612_v39, %v4506_v60 }
 0xd8a   : > { %v4426_v57 = vpop.permute.xlu0 %4425  ;;  %v4562_v17 = vsel %vm4537_vm15, %v4529_v56, 0.0  ;;  %v4530_v10 = vmul.f32 %v8612_v39, %v4507_v27  ;;  %v4615_v27 = vld [vmem:[#allocation2 + $0x20] sm:$0xff] }
 0xd8b   : > { %v4469_v53 = vmul.f32 %v8599_v58, %v4426_v57  ;;  %v4431_v43 = vpop.permute.xlu1 %4430  ;;  %4563 = vadd.xlane.f32.xlu1 %v4562_v17 }
 0xd8c   : > { %v4470_v26 = vmul.f32 %v8599_v58, %v4431_v43  ;;  %v4565_v38 = vsel %vm4537_vm15, %v4530_v10, 0.0  ;;  %v4616_v10 = vld [vmem:[#allocation2 + $0x28] sm:$0xff] }
 0xd8d   : > { %v4492_v20 = vadd.f32 %v8604_v55, %v4469_v53  ;;  %4566 = vadd.xlane.f32.xlu0 %v4565_v38 }
 0xd8e   : > { %v4493_v13 = vadd.f32 %v8604_v55, %v4470_v26 }
 0xd8f   : > { %v4508_v61 = vmax.f32 %v4492_v20, 0.0 }
 0xd90   : > { %v4509_v31 = vmax.f32 %v4493_v13, 0.0  ;;  %v4617_v13 = vld [vmem:[#allocation2 + $0x30] sm:$0xff] }
 0xd91   : > { %v4531_v48 = vmul.f32 %v8612_v39, %v4508_v61 }
 0xd92   : > { %v4532_v46 = vmul.f32 %v8612_v39, %v4509_v31 }
 0xd93   : > { %v4568_v11 = vsel %vm4537_vm15, %v4531_v48, 0.0 }
 0xd94   : > { %4569 = vadd.xlane.f32.xlu1 %v4568_v11  ;;  %v4436_v63 = vpop.permute.xlu0 %4435  ;;  %v4571_v18 = vsel %vm4537_vm15, %v4532_v46, 0.0  ;;  %v4618_v46 = vld [vmem:[#allocation2 + $0x38] sm:$0xff] }
 0xd95   : > { %v4471_v0 = vmul.f32 %v8599_v58, %v4436_v63  ;;  %4572 = vadd.xlane.f32.xlu0 %v4571_v18 }
 0xd96   : > { %v4441_v62 = vpop.permute.xlu1 %4440 }
 0xd97   : > { %v4494_v50 = vadd.f32 %v8604_v55, %v4471_v0  ;;  %v4472_v54 = vmul.f32 %v8599_v58, %v4441_v62 }
 0xd99   : > { %v4510_v40 = vmax.f32 %v4494_v50, 0.0  ;;  %v4495_v2 = vadd.f32 %v8604_v55, %v4472_v54  ;;  %v4619_v50 = vld [vmem:[#allocation2 + $0x40] sm:$0xff] }
 0xd9b   : > { %v4511_v36 = vmax.f32 %v4495_v2, 0.0  ;;  %v4533_v5 = vmul.f32 %v8612_v39, %v4510_v40 }
 0xd9c   : > { %v4446_v32 = vpop.permute.xlu0 %4445 }
 0xd9d   : > { %v4473_v12 = vmul.f32 %v8599_v58, %v4446_v32  ;;  %v4574_v15 = vsel %vm4537_vm15, %v4533_v5, 0.0  ;;  %v4534_v25 = vmul.f32 %v8612_v39, %v4511_v36  ;;  %v4620_v36 = vld [vmem:[#allocation2 + $0x48] sm:$0xff] }
 0xd9e   : > { %v4451_v45 = vpop.permute.xlu1 %4450  ;;  %4575 = vadd.xlane.f32.xlu1 %v4574_v15 }
 0xd9f   : > { %v4496_v7 = vadd.f32 %v8604_v55, %v4473_v12  ;;  %v4474_v23 = vmul.f32 %v8599_v58, %v4451_v45  ;;  %v4577_v3 = vsel %vm4537_vm15, %v4534_v25, 0.0 }
 0xda0   : > { %4578 = vadd.xlane.f32.xlu0 %v4577_v3 }
 0xda1   : > { %v4512_v49 = vmax.f32 %v4496_v7, 0.0  ;;  %v4497_v52 = vadd.f32 %v8604_v55, %v4474_v23  ;;  %v4621_v7 = vld [vmem:[#allocation2 + $0x50] sm:$0xff] }
 0xda3   : > { %v4513_v34 = vmax.f32 %v4497_v52, 0.0  ;;  %v4535_v30 = vmul.f32 %v8612_v39, %v4512_v49  ;;  %v4622_v49 = vld [vmem:[#allocation2 + $0x58] sm:$0xff] }
 0xda5   : > { %v4580_v44 = vsel %vm4537_vm15, %v4535_v30, 0.0  ;;  %v4536_v21 = vmul.f32 %v8612_v39, %v4513_v34 }
 0xda6   : > { %4581 = vadd.xlane.f32.xlu1 %v4580_v44 }
 0xda7   : > { %v4583_v1 = vsel %vm4537_vm15, %v4536_v21, 0.0 }
 0xda8   : > { %4584 = vadd.xlane.f32.xlu0 %v4583_v1  ;;  %v4623_v1 = vld [vmem:[#allocation2 + $0x60] sm:$0xff] }
 0xdf8   : > { %v4540_v58 = vpop.xlane.xlu0 %4539 }
 0xdf9   : > { %v4593_v37 = vadd.f32 %v8675_v24, %v4540_v58 }
 0xdfa   : > { %v4543_v51 = vpop.xlane.xlu1 %4542 }
 0xdfb   : > { %v4627_v29 = vmul.f32 0.25, %v4593_v37  ;;  %v4594_v55 = vadd.f32 %v8675_v24, %v4543_v51  ;;  %v4624_v51 = vld [vmem:[#allocation2 + $0x68] sm:$0xff] }
 0xdfd   : > { %v4643_v28 = vadd.f32 %v4627_v29, %v4611_v9  ;;  %v4628_v47 = vmul.f32 0.25, %v4594_v55 }
 0xdff   : > { %4660 = vst.msk [vmem:[#allocation2] sm:$0xff] %vm4659_vm8, %v4643_v28  ;;  %v4644_v39 = vadd.f32 %v4628_v47, %v4612_v14  ;;  %4679 = vperm.xlu1 %5612, %v4643_v28  }
 0xe00   : > { %v4546_v35 = vpop.xlane.xlu0 %4545 }
 0xe01   : > { %4661 = vst.msk [vmem:[#allocation2 + $0x8] sm:$0xff] %vm4659_vm8, %v4644_v39  ;;  %v4595_v19 = vadd.f32 %v8675_v24, %v4546_v35  ;;  %4684 = vperm.xlu0 %5611, %v4644_v39   ;;  %v4625_v39 = vld [vmem:[#allocation2 + $0x70] sm:$0xff] }
 0xe03   : > { %v4629_v4 = vmul.f32 0.25, %v4595_v19 }
 0xe04   : > { %v4549_v42 = vpop.xlane.xlu0 %4548 }
 0xe05   : > { %v4645_v8 = vadd.f32 %v4629_v4, %v4613_v41  ;;  %v4596_v16 = vadd.f32 %v8675_v24, %v4549_v42  ;;  %v4626_v4 = vld [vmem:[#allocation2 + $0x78] sm:$0xff] }
 0xe07   : > { %4662 = vst.msk [vmem:[#allocation2 + $0x10] sm:$0xff] %vm4659_vm8, %v4645_v8  ;;  %v4630_v22 = vmul.f32 0.25, %v4596_v16  ;;  %4689 = vperm.xlu1 %5612, %v4645_v8  }
 0xe08   : > { %v4552_v6 = vpop.xlane.xlu1 %4551 }
 0xe09   : > { %v4646_v60 = vadd.f32 %v4630_v22, %v4614_v33  ;;  %v4597_v59 = vadd.f32 %v8675_v24, %v4552_v6  ;;  %v8712_v33 = vld [vmem:[%s8883_s23] ss:$0 sm:$0xff] }
 0xe0a   : > { %v4555_v56 = vpop.xlane.xlu0 %4554  ;;  %v8717_v22 = vld [vmem:[%s8884_s24] ss:$0 sm:$0xff] }
 0xe0b   : > { %4663 = vst.msk [vmem:[#allocation2 + $0x18] sm:$0xff] %vm4659_vm8, %v4646_v60  ;;  %v4631_v57 = vmul.f32 0.25, %v4597_v59  ;;  %v4598_v17 = vadd.f32 %v8675_v24, %v4555_v56  ;;  %4694 = vperm.xlu1 %5612, %v4646_v60   ;;  %v8725_v56 = vld [vmem:[%s8885_s25] ss:$0 sm:$0xff] }
 0xe0d   : > { %v4647_v53 = vadd.f32 %v4631_v57, %v4615_v27  ;;  %v4632_v43 = vmul.f32 0.25, %v4598_v17 }
 0xe0f   : > { %4664 = vst.msk [vmem:[#allocation2 + $0x20] sm:$0xff] %vm4659_vm8, %v4647_v53  ;;  %v4648_v26 = vadd.f32 %v4632_v43, %v4616_v10  ;;  %4699 = vperm.xlu0 %5611, %v4647_v53  }
 0xe10   : > { %v4558_v38 = vpop.xlane.xlu1 %4557 }
 0xe11   : > { %4665 = vst.msk [vmem:[#allocation2 + $0x28] sm:$0xff] %vm4659_vm8, %v4648_v26  ;;  %v4599_v20 = vadd.f32 %v8675_v24, %v4558_v38  ;;  %4704 = vperm.xlu1 %5612, %v4648_v26  }
 0xe12   : > { %v4561_v61 = vpop.xlane.xlu0 %4560 }
 0xe13   : > { %v4633_v31 = vmul.f32 0.25, %v4599_v20  ;;  %v4600_v48 = vadd.f32 %v8675_v24, %v4561_v61 }
 0xe15   : > { %v4649_v11 = vadd.f32 %v4633_v31, %v4617_v13  ;;  %v4634_v63 = vmul.f32 0.25, %v4600_v48 }
 0xe17   : > { %4666 = vst.msk [vmem:[#allocation2 + $0x30] sm:$0xff] %vm4659_vm8, %v4649_v11  ;;  %v4650_v18 = vadd.f32 %v4634_v63, %v4618_v46  ;;  %4709 = vperm.xlu0 %5611, %v4649_v11  }
 0xe18   : > { %v4564_v0 = vpop.xlane.xlu1 %4563 }
 0xe19   : > { %4667 = vst.msk [vmem:[#allocation2 + $0x38] sm:$0xff] %vm4659_vm8, %v4650_v18  ;;  %v4601_v62 = vadd.f32 %v8675_v24, %v4564_v0  ;;  %4714 = vperm.xlu1 %5612, %v4650_v18  }
 0xe1a   : > { %v4567_v54 = vpop.xlane.xlu0 %4566 }
 0xe1b   : > { %v4635_v40 = vmul.f32 0.25, %v4601_v62  ;;  %v4602_v2 = vadd.f32 %v8675_v24, %v4567_v54 }
 0xe1d   : > { %v4651_v5 = vadd.f32 %v4635_v40, %v4619_v50  ;;  %v4636_v32 = vmul.f32 0.25, %v4602_v2 }
 0xe1f   : > { %4668 = vst.msk [vmem:[#allocation2 + $0x40] sm:$0xff] %vm4659_vm8, %v4651_v5  ;;  %v4652_v12 = vadd.f32 %v4636_v32, %v4620_v36  ;;  %4719 = vperm.xlu0 %5611, %v4651_v5  }
 0xe21   : > { %4669 = vst.msk [vmem:[#allocation2 + $0x48] sm:$0xff] %vm4659_vm8, %v4652_v12  ;;  %v4570_v15 = vpop.xlane.xlu1 %4569  ;;  %4724 = vperm.xlu1 %5612, %v4652_v12  }
 0xe22   : > { %v4603_v25 = vadd.f32 %v8675_v24, %v4570_v15  ;;  %v4573_v45 = vpop.xlane.xlu0 %4572 }
 0xe23   : > { %v4604_v23 = vadd.f32 %v8675_v24, %v4573_v45 }
 0xe24   : > { %v4637_v3 = vmul.f32 0.25, %v4603_v25 }
 0xe25   : > { %v4638_v52 = vmul.f32 0.25, %v4604_v23 }
 0xe26   : > { %v4653_v34 = vadd.f32 %v4637_v3, %v4621_v7 }
 0xe27   : > { %v4654_v30 = vadd.f32 %v4638_v52, %v4622_v49 }
 0xe28   : > { %4670 = vst.msk [vmem:[#allocation2 + $0x50] sm:$0xff] %vm4659_vm8, %v4653_v34  ;;  %4729 = vperm.xlu0 %5611, %v4653_v34  }
 0xe29   : > { %4671 = vst.msk [vmem:[#allocation2 + $0x58] sm:$0xff] %vm4659_vm8, %v4654_v30  ;;  %4734 = vperm.xlu1 %5612, %v4654_v30  }
 0xe2b   : > { %v4576_v44 = vpop.xlane.xlu1 %4575 }
 0xe2c   : > { %v4605_v21 = vadd.f32 %v8675_v24, %v4576_v44 }
 0xe2d   : > { %v4579_v58 = vpop.xlane.xlu0 %4578 }
 0xe2e   : > { %v4639_v37 = vmul.f32 0.25, %v4605_v21  ;;  %v4606_v9 = vadd.f32 %v8675_v24, %v4579_v58 }
 0xe30   : > { %v4655_v29 = vadd.f32 %v4639_v37, %v4623_v1  ;;  %v4640_v55 = vmul.f32 0.25, %v4606_v9 }
 0xe32   : > { %4672 = vst.msk [vmem:[#allocation2 + $0x60] sm:$0xff] %vm4659_vm8, %v4655_v29  ;;  %v4656_v14 = vadd.f32 %v4640_v55, %v4624_v51  ;;  %4739 = vperm.xlu0 %5611, %v4655_v29  }
 0xe33   : > { %v4582_v28 = vpop.xlane.xlu1 %4581 }
 0xe34   : > { %4673 = vst.msk [vmem:[#allocation2 + $0x68] sm:$0xff] %vm4659_vm8, %v4656_v14  ;;  %v4607_v47 = vadd.f32 %v8675_v24, %v4582_v28  ;;  %4744 = vperm.xlu1 %5612, %v4656_v14  }
 0xe35   : > { %v4585_v35 = vpop.xlane.xlu0 %4584 }
 0xe36   : > { %v4641_v19 = vmul.f32 0.25, %v4607_v47  ;;  %v4608_v41 = vadd.f32 %v8675_v24, %v4585_v35 }
 0xe38   : > { %v4657_v42 = vadd.f32 %v4641_v19, %v4625_v39  ;;  %v4642_v8 = vmul.f32 0.25, %v4608_v41 }
 0xe3a   : > { %4674 = vst.msk [vmem:[#allocation2 + $0x70] sm:$0xff] %vm4659_vm8, %v4657_v42  ;;  %v4658_v16 = vadd.f32 %v4642_v8, %v4626_v4  ;;  %4749 = vperm.xlu0 %5611, %v4657_v42  }
 0xe3c   : > { %4675 = vst.msk [vmem:[#allocation2 + $0x78] sm:$0xff] %vm4659_vm8, %v4658_v16  ;;  %4754 = vperm.xlu1 %5612, %v4658_v16  }
 0xe7e   : > { %v4680_v24 = vpop.permute.xlu1 %4679 }
 0xe7f   : > { %v4763_v6 = vmul.f32 %v8712_v33, %v4680_v24 }
 0xe80   : > { %v4685_v60 = vpop.permute.xlu0 %4684 }
 0xe81   : > { %v4786_v59 = vadd.f32 %v8717_v22, %v4763_v6  ;;  %v4764_v27 = vmul.f32 %v8712_v33, %v4685_v60 }
 0xe83   : > { %v4802_v57 = vmax.f32 %v4786_v59, 0.0  ;;  %v4787_v17 = vadd.f32 %v8717_v22, %v4764_v27 }
 0xe85   : > { %v4803_v10 = vmax.f32 %v4787_v17, 0.0  ;;  %v4825_v53 = vmul.f32 %v8725_v56, %v4802_v57 }
 0xe86   : > { %v4690_v43 = vpop.permute.xlu1 %4689 }
 0xe87   : > { %v4765_v26 = vmul.f32 %v8712_v33, %v4690_v43  ;;  %v4841_v38 = vsel %vm4537_vm15, %v4825_v53, 0.0  ;;  %v4826_v20 = vmul.f32 %v8725_v56, %v4803_v10 }
 0xe88   : > { %4842 = vadd.xlane.f32.xlu0 %v4841_v38 }
 0xe89   : > { %v4788_v13 = vadd.f32 %v8717_v22, %v4765_v26  ;;  %v4844_v61 = vsel %vm4537_vm15, %v4826_v20, 0.0 }
 0xe8a   : > { %v4695_v31 = vpop.permute.xlu1 %4694  ;;  %4845 = vadd.xlane.f32.xlu1 %v4844_v61 }
 0xe8b   : > { %v4804_v48 = vmax.f32 %v4788_v13, 0.0  ;;  %v4766_v46 = vmul.f32 %v8712_v33, %v4695_v31 }
 0xe8d   : > { %v4789_v11 = vadd.f32 %v8717_v22, %v4766_v46  ;;  %v4827_v63 = vmul.f32 %v8725_v56, %v4804_v48 }
 0xe8e   : > { %v4700_v18 = vpop.permute.xlu0 %4699 }
 0xe8f   : > { %v4805_v0 = vmax.f32 %v4789_v11, 0.0  ;;  %v4767_v62 = vmul.f32 %v8712_v33, %v4700_v18  ;;  %v4847_v50 = vsel %vm4537_vm15, %v4827_v63, 0.0 }
 0xe90   : > { %4848 = vadd.xlane.f32.xlu0 %v4847_v50  ;;  %v4705_v54 = vpop.permute.xlu1 %4704 }
 0xe91   : > { %v4790_v40 = vadd.f32 %v8717_v22, %v4767_v62  ;;  %v4768_v2 = vmul.f32 %v8712_v33, %v4705_v54  ;;  %v4828_v36 = vmul.f32 %v8725_v56, %v4805_v0 }
 0xe93   : > { %v4806_v5 = vmax.f32 %v4790_v40, 0.0  ;;  %v4791_v32 = vadd.f32 %v8717_v22, %v4768_v2  ;;  %v4850_v12 = vsel %vm4537_vm15, %v4828_v36, 0.0 }
 0xe94   : > { %4851 = vadd.xlane.f32.xlu0 %v4850_v12 }
 0xe95   : > { %v4807_v15 = vmax.f32 %v4791_v32, 0.0  ;;  %v4829_v25 = vmul.f32 %v8725_v56, %v4806_v5 }
 0xe96   : > { %v4710_v45 = vpop.permute.xlu0 %4709 }
 0xe97   : > { %v4769_v7 = vmul.f32 %v8712_v33, %v4710_v45  ;;  %v4853_v23 = vsel %vm4537_vm15, %v4829_v25, 0.0  ;;  %v4830_v3 = vmul.f32 %v8725_v56, %v4807_v15 }
 0xe98   : > { %v4715_v49 = vpop.permute.xlu1 %4714  ;;  %4854 = vadd.xlane.f32.xlu1 %v4853_v23  ;;  %v5282_v23 = vld [vmem:[#allocation5] ss:$0 sm:$0xff] }
 0xe99   : > { %v4792_v52 = vadd.f32 %v8717_v22, %v4769_v7  ;;  %v4770_v34 = vmul.f32 %v8712_v33, %v4715_v49  ;;  %v4856_v30 = vsel %vm4537_vm15, %v4830_v3, 0.0 }
 0xe9a   : > { %4857 = vadd.xlane.f32.xlu0 %v4856_v30 }
 0xe9b   : > { %v4808_v44 = vmax.f32 %v4792_v52, 0.0  ;;  %v4793_v21 = vadd.f32 %v8717_v22, %v4770_v34 }
 0xe9d   : > { %v4809_v1 = vmax.f32 %v4793_v21, 0.0  ;;  %v4831_v58 = vmul.f32 %v8725_v56, %v4808_v44 }
 0xe9e   : > { %v4720_v37 = vpop.permute.xlu0 %4719 }
 0xe9f   : > { %v4771_v9 = vmul.f32 %v8712_v33, %v4720_v37  ;;  %v4859_v51 = vsel %vm4537_vm15, %v4831_v58, 0.0  ;;  %v4832_v29 = vmul.f32 %v8725_v56, %v4809_v1 }
 0xea0   : > { %v4725_v55 = vpop.permute.xlu1 %4724  ;;  %4860 = vadd.xlane.f32.xlu1 %v4859_v51 }
 0xea1   : > { %v4794_v14 = vadd.f32 %v8717_v22, %v4771_v9  ;;  %v4772_v28 = vmul.f32 %v8712_v33, %v4725_v55  ;;  %v4862_v47 = vsel %vm4537_vm15, %v4832_v29, 0.0 }
 0xea2   : > { %4863 = vadd.xlane.f32.xlu0 %v4862_v47 }
 0xea3   : > { %v4810_v39 = vmax.f32 %v4794_v14, 0.0  ;;  %v4795_v35 = vadd.f32 %v8717_v22, %v4772_v28 }
 0xea5   : > { %v4811_v19 = vmax.f32 %v4795_v35, 0.0  ;;  %v4833_v41 = vmul.f32 %v8725_v56, %v4810_v39 }
 0xea7   : > { %v4730_v4 = vpop.permute.xlu0 %4729  ;;  %v4865_v42 = vsel %vm4537_vm15, %v4833_v41, 0.0  ;;  %v4834_v8 = vmul.f32 %v8725_v56, %v4811_v19 }
 0xea8   : > { %v4773_v16 = vmul.f32 %v8712_v33, %v4730_v4  ;;  %v4735_v24 = vpop.permute.xlu1 %4734  ;;  %4866 = vadd.xlane.f32.xlu1 %v4865_v42 }
 0xea9   : > { %v4774_v6 = vmul.f32 %v8712_v33, %v4735_v24  ;;  %v4868_v60 = vsel %vm4537_vm15, %v4834_v8, 0.0 }
 0xeaa   : > { %v4796_v59 = vadd.f32 %v8717_v22, %v4773_v16  ;;  %4869 = vadd.xlane.f32.xlu0 %v4868_v60 }
 0xeab   : > { %v4797_v27 = vadd.f32 %v8717_v22, %v4774_v6 }
 0xeac   : > { %v4812_v57 = vmax.f32 %v4796_v59, 0.0 }
 0xead   : > { %v4813_v17 = vmax.f32 %v4797_v27, 0.0 }
 0xeae   : > { %v4835_v10 = vmul.f32 %v8725_v56, %v4812_v57 }
 0xeaf   : > { %v4836_v53 = vmul.f32 %v8725_v56, %v4813_v17 }
 0xeb0   : > { %v4871_v43 = vsel %vm4537_vm15, %v4835_v10, 0.0 }
 0xeb1   : > { %4872 = vadd.xlane.f32.xlu1 %v4871_v43  ;;  %v4740_v26 = vpop.permute.xlu0 %4739  ;;  %v4874_v38 = vsel %vm4537_vm15, %v4836_v53, 0.0 }
 0xeb2   : > { %v4775_v20 = vmul.f32 %v8712_v33, %v4740_v26  ;;  %4875 = vadd.xlane.f32.xlu0 %v4874_v38 }
 0xeb3   : > { %v4745_v13 = vpop.permute.xlu1 %4744 }
 0xeb4   : > { %v4798_v61 = vadd.f32 %v8717_v22, %v4775_v20  ;;  %v4776_v31 = vmul.f32 %v8712_v33, %v4745_v13 }
 0xeb6   : > { %v4814_v48 = vmax.f32 %v4798_v61, 0.0  ;;  %v4799_v46 = vadd.f32 %v8717_v22, %v4776_v31 }
 0xeb8   : > { %v4815_v11 = vmax.f32 %v4799_v46, 0.0  ;;  %v4837_v63 = vmul.f32 %v8725_v56, %v4814_v48 }
 0xeb9   : > { %v4750_v18 = vpop.permute.xlu0 %4749 }
 0xeba   : > { %v4777_v0 = vmul.f32 %v8712_v33, %v4750_v18  ;;  %v4877_v62 = vsel %vm4537_vm15, %v4837_v63, 0.0  ;;  %v4838_v50 = vmul.f32 %v8725_v56, %v4815_v11 }
 0xebb   : > { %v4755_v54 = vpop.permute.xlu1 %4754  ;;  %4878 = vadd.xlane.f32.xlu1 %v4877_v62 }
 0xebc   : > { %v4800_v40 = vadd.f32 %v8717_v22, %v4777_v0  ;;  %v4778_v2 = vmul.f32 %v8712_v33, %v4755_v54  ;;  %v4880_v36 = vsel %vm4537_vm15, %v4838_v50, 0.0 }
 0xebd   : > { %4881 = vadd.xlane.f32.xlu0 %v4880_v36 }
 0xebe   : > { %v4816_v5 = vmax.f32 %v4800_v40, 0.0  ;;  %v4801_v32 = vadd.f32 %v8717_v22, %v4778_v2 }
 0xec0   : > { %v4817_v12 = vmax.f32 %v4801_v32, 0.0  ;;  %v4839_v15 = vmul.f32 %v8725_v56, %v4816_v5 }
 0xec2   : > { %v4883_v25 = vsel %vm4537_vm15, %v4839_v15, 0.0  ;;  %v4840_v45 = vmul.f32 %v8725_v56, %v4817_v12 }
 0xec3   : > { %4884 = vadd.xlane.f32.xlu1 %v4883_v25 }
 0xec4   : > { %v4886_v7 = vsel %vm4537_vm15, %v4840_v45, 0.0 }
 0xec5   : > { %4887 = vadd.xlane.f32.xlu0 %v4886_v7 }
 0xf15   : > { %v4843_v3 = vpop.xlane.xlu0 %4842 }
 0xf16   : > { %v4896_v33 = vadd.f32 %v5282_v23, %v4843_v3 }
 0xf17   : > { %v4846_v49 = vpop.xlane.xlu1 %4845 }
 0xf18   : > { %4912 = vst.msk [vmem:[%s8886_s27] sm:$0xff] %vm4659_vm8, %v4896_v33  ;;  %v4897_v22 = vadd.f32 %v5282_v23, %v4846_v49 }
 0xf1a   : > { %4913 = vst.msk [vmem:[%s8886_s27 + $0x8] sm:$0xff] %vm4659_vm8, %v4897_v22 }
 0xf1d   : > { %v4849_v56 = vpop.xlane.xlu0 %4848 }
 0xf1e   : > { %v4898_v52 = vadd.f32 %v5282_v23, %v4849_v56 }
 0xf20   : > { %4914 = vst.msk [vmem:[%s8886_s27 + $0x10] sm:$0xff] %vm4659_vm8, %v4898_v52 }
 0xf21   : > { %v4852_v34 = vpop.xlane.xlu0 %4851 }
 0xf22   : > { %v4899_v30 = vadd.f32 %v5282_v23, %v4852_v34 }
 0xf24   : > { %4915 = vst.msk [vmem:[%s8886_s27 + $0x18] sm:$0xff] %vm4659_vm8, %v4899_v30 }
 0xf25   : > { %v4855_v44 = vpop.xlane.xlu1 %4854 }
 0xf26   : > { %v4900_v21 = vadd.f32 %v5282_v23, %v4855_v44 }
 0xf27   : > { %v4858_v1 = vpop.xlane.xlu0 %4857 }
 0xf28   : > { %4916 = vst.msk [vmem:[%s8886_s27 + $0x20] sm:$0xff] %vm4659_vm8, %v4900_v21  ;;  %v4901_v58 = vadd.f32 %v5282_v23, %v4858_v1 }
 0xf2a   : > { %4917 = vst.msk [vmem:[%s8886_s27 + $0x28] sm:$0xff] %vm4659_vm8, %v4901_v58 }
 0xf2d   : > { %v4861_v37 = vpop.xlane.xlu1 %4860 }
 0xf2e   : > { %v4902_v9 = vadd.f32 %v5282_v23, %v4861_v37 }
 0xf2f   : > { %v4864_v51 = vpop.xlane.xlu0 %4863 }
 0xf30   : > { %4918 = vst.msk [vmem:[%s8886_s27 + $0x30] sm:$0xff] %vm4659_vm8, %v4902_v9  ;;  %v4903_v29 = vadd.f32 %v5282_v23, %v4864_v51 }
 0xf32   : > { %4919 = vst.msk [vmem:[%s8886_s27 + $0x38] sm:$0xff] %vm4659_vm8, %v4903_v29 }
 0xf35   : > { %v4867_v55 = vpop.xlane.xlu1 %4866 }
 0xf36   : > { %v4904_v14 = vadd.f32 %v5282_v23, %v4867_v55 }
 0xf37   : > { %v4870_v28 = vpop.xlane.xlu0 %4869 }
 0xf38   : > { %4920 = vst.msk [vmem:[%s8886_s27 + $0x40] sm:$0xff] %vm4659_vm8, %v4904_v14  ;;  %v4905_v47 = vadd.f32 %v5282_v23, %v4870_v28 }
 0xf3a   : > { %4921 = vst.msk [vmem:[%s8886_s27 + $0x48] sm:$0xff] %vm4659_vm8, %v4905_v47 }
 0xf3e   : > { %v4873_v39 = vpop.xlane.xlu1 %4872 }
 0xf3f   : > { %v4906_v35 = vadd.f32 %v5282_v23, %v4873_v39  ;;  %v4876_v19 = vpop.xlane.xlu0 %4875 }
 0xf40   : > { %v4907_v41 = vadd.f32 %v5282_v23, %v4876_v19 }
 0xf41   : > { %4922 = vst.msk [vmem:[%s8886_s27 + $0x50] sm:$0xff] %vm4659_vm8, %v4906_v35 }
 0xf42   : > { %4923 = vst.msk [vmem:[%s8886_s27 + $0x58] sm:$0xff] %vm4659_vm8, %v4907_v41 }
 0xf48   : > { %v4879_v4 = vpop.xlane.xlu1 %4878 }
 0xf49   : > { %v4908_v42 = vadd.f32 %v5282_v23, %v4879_v4 }
 0xf4a   : > { %v4882_v8 = vpop.xlane.xlu0 %4881 }
 0xf4b   : > { %4924 = vst.msk [vmem:[%s8886_s27 + $0x60] sm:$0xff] %vm4659_vm8, %v4908_v42  ;;  %v4909_v16 = vadd.f32 %v5282_v23, %v4882_v8 }
 0xf4d   : > { %4925 = vst.msk [vmem:[%s8886_s27 + $0x68] sm:$0xff] %vm4659_vm8, %v4909_v16 }
 0xf50   : > { %v4885_v24 = vpop.xlane.xlu1 %4884 }
 0xf51   : > { %v4910_v6 = vadd.f32 %v5282_v23, %v4885_v24 }
 0xf52   : > { %v4888_v60 = vpop.xlane.xlu0 %4887 }
 0xf53   : > { %4926 = vst.msk [vmem:[%s8886_s27 + $0x70] sm:$0xff] %vm4659_vm8, %v4910_v6  ;;  %v4911_v59 = vadd.f32 %v5282_v23, %v4888_v60 }
 0xf55   : > { %4927 = vst.msk [vmem:[%s8886_s27 + $0x78] sm:$0xff] %vm4659_vm8, %v4911_v59 }
 0xf56 PF: > { %s43_s10 = sadd.s32 1, %s5899_s10   ;;  %s8981_s28 = smov %s5895_s0 }
 0xf57   : > { %p40_p6 = scmp.ge.s32.totalorder %s43_s10, 4   ;;  %s8982_s0 = smov %s8984_s18 }
 0xf59   :  { %42 = sbr.rel (!%p40_p6) target bundleno = 13 (0xd), region = 183 }

</bundles_post_ra>
